<compile_context>
chip_gen: v6e
topology: v6e:2x2x1
jax: 0.10.0
libtpu: 0.0.40
codegen_flags: <defaults>
</compile_context>

<pallas_src>
import functools
import math

import jax
import jax.numpy as jnp
from jax import lax
from jax.experimental import pallas as pl
from jax.experimental.pallas import tpu as pltpu


# ----------------------------- in-kernel helpers -----------------------------

def _ln(x, g, b):
    """Harvard LayerNorm: unbiased std (ddof=1), eps added to std (NOT inside sqrt)."""
    d = x.shape[-1]
    mean = jnp.mean(x, axis=-1, keepdims=True)
    var = jnp.sum((x - mean) ** 2, axis=-1, keepdims=True) * (1.0 / (d - 1))
    std = jnp.sqrt(var)
    inv = pl.reciprocal(std + 1e-6, approx=False)
    return g * (x - mean) * inv + b


# ----------------------------- fused sublayer kernels -------------------------

def _attn_kernel(xq_ref, kv_src_ref, mask_ref, g_ref, b_ref,
                 wq_ref, bq_ref, wkv_ref, bkv_ref, wo_ref, bo_ref,
                 o_ref, kv_scr, ctx_scr, *, H, dk, tq, causal, ln_kv):
    """out_tile = x_tile + MHA(LN(x_tile), kv_src)   (all heads, one q row-tile).

    Self-attention : kv_src = x        (ln_kv=True,  causal per flag)
    Cross-attention: kv_src = memory   (ln_kv=False, causal=False)
    K/V are projected once per batch element (q-tile 0) into bf16 VMEM scratch.
    """
    D = H * dk
    qi = pl.program_id(1)

    @pl.when(qi == 0)
    def _():
        src = kv_src_ref[0]                                       # (Lk, D) f32
        if ln_kv:
            src = _ln(src, g_ref[...], b_ref[...])
        kv = jnp.dot(src.astype(jnp.bfloat16), wkv_ref[...],
                     preferred_element_type=jnp.float32) + bkv_ref[...]
        kv_scr[...] = kv.astype(jnp.bfloat16)                     # (Lk, 2D)

    x = xq_ref[0]                                                 # (tq, D) f32
    y = _ln(x, g_ref[...], b_ref[...])
    q = (jnp.dot(y.astype(jnp.bfloat16), wq_ref[...],
                 preferred_element_type=jnp.float32) + bq_ref[...]).astype(jnp.bfloat16)

    Lk = kv_scr.shape[0]
    # Additive mask bias, hoisted out of the head loop.  Key padding comes from the
    # (1, Lk) mask block; the causal part is generated in-kernel (never touches HBM).
    bias = (mask_ref[0] - 1.0) * 1e9                              # (1, Lk)
    if causal:
        rows = lax.broadcasted_iota(jnp.int32, (tq, Lk), 0) + qi * tq
        cols = lax.broadcasted_iota(jnp.int32, (tq, Lk), 1)
        bias = bias + jnp.where(rows >= cols, 0.0, -1e9)          # (tq, Lk)

    kv = kv_scr[...]                                              # (Lk, 2D) bf16
    for hh in range(H):                                           # H is small & static
        sl = slice(hh * dk, (hh + 1) * dk)
        k_h = kv[:, sl]                                           # (Lk, dk)
        v_h = kv[:, D + hh * dk: D + (hh + 1) * dk]               # (Lk, dk)
        s = lax.dot_general(q[:, sl], k_h, (((1,), (1,)), ((), ())),
                            preferred_element_type=jnp.float32)   # (tq, Lk)
        s = s + bias
        s = s - jnp.max(s, axis=-1, keepdims=True)
        p = jnp.exp(s)
        p = p * pl.reciprocal(jnp.sum(p, axis=-1, keepdims=True), approx=True)
        ctx_scr[:, sl] = jnp.dot(p.astype(jnp.bfloat16), v_h,
                                 preferred_element_type=jnp.float32)  # (tq, dk)

    # Single full-depth output projection (contraction dim = D, not dk).
    attn = jnp.dot(ctx_scr[...].astype(jnp.bfloat16), wo_ref[...],
                   preferred_element_type=jnp.float32)             # (tq, D)
    o_ref[0] = x + attn + bo_ref[...]


def _ffn_kernel(*refs, final_ln):
    """x + FFN(LN(x)) on a (tm, D) row tile; optionally fused trailing stack LayerNorm."""
    if final_ln:
        (x_ref, g_ref, b_ref, w1_ref, b1_ref, w2_ref, b2_ref,
         gf_ref, bf_ref, o_ref) = refs
    else:
        x_ref, g_ref, b_ref, w1_ref, b1_ref, w2_ref, b2_ref, o_ref = refs
    x = x_ref[...]
    y = _ln(x, g_ref[...], b_ref[...])
    hid = jnp.maximum(
        jnp.dot(y.astype(jnp.bfloat16), w1_ref[...],
                preferred_element_type=jnp.float32) + b1_ref[...], 0.0)
    out = x + jnp.dot(hid.astype(jnp.bfloat16), w2_ref[...],
                      preferred_element_type=jnp.float32) + b2_ref[...]
    if final_ln:
        out = _ln(out, gf_ref[...], bf_ref[...])
    o_ref[...] = out


# ----------------------------- pallas_call wrappers ---------------------------

def _round_up(x, m):
    return (x + m - 1) // m * m


def _q_tile(L, target=128):
    """Query row-tile: multiple-of-8 divisor of L up to `target` (full extent fallback)."""
    if L <= target:
        return L
    t = target - (target % 8)
    while t >= 8:
        if L % t == 0:
            return t
        t -= 8
    return L


def attn_sublayer(p_attn, p_ln, x, kv_src, key_mask, h, *, causal, ln_kv):
    """x: (B, Lq, D); kv_src: (B, Lk, D); key_mask: (B, 1, Lk) in {0,1}."""
    B, Lq, D = x.shape
    Lk = kv_src.shape[1]
    dk = D // h
    tq = _q_tile(Lq)
    nq = Lq // tq
    km = key_mask.astype(jnp.float32)
    kernel = functools.partial(_attn_kernel, H=h, dk=dk, tq=tq,
                               causal=causal, ln_kv=ln_kv)
    bcast = lambda b, i: (0, 0)
    return pl.pallas_call(
        kernel,
        out_shape=jax.ShapeDtypeStruct((B, Lq, D), jnp.float32),
        grid=(B, nq),
        in_specs=[
            pl.BlockSpec((1, tq, D), lambda b, i: (b, i, 0)),   # query tile
            pl.BlockSpec((1, Lk, D), lambda b, i: (b, 0, 0)),   # K/V source (per-b invariant)
            pl.BlockSpec((1, 1, Lk), lambda b, i: (b, 0, 0)),   # key padding mask
            pl.BlockSpec((1, D), bcast),                        # LN gamma
            pl.BlockSpec((1, D), bcast),                        # LN beta
            pl.BlockSpec((D, D), bcast),                        # Wq (scale folded, bf16)
            pl.BlockSpec((1, D), bcast),                        # bq
            pl.BlockSpec((D, 2 * D), bcast),                    # Wkv packed (bf16)
            pl.BlockSpec((1, 2 * D), bcast),                    # bkv
            pl.BlockSpec((D, D), bcast),                        # Wo (bf16)
            pl.BlockSpec((1, D), bcast),                        # bo
        ],
        out_specs=pl.BlockSpec((1, tq, D), lambda b, i: (b, i, 0)),
        scratch_shapes=[pltpu.VMEM((Lk, 2 * D), jnp.bfloat16),  # projected K|V
                        pltpu.VMEM((tq, D), jnp.float32)],      # concat_h ctx_h
        compiler_params=pltpu.CompilerParams(
            dimension_semantics=("parallel", "arbitrary")),
    )(x, kv_src, km, p_ln["g"], p_ln["b"],
      p_attn["wq"], p_attn["bq"], p_attn["wkv"], p_attn["bkv"],
      p_attn["wo"], p_attn["bo"])


def ffn_sublayer(p_ffn, p_ln, x, final_ln_params=None):
    """x + FFN(LN(x)); row-tiled grid over B*L (padded to the tile), optional fused final LN."""
    B, L, D = x.shape
    F = p_ffn["w1"].shape[1]
    M = B * L
    tm = min(512, _round_up(M, 8))
    Mp = _round_up(M, tm)
    x2 = x.reshape(M, D)
    if Mp != M:
        x2 = jnp.pad(x2, ((0, Mp - M), (0, 0)))
    final_ln = final_ln_params is not None
    kernel = functools.partial(_ffn_kernel, final_ln=final_ln)
    bcast = lambda i: (0, 0)
    in_specs = [
        pl.BlockSpec((tm, D), lambda i: (i, 0)),
        pl.BlockSpec((1, D), bcast),
        pl.BlockSpec((1, D), bcast),
        pl.BlockSpec((D, F), bcast),
        pl.BlockSpec((1, F), bcast),
        pl.BlockSpec((F, D), bcast),
        pl.BlockSpec((1, D), bcast),
    ]
    args = [x2, p_ln["g"], p_ln["b"],
            p_ffn["w1"], p_ffn["b1"], p_ffn["w2"], p_ffn["b2"]]
    if final_ln:
        in_specs += [pl.BlockSpec((1, D), bcast), pl.BlockSpec((1, D), bcast)]
        args += [final_ln_params["g"], final_ln_params["b"]]
    out = pl.pallas_call(
        kernel,
        out_shape=jax.ShapeDtypeStruct((Mp, D), jnp.float32),
        grid=(Mp // tm,),
        in_specs=in_specs,
        out_specs=pl.BlockSpec((tm, D), lambda i: (i, 0)),
        compiler_params=pltpu.CompilerParams(dimension_semantics=("parallel",)),
    )(*args)
    return out[:M].reshape(B, L, D)


# ----------------------------- model (JAX glue) -------------------------------

def embed(table, tokens, d_model, pe):
    # nn.Embedding lookup * sqrt(d_model) + sinusoidal positional encoding (eval: no dropout)
    x = jnp.take(table, tokens, axis=0) * math.sqrt(d_model)
    return x + pe[None, : tokens.shape[1], :]


def _key_mask(mask, causal):
    """Reduce an attention mask to its (B, 1, Lk) key-padding component.

    TODO(synk): masks of the Annotated-Transformer form (key padding, optionally AND-ed with
    the causal triangle) are handled exactly; arbitrary per-query tgt masks are not
    representable because the causal part is regenerated in-kernel.
    """
    m = mask.astype(jnp.float32)
    if m.shape[1] == 1:
        return m
    return m[:, -1:, :] if causal else m[:, :1, :]


def encoder_layer(p, x, src_key_mask, h, final_ln_params=None):
    x = attn_sublayer(p["attn"], p["ln1"], x, x, src_key_mask, h,
                      causal=False, ln_kv=True)
    x = ffn_sublayer(p["ffn"], p["ln2"], x, final_ln_params)
    return x


def decoder_layer(p, x, memory, src_key_mask, tgt_key_mask, h, final_ln_params=None):
    x = attn_sublayer(p["self_attn"], p["ln1"], x, x, tgt_key_mask, h,
                      causal=True, ln_kv=True)
    x = attn_sublayer(p["src_attn"], p["ln2"], x, memory, src_key_mask, h,
                      causal=False, ln_kv=False)
    x = ffn_sublayer(p["ffn"], p["ln3"], x, final_ln_params)
    return x


def encode(pp, src, src_mask, h, d_model):
    x = embed(pp["src_emb"], src, d_model, pp["pe"])
    skm = _key_mask(src_mask, causal=False)
    n = len(pp["enc_layers"])
    for li, lp in enumerate(pp["enc_layers"]):
        fin = pp["enc_norm"] if li == n - 1 else None   # final stack LN fused into last FFN
        x = encoder_layer(lp, x, skm, h, final_ln_params=fin)
    return x


def decode(pp, memory, src_mask, tgt, tgt_mask, h, d_model):
    x = embed(pp["tgt_emb"], tgt, d_model, pp["pe"])
    skm = _key_mask(src_mask, causal=False)
    tkm = _key_mask(tgt_mask, causal=True)
    n = len(pp["dec_layers"])
    for li, lp in enumerate(pp["dec_layers"]):
        fin = pp["dec_norm"] if li == n - 1 else None
        x = decoder_layer(lp, x, memory, skm, tkm, h, final_ln_params=fin)
    return x


def encoder_decoder_forward(pp, src, tgt, src_mask, tgt_mask, h, d_model):
    memory = encode(pp, src, src_mask, h, d_model)
    return decode(pp, memory, src_mask, tgt, tgt_mask, h, d_model)


# ----------------------------- parameter init / packing -----------------------

def _dense(key, din, dout):
    return (0.02 * jax.random.normal(key, (din, dout), jnp.float32),
            jnp.zeros((dout,), jnp.float32))


def _init_mha(key, d_model):
    k1, k2, k3, k4 = jax.random.split(key, 4)
    wq, bq = _dense(k1, d_model, d_model)
    wk, bk = _dense(k2, d_model, d_model)
    wv, bv = _dense(k3, d_model, d_model)
    wo, bo = _dense(k4, d_model, d_model)
    return dict(wq=wq, bq=bq, wk=wk, bk=bk, wv=wv, bv=bv, wo=wo, bo=bo)


def _init_ffn(key, d_model, d_ff):
    k1, k2 = jax.random.split(key)
    w1, b1 = _dense(k1, d_model, d_ff)
    w2, b2 = _dense(k2, d_ff, d_model)
    return dict(w1=w1, b1=b1, w2=w2, b2=b2)


def _init_ln(d_model):
    return dict(g=jnp.ones((d_model,), jnp.float32),
                b=jnp.zeros((d_model,), jnp.float32))


def _positional_encoding(max_len, d_model):
    pos = jnp.arange(max_len, dtype=jnp.float32)[:, None]
    div = jnp.exp(jnp.arange(0, d_model, 2, dtype=jnp.float32)
                  * (-math.log(10000.0) / d_model))
    pe = jnp.zeros((max_len, d_model), jnp.float32)
    pe = pe.at[:, 0::2].set(jnp.sin(pos * div))
    pe = pe.at[:, 1::2].set(jnp.cos(pos * div))
    return pe


def init_params(key, src_vocab, tgt_vocab, d_model, d_ff, h, n_layers, max_len=64):
    keys = jax.random.split(key, 2 + 2 * n_layers + 3 * n_layers + 2)
    ki = iter(keys)
    params = dict(
        src_emb=0.02 * jax.random.normal(next(ki), (src_vocab, d_model), jnp.float32),
        tgt_emb=0.02 * jax.random.normal(next(ki), (tgt_vocab, d_model), jnp.float32),
        pe=_positional_encoding(max_len, d_model),
        enc_layers=[], dec_layers=[],
        enc_norm=_init_ln(d_model), dec_norm=_init_ln(d_model),
    )
    for _ in range(n_layers):
        params["enc_layers"].append(dict(
            ln1=_init_ln(d_model), attn=_init_mha(next(ki), d_model),
            ln2=_init_ln(d_model), ffn=_init_ffn(next(ki), d_model, d_ff)))
    for _ in range(n_layers):
        params["dec_layers"].append(dict(
            ln1=_init_ln(d_model), self_attn=_init_mha(next(ki), d_model),
            ln2=_init_ln(d_model), src_attn=_init_mha(next(ki), d_model),
            ln3=_init_ln(d_model), ffn=_init_ffn(next(ki), d_model, d_ff)))
    return params


def pack_params(params, h):
    """One-time packing: fold 1/sqrt(dk) into Wq/bq, fuse K|V weights, cast matmul weights to
    bf16 (f32 accumulation in-kernel), reshape biases & LN params to (1, N) broadcast blocks."""
    d = params["pe"].shape[-1]
    dk = d // h
    scale = 1.0 / math.sqrt(dk)

    def pack_attn(p):
        return dict(
            wq=(p["wq"] * scale).astype(jnp.bfloat16),
            bq=(p["bq"] * scale).reshape(1, d),
            wkv=jnp.concatenate([p["wk"], p["wv"]], axis=1).astype(jnp.bfloat16),
            bkv=jnp.concatenate([p["bk"], p["bv"]]).reshape(1, 2 * d),
            wo=p["wo"].astype(jnp.bfloat16),
            bo=p["bo"].reshape(1, d))

    def pack_ln(p):
        return dict(g=p["g"].reshape(1, d), b=p["b"].reshape(1, d))

    def pack_ffn(p):
        f = p["w1"].shape[1]
        return dict(w1=p["w1"].astype(jnp.bfloat16), b1=p["b1"].reshape(1, f),
                    w2=p["w2"].astype(jnp.bfloat16), b2=p["b2"].reshape(1, d))

    return dict(
        src_emb=params["src_emb"], tgt_emb=params["tgt_emb"], pe=params["pe"],
        enc_norm=pack_ln(params["enc_norm"]), dec_norm=pack_ln(params["dec_norm"]),
        enc_layers=[dict(ln1=pack_ln(lp["ln1"]), attn=pack_attn(lp["attn"]),
                         ln2=pack_ln(lp["ln2"]), ffn=pack_ffn(lp["ffn"]))
                    for lp in params["enc_layers"]],
        dec_layers=[dict(ln1=pack_ln(lp["ln1"]), self_attn=pack_attn(lp["self_attn"]),
                         ln2=pack_ln(lp["ln2"]), src_attn=pack_attn(lp["src_attn"]),
                         ln3=pack_ln(lp["ln3"]), ffn=pack_ffn(lp["ffn"]))
                    for lp in params["dec_layers"]],
    )


# ----------------------------------- main -------------------------------------

if __name__ == "__main__":
    B, L_SRC, L_TGT = 2, 8, 8
    D_MODEL, D_FF, H, N_LAYERS = 32, 64, 4, 2
    SRC_VOCAB = TGT_VOCAB = 16

    root = jax.random.PRNGKey(0)
    kp, ksrc, ktgt = jax.random.split(root, 3)

    raw_params = init_params(kp, SRC_VOCAB, TGT_VOCAB, D_MODEL, D_FF, H, N_LAYERS)
    params = pack_params(raw_params, H)

    src = jax.random.randint(ksrc, (B, L_SRC), 1, SRC_VOCAB, dtype=jnp.int32)
    tgt = jax.random.randint(ktgt, (B, L_TGT), 1, TGT_VOCAB, dtype=jnp.int32)
    src_mask = jnp.ones((B, 1, L_SRC), jnp.float32)                      # (B, 1, Lsrc) padding
    tgt_mask = jnp.broadcast_to(                                          # causal (B, Ltgt, Ltgt)
        jnp.tril(jnp.ones((L_TGT, L_TGT), jnp.float32))[None], (B, L_TGT, L_TGT))

    fwd = jax.jit(encoder_decoder_forward, static_argnames=("h", "d_model"))
    out = fwd(params, src, tgt, src_mask, tgt_mask, h=H, d_model=D_MODEL)
    out = jax.block_until_ready(out)

    assert out.shape == (B, L_TGT, D_MODEL)
    assert bool(jnp.all(jnp.isfinite(out)))
    print("KERNEL_OK")
</pallas_src>

<mosaic_0001>
module attributes {stable_mosaic.version = 11 : i64} {
  func.func @_attn_kernel(%arg0: i32, %arg1: i32, %arg2: memref<1x8x32xf32, #tpu.memory_space<vmem>>, %arg3: memref<1x8x32xf32, #tpu.memory_space<vmem>>, %arg4: memref<1x1x8xf32, #tpu.memory_space<vmem>>, %arg5: memref<1x32xf32, #tpu.memory_space<vmem>>, %arg6: memref<1x32xf32, #tpu.memory_space<vmem>>, %arg7: memref<32x32xbf16, #tpu.memory_space<vmem>>, %arg8: memref<1x32xf32, #tpu.memory_space<vmem>>, %arg9: memref<32x64xbf16, #tpu.memory_space<vmem>>, %arg10: memref<1x64xf32, #tpu.memory_space<vmem>>, %arg11: memref<32x32xbf16, #tpu.memory_space<vmem>>, %arg12: memref<1x32xf32, #tpu.memory_space<vmem>>, %arg13: memref<1x8x32xf32, #tpu.memory_space<vmem>>, %arg14: memref<8x64xbf16, #tpu.memory_space<vmem>>, %arg15: memref<8x32xf32, #tpu.memory_space<vmem>>) attributes {dimension_semantics = [#tpu.dimension_semantics<parallel>, #tpu.dimension_semantics<arbitrary>], iteration_bounds = array<i64: 2, 1>, scalar_prefetch = 0 : i64, scratch_operands = 2 : i64, tpu.core_type = #tpu.core_type<tc>, window_params = [{transform_indices = @transform_0, window_bounds = array<i64: 1, 8, 32>}, {transform_indices = @transform_1, window_bounds = array<i64: 1, 8, 32>}, {transform_indices = @transform_2, window_bounds = array<i64: 1, 1, 8>}, {pipeline_mode = #tpu.pipeline_mode<synchronous>, transform_indices = @transform_3, window_bounds = array<i64: 1, 32>}, {pipeline_mode = #tpu.pipeline_mode<synchronous>, transform_indices = @transform_4, window_bounds = array<i64: 1, 32>}, {pipeline_mode = #tpu.pipeline_mode<synchronous>, transform_indices = @transform_5, window_bounds = array<i64: 32, 32>}, {pipeline_mode = #tpu.pipeline_mode<synchronous>, transform_indices = @transform_6, window_bounds = array<i64: 1, 32>}, {pipeline_mode = #tpu.pipeline_mode<synchronous>, transform_indices = @transform_7, window_bounds = array<i64: 32, 64>}, {pipeline_mode = #tpu.pipeline_mode<synchronous>, transform_indices = @transform_8, window_bounds = array<i64: 1, 64>}, {pipeline_mode = #tpu.pipeline_mode<synchronous>, transform_indices = @transform_9, window_bounds = array<i64: 32, 32>}, {pipeline_mode = #tpu.pipeline_mode<synchronous>, transform_indices = @transform_10, window_bounds = array<i64: 1, 32>}, {transform_indices = @transform_11, window_bounds = array<i64: 1, 8, 32>}]} {
    %c0_i32 = arith.constant 0 : i32
    %0 = arith.cmpi eq, %arg1, %c0_i32 : i32
    %1 = arith.extui %0 : i1 to i32
    %c0_i32_0 = arith.constant 0 : i32
    %2 = arith.cmpi ne, %1, %c0_i32_0 : i32
    scf.if %2 {
      %c0_54 = arith.constant 0 : index
      %c0_55 = arith.constant 0 : index
      %c0_56 = arith.constant 0 : index
      %131 = vector.load %arg3[%c0_54, %c0_55, %c0_56] : memref<1x8x32xf32, #tpu.memory_space<vmem>>, vector<1x8x32xf32>
      %132 = vector.shape_cast %131 : vector<1x8x32xf32> to vector<8x32xf32>
      %c0_57 = arith.constant 0 : index
      %c0_58 = arith.constant 0 : index
      %133 = vector.load %arg5[%c0_57, %c0_58] : memref<1x32xf32, #tpu.memory_space<vmem>>, vector<1x32xf32>
      %c0_59 = arith.constant 0 : index
      %c0_60 = arith.constant 0 : index
      %134 = vector.load %arg6[%c0_59, %c0_60] : memref<1x32xf32, #tpu.memory_space<vmem>>, vector<1x32xf32>
      %cst_61 = arith.constant dense<0.000000e+00> : vector<8xf32>
      %135 = vector.multi_reduction <add>, %132, %cst_61 [1] : vector<8x32xf32> to vector<8xf32>
      %136 = vector.shape_cast %135 : vector<8xf32> to vector<8x1xf32>
      %cst_62 = arith.constant 3.200000e+01 : f32
      %137 = vector.broadcast %cst_62 : f32 to vector<8x1xf32>
      %138 = arith.divf %136, %137 : vector<8x1xf32>
      %139 = vector.broadcast %138 : vector<8x1xf32> to vector<8x32xf32>
      %140 = arith.subf %132, %139 : vector<8x32xf32>
      %141 = arith.mulf %140, %140 : vector<8x32xf32>
      %cst_63 = arith.constant dense<0.000000e+00> : vector<8xf32>
      %142 = vector.multi_reduction <add>, %141, %cst_63 [1] : vector<8x32xf32> to vector<8xf32>
      %143 = vector.shape_cast %142 : vector<8xf32> to vector<8x1xf32>
      %cst_64 = arith.constant 0.0322580636 : f32
      %144 = vector.broadcast %cst_64 : f32 to vector<8x1xf32>
      %145 = arith.mulf %143, %144 : vector<8x1xf32>
      %146 = math.sqrt %145 : vector<8x1xf32>
      %cst_65 = arith.constant 9.99999997E-7 : f32
      %147 = vector.broadcast %cst_65 : f32 to vector<8x1xf32>
      %148 = arith.addf %146, %147 : vector<8x1xf32>
      %149 = tpu.reciprocal %148 : vector<8x1xf32> -> vector<8x1xf32>
      %150 = vector.broadcast %138 : vector<8x1xf32> to vector<8x32xf32>
      %151 = arith.subf %132, %150 : vector<8x32xf32>
      %152 = vector.broadcast %133 : vector<1x32xf32> to vector<8x32xf32>
      %153 = arith.mulf %152, %151 : vector<8x32xf32>
      %154 = vector.broadcast %149 : vector<8x1xf32> to vector<8x32xf32>
      %155 = arith.mulf %153, %154 : vector<8x32xf32>
      %156 = vector.broadcast %134 : vector<1x32xf32> to vector<8x32xf32>
      %157 = arith.addf %155, %156 : vector<8x32xf32>
      %158 = arith.truncf %157 : vector<8x32xf32> to vector<8x32xbf16>
      %c0_66 = arith.constant 0 : index
      %c0_67 = arith.constant 0 : index
      %159 = vector.load %arg9[%c0_66, %c0_67] : memref<32x64xbf16, #tpu.memory_space<vmem>>, vector<32x64xbf16>
      %cst_68 = arith.constant dense<0.000000e+00> : vector<8x64xf32>
      %160 = tpu.matmul %158, %159, %cst_68 {dimension_numbers = #tpu.dot_dimension_numbers<[1], [0], [0], [1], [0, 0, 1, 1], [], []>} : vector<8x32xbf16>, vector<32x64xbf16>, vector<8x64xf32> -> vector<8x64xf32>
      %c0_69 = arith.constant 0 : index
      %c0_70 = arith.constant 0 : index
      %161 = vector.load %arg10[%c0_69, %c0_70] : memref<1x64xf32, #tpu.memory_space<vmem>>, vector<1x64xf32>
      %162 = vector.broadcast %161 : vector<1x64xf32> to vector<8x64xf32>
      %163 = arith.addf %160, %162 : vector<8x64xf32>
      %164 = arith.truncf %163 : vector<8x64xf32> to vector<8x64xbf16>
      %c0_71 = arith.constant 0 : index
      %c0_72 = arith.constant 0 : index
      %165 = vector.load %arg14[%c0_71, %c0_72] : memref<8x64xbf16, #tpu.memory_space<vmem>>, vector<8x64xbf16>
      tpu.vector_store %arg14[%c0_71, %c0_72], %164 {strides = array<i32>} : memref<8x64xbf16, #tpu.memory_space<vmem>>, vector<8x64xbf16>,
    } else {
    }
    %c0 = arith.constant 0 : index
    %c0_1 = arith.constant 0 : index
    %c0_2 = arith.constant 0 : index
    %3 = vector.load %arg2[%c0, %c0_1, %c0_2] : memref<1x8x32xf32, #tpu.memory_space<vmem>>, vector<1x8x32xf32>
    %4 = vector.shape_cast %3 : vector<1x8x32xf32> to vector<8x32xf32>
    %c0_3 = arith.constant 0 : index
    %c0_4 = arith.constant 0 : index
    %5 = vector.load %arg5[%c0_3, %c0_4] : memref<1x32xf32, #tpu.memory_space<vmem>>, vector<1x32xf32>
    %c0_5 = arith.constant 0 : index
    %c0_6 = arith.constant 0 : index
    %6 = vector.load %arg6[%c0_5, %c0_6] : memref<1x32xf32, #tpu.memory_space<vmem>>, vector<1x32xf32>
    %cst = arith.constant dense<0.000000e+00> : vector<8xf32>
    %7 = vector.multi_reduction <add>, %4, %cst [1] : vector<8x32xf32> to vector<8xf32>
    %8 = vector.shape_cast %7 : vector<8xf32> to vector<8x1xf32>
    %cst_7 = arith.constant 3.200000e+01 : f32
    %9 = vector.broadcast %cst_7 : f32 to vector<8x1xf32>
    %10 = arith.divf %8, %9 : vector<8x1xf32>
    %11 = vector.broadcast %10 : vector<8x1xf32> to vector<8x32xf32>
    %12 = arith.subf %4, %11 : vector<8x32xf32>
    %13 = arith.mulf %12, %12 : vector<8x32xf32>
    %cst_8 = arith.constant dense<0.000000e+00> : vector<8xf32>
    %14 = vector.multi_reduction <add>, %13, %cst_8 [1] : vector<8x32xf32> to vector<8xf32>
    %15 = vector.shape_cast %14 : vector<8xf32> to vector<8x1xf32>
    %cst_9 = arith.constant 0.0322580636 : f32
    %16 = vector.broadcast %cst_9 : f32 to vector<8x1xf32>
    %17 = arith.mulf %15, %16 : vector<8x1xf32>
    %18 = math.sqrt %17 : vector<8x1xf32>
    %cst_10 = arith.constant 9.99999997E-7 : f32
    %19 = vector.broadcast %cst_10 : f32 to vector<8x1xf32>
    %20 = arith.addf %18, %19 : vector<8x1xf32>
    %21 = tpu.reciprocal %20 : vector<8x1xf32> -> vector<8x1xf32>
    %22 = vector.broadcast %10 : vector<8x1xf32> to vector<8x32xf32>
    %23 = arith.subf %4, %22 : vector<8x32xf32>
    %24 = vector.broadcast %5 : vector<1x32xf32> to vector<8x32xf32>
    %25 = arith.mulf %24, %23 : vector<8x32xf32>
    %26 = vector.broadcast %21 : vector<8x1xf32> to vector<8x32xf32>
    %27 = arith.mulf %25, %26 : vector<8x32xf32>
    %28 = vector.broadcast %6 : vector<1x32xf32> to vector<8x32xf32>
    %29 = arith.addf %27, %28 : vector<8x32xf32>
    %30 = arith.truncf %29 : vector<8x32xf32> to vector<8x32xbf16>
    %c0_11 = arith.constant 0 : index
    %c0_12 = arith.constant 0 : index
    %31 = vector.load %arg7[%c0_11, %c0_12] : memref<32x32xbf16, #tpu.memory_space<vmem>>, vector<32x32xbf16>
    %cst_13 = arith.constant dense<0.000000e+00> : vector<8x32xf32>
    %32 = tpu.matmul %30, %31, %cst_13 {dimension_numbers = #tpu.dot_dimension_numbers<[1], [0], [0], [1], [0, 0, 1, 1], [], []>} : vector<8x32xbf16>, vector<32x32xbf16>, vector<8x32xf32> -> vector<8x32xf32>
    %c0_14 = arith.constant 0 : index
    %c0_15 = arith.constant 0 : index
    %33 = vector.load %arg8[%c0_14, %c0_15] : memref<1x32xf32, #tpu.memory_space<vmem>>, vector<1x32xf32>
    %34 = vector.broadcast %33 : vector<1x32xf32> to vector<8x32xf32>
    %35 = arith.addf %32, %34 : vector<8x32xf32>
    %36 = arith.truncf %35 : vector<8x32xf32> to vector<8x32xbf16>
    %c0_16 = arith.constant 0 : index
    %c0_17 = arith.constant 0 : index
    %c0_18 = arith.constant 0 : index
    %37 = vector.load %arg4[%c0_16, %c0_17, %c0_18] : memref<1x1x8xf32, #tpu.memory_space<vmem>>, vector<1x1x8xf32>
    %38 = vector.shape_cast %37 : vector<1x1x8xf32> to vector<1x8xf32>
    %cst_19 = arith.constant 1.000000e+00 : f32
    %39 = vector.broadcast %cst_19 : f32 to vector<1x8xf32>
    %40 = arith.subf %38, %39 : vector<1x8xf32>
    %cst_20 = arith.constant 1.000000e+09 : f32
    %41 = vector.broadcast %cst_20 : f32 to vector<1x8xf32>
    %42 = arith.mulf %40, %41 : vector<1x8xf32>
    %c0_21 = arith.constant 0 : index
    %c0_22 = arith.constant 0 : index
    %43 = vector.load %arg14[%c0_21, %c0_22] : memref<8x64xbf16, #tpu.memory_space<vmem>>, vector<8x64xbf16>
    %44 = vector.extract_strided_slice %43 {offsets = [0, 0], sizes = [8, 8], strides = [1, 1]} : vector<8x64xbf16> to vector<8x8xbf16>
    %45 = vector.extract_strided_slice %43 {offsets = [0, 32], sizes = [8, 8], strides = [1, 1]} : vector<8x64xbf16> to vector<8x8xbf16>
    %46 = vector.extract_strided_slice %36 {offsets = [0, 0], sizes = [8, 8], strides = [1, 1]} : vector<8x32xbf16> to vector<8x8xbf16>
    %cst_23 = arith.constant dense<0.000000e+00> : vector<8x8xf32>
    %47 = tpu.matmul %46, %44, %cst_23 {dimension_numbers = #tpu.dot_dimension_numbers<[1], [1], [0], [0], [0, 0, 1, 0], [], []>} : vector<8x8xbf16>, vector<8x8xbf16>, vector<8x8xf32> -> vector<8x8xf32>
    %48 = vector.broadcast %42 : vector<1x8xf32> to vector<8x8xf32>
    %49 = arith.addf %47, %48 : vector<8x8xf32>
    %cst_24 = arith.constant dense<0xFF800000> : vector<8xf32>
    %50 = vector.multi_reduction <maximumf>, %49, %cst_24 [1] : vector<8x8xf32> to vector<8xf32>
    %51 = vector.shape_cast %50 : vector<8xf32> to vector<8x1xf32>
    %52 = vector.broadcast %51 : vector<8x1xf32> to vector<8x8xf32>
    %53 = arith.subf %49, %52 : vector<8x8xf32>
    %54 = math.exp %53 : vector<8x8xf32>
    %cst_25 = arith.constant dense<0.000000e+00> : vector<8xf32>
    %55 = vector.multi_reduction <add>, %54, %cst_25 [1] : vector<8x8xf32> to vector<8xf32>
    %56 = vector.shape_cast %55 : vector<8xf32> to vector<8x1xf32>
    %57 = tpu.reciprocal %56 {approx = true} : vector<8x1xf32> -> vector<8x1xf32>
    %58 = vector.broadcast %57 : vector<8x1xf32> to vector<8x8xf32>
    %59 = arith.mulf %54, %58 : vector<8x8xf32>
    %60 = arith.truncf %59 : vector<8x8xf32> to vector<8x8xbf16>
    %cst_26 = arith.constant dense<0.000000e+00> : vector<8x8xf32>
    %61 = tpu.matmul %60, %45, %cst_26 {dimension_numbers = #tpu.dot_dimension_numbers<[1], [0], [0], [1], [0, 0, 1, 1], [], []>} : vector<8x8xbf16>, vector<8x8xbf16>, vector<8x8xf32> -> vector<8x8xf32>
    %c0_27 = arith.constant 0 : index
    %c0_28 = arith.constant 0 : index
    %62 = vector.load %arg15[%c0_27, %c0_28] : memref<8x32xf32, #tpu.memory_space<vmem>>, vector<8x8xf32>
    tpu.vector_store %arg15[%c0_27, %c0_28], %61 {strides = array<i32>} : memref<8x32xf32, #tpu.memory_space<vmem>>, vector<8x8xf32>,
    %63 = vector.extract_strided_slice %43 {offsets = [0, 8], sizes = [8, 8], strides = [1, 1]} : vector<8x64xbf16> to vector<8x8xbf16>
    %64 = vector.extract_strided_slice %43 {offsets = [0, 40], sizes = [8, 8], strides = [1, 1]} : vector<8x64xbf16> to vector<8x8xbf16>
    %65 = vector.extract_strided_slice %36 {offsets = [0, 8], sizes = [8, 8], strides = [1, 1]} : vector<8x32xbf16> to vector<8x8xbf16>
    %cst_29 = arith.constant dense<0.000000e+00> : vector<8x8xf32>
    %66 = tpu.matmul %65, %63, %cst_29 {dimension_numbers = #tpu.dot_dimension_numbers<[1], [1], [0], [0], [0, 0, 1, 0], [], []>} : vector<8x8xbf16>, vector<8x8xbf16>, vector<8x8xf32> -> vector<8x8xf32>
    %67 = vector.broadcast %42 : vector<1x8xf32> to vector<8x8xf32>
    %68 = arith.addf %66, %67 : vector<8x8xf32>
    %cst_30 = arith.constant dense<0xFF800000> : vector<8xf32>
    %69 = vector.multi_reduction <maximumf>, %68, %cst_30 [1] : vector<8x8xf32> to vector<8xf32>
    %70 = vector.shape_cast %69 : vector<8xf32> to vector<8x1xf32>
    %71 = vector.broadcast %70 : vector<8x1xf32> to vector<8x8xf32>
    %72 = arith.subf %68, %71 : vector<8x8xf32>
    %73 = math.exp %72 : vector<8x8xf32>
    %cst_31 = arith.constant dense<0.000000e+00> : vector<8xf32>
    %74 = vector.multi_reduction <add>, %73, %cst_31 [1] : vector<8x8xf32> to vector<8xf32>
    %75 = vector.shape_cast %74 : vector<8xf32> to vector<8x1xf32>
    %76 = tpu.reciprocal %75 {approx = true} : vector<8x1xf32> -> vector<8x1xf32>
    %77 = vector.broadcast %76 : vector<8x1xf32> to vector<8x8xf32>
    %78 = arith.mulf %73, %77 : vector<8x8xf32>
    %79 = arith.truncf %78 : vector<8x8xf32> to vector<8x8xbf16>
    %cst_32 = arith.constant dense<0.000000e+00> : vector<8x8xf32>
    %80 = tpu.matmul %79, %64, %cst_32 {dimension_numbers = #tpu.dot_dimension_numbers<[1], [0], [0], [1], [0, 0, 1, 1], [], []>} : vector<8x8xbf16>, vector<8x8xbf16>, vector<8x8xf32> -> vector<8x8xf32>
    %c0_33 = arith.constant 0 : index
    %c8 = arith.constant 8 : index
    %81 = vector.load %arg15[%c0_33, %c8] : memref<8x32xf32, #tpu.memory_space<vmem>>, vector<8x8xf32>
    tpu.vector_store %arg15[%c0_33, %c8], %80 {strides = array<i32>} : memref<8x32xf32, #tpu.memory_space<vmem>>, vector<8x8xf32>,
    %82 = vector.extract_strided_slice %43 {offsets = [0, 16], sizes = [8, 8], strides = [1, 1]} : vector<8x64xbf16> to vector<8x8xbf16>
    %83 = vector.extract_strided_slice %43 {offsets = [0, 48], sizes = [8, 8], strides = [1, 1]} : vector<8x64xbf16> to vector<8x8xbf16>
    %84 = vector.extract_strided_slice %36 {offsets = [0, 16], sizes = [8, 8], strides = [1, 1]} : vector<8x32xbf16> to vector<8x8xbf16>
    %cst_34 = arith.constant dense<0.000000e+00> : vector<8x8xf32>
    %85 = tpu.matmul %84, %82, %cst_34 {dimension_numbers = #tpu.dot_dimension_numbers<[1], [1], [0], [0], [0, 0, 1, 0], [], []>} : vector<8x8xbf16>, vector<8x8xbf16>, vector<8x8xf32> -> vector<8x8xf32>
    %86 = vector.broadcast %42 : vector<1x8xf32> to vector<8x8xf32>
    %87 = arith.addf %85, %86 : vector<8x8xf32>
    %cst_35 = arith.constant dense<0xFF800000> : vector<8xf32>
    %88 = vector.multi_reduction <maximumf>, %87, %cst_35 [1] : vector<8x8xf32> to vector<8xf32>
    %89 = vector.shape_cast %88 : vector<8xf32> to vector<8x1xf32>
    %90 = vector.broadcast %89 : vector<8x1xf32> to vector<8x8xf32>
    %91 = arith.subf %87, %90 : vector<8x8xf32>
    %92 = math.exp %91 : vector<8x8xf32>
    %cst_36 = arith.constant dense<0.000000e+00> : vector<8xf32>
    %93 = vector.multi_reduction <add>, %92, %cst_36 [1] : vector<8x8xf32> to vector<8xf32>
    %94 = vector.shape_cast %93 : vector<8xf32> to vector<8x1xf32>
    %95 = tpu.reciprocal %94 {approx = true} : vector<8x1xf32> -> vector<8x1xf32>
    %96 = vector.broadcast %95 : vector<8x1xf32> to vector<8x8xf32>
    %97 = arith.mulf %92, %96 : vector<8x8xf32>
    %98 = arith.truncf %97 : vector<8x8xf32> to vector<8x8xbf16>
    %cst_37 = arith.constant dense<0.000000e+00> : vector<8x8xf32>
    %99 = tpu.matmul %98, %83, %cst_37 {dimension_numbers = #tpu.dot_dimension_numbers<[1], [0], [0], [1], [0, 0, 1, 1], [], []>} : vector<8x8xbf16>, vector<8x8xbf16>, vector<8x8xf32> -> vector<8x8xf32>
    %c0_38 = arith.constant 0 : index
    %c16 = arith.constant 16 : index
    %100 = vector.load %arg15[%c0_38, %c16] : memref<8x32xf32, #tpu.memory_space<vmem>>, vector<8x8xf32>
    tpu.vector_store %arg15[%c0_38, %c16], %99 {strides = array<i32>} : memref<8x32xf32, #tpu.memory_space<vmem>>, vector<8x8xf32>,
    %101 = vector.extract_strided_slice %43 {offsets = [0, 24], sizes = [8, 8], strides = [1, 1]} : vector<8x64xbf16> to vector<8x8xbf16>
    %102 = vector.extract_strided_slice %43 {offsets = [0, 56], sizes = [8, 8], strides = [1, 1]} : vector<8x64xbf16> to vector<8x8xbf16>
    %103 = vector.extract_strided_slice %36 {offsets = [0, 24], sizes = [8, 8], strides = [1, 1]} : vector<8x32xbf16> to vector<8x8xbf16>
    %cst_39 = arith.constant dense<0.000000e+00> : vector<8x8xf32>
    %104 = tpu.matmul %103, %101, %cst_39 {dimension_numbers = #tpu.dot_dimension_numbers<[1], [1], [0], [0], [0, 0, 1, 0], [], []>} : vector<8x8xbf16>, vector<8x8xbf16>, vector<8x8xf32> -> vector<8x8xf32>
    %105 = vector.broadcast %42 : vector<1x8xf32> to vector<8x8xf32>
    %106 = arith.addf %104, %105 : vector<8x8xf32>
    %cst_40 = arith.constant dense<0xFF800000> : vector<8xf32>
    %107 = vector.multi_reduction <maximumf>, %106, %cst_40 [1] : vector<8x8xf32> to vector<8xf32>
    %108 = vector.shape_cast %107 : vector<8xf32> to vector<8x1xf32>
    %109 = vector.broadcast %108 : vector<8x1xf32> to vector<8x8xf32>
    %110 = arith.subf %106, %109 : vector<8x8xf32>
    %111 = math.exp %110 : vector<8x8xf32>
    %cst_41 = arith.constant dense<0.000000e+00> : vector<8xf32>
    %112 = vector.multi_reduction <add>, %111, %cst_41 [1] : vector<8x8xf32> to vector<8xf32>
    %113 = vector.shape_cast %112 : vector<8xf32> to vector<8x1xf32>
    %114 = tpu.reciprocal %113 {approx = true} : vector<8x1xf32> -> vector<8x1xf32>
    %115 = vector.broadcast %114 : vector<8x1xf32> to vector<8x8xf32>
    %116 = arith.mulf %111, %115 : vector<8x8xf32>
    %117 = arith.truncf %116 : vector<8x8xf32> to vector<8x8xbf16>
    %cst_42 = arith.constant dense<0.000000e+00> : vector<8x8xf32>
    %118 = tpu.matmul %117, %102, %cst_42 {dimension_numbers = #tpu.dot_dimension_numbers<[1], [0], [0], [1], [0, 0, 1, 1], [], []>} : vector<8x8xbf16>, vector<8x8xbf16>, vector<8x8xf32> -> vector<8x8xf32>
    %c0_43 = arith.constant 0 : index
    %c24 = arith.constant 24 : index
    %119 = vector.load %arg15[%c0_43, %c24] : memref<8x32xf32, #tpu.memory_space<vmem>>, vector<8x8xf32>
    tpu.vector_store %arg15[%c0_43, %c24], %118 {strides = array<i32>} : memref<8x32xf32, #tpu.memory_space<vmem>>, vector<8x8xf32>,
    %c0_44 = arith.constant 0 : index
    %c0_45 = arith.constant 0 : index
    %120 = vector.load %arg15[%c0_44, %c0_45] : memref<8x32xf32, #tpu.memory_space<vmem>>, vector<8x32xf32>
    %121 = arith.truncf %120 : vector<8x32xf32> to vector<8x32xbf16>
    %c0_46 = arith.constant 0 : index
    %c0_47 = arith.constant 0 : index
    %122 = vector.load %arg11[%c0_46, %c0_47] : memref<32x32xbf16, #tpu.memory_space<vmem>>, vector<32x32xbf16>
    %cst_48 = arith.constant dense<0.000000e+00> : vector<8x32xf32>
    %123 = tpu.matmul %121, %122, %cst_48 {dimension_numbers = #tpu.dot_dimension_numbers<[1], [0], [0], [1], [0, 0, 1, 1], [], []>} : vector<8x32xbf16>, vector<32x32xbf16>, vector<8x32xf32> -> vector<8x32xf32>
    %124 = arith.addf %4, %123 : vector<8x32xf32>
    %c0_49 = arith.constant 0 : index
    %c0_50 = arith.constant 0 : index
    %125 = vector.load %arg12[%c0_49, %c0_50] : memref<1x32xf32, #tpu.memory_space<vmem>>, vector<1x32xf32>
    %126 = vector.broadcast %125 : vector<1x32xf32> to vector<8x32xf32>
    %127 = arith.addf %124, %126 : vector<8x32xf32>
    %c0_51 = arith.constant 0 : index
    %c0_52 = arith.constant 0 : index
    %c0_53 = arith.constant 0 : index
    %128 = vector.load %arg13[%c0_51, %c0_52, %c0_53] : memref<1x8x32xf32, #tpu.memory_space<vmem>>, vector<1x8x32xf32>
    %129 = vector.shape_cast %128 : vector<1x8x32xf32> to vector<8x32xf32>
    %130 = vector.shape_cast %127 : vector<8x32xf32> to vector<1x8x32xf32>
    tpu.vector_store %arg13[%c0_51, %c0_52, %c0_53], %130 {strides = array<i32>} : memref<1x8x32xf32, #tpu.memory_space<vmem>>, vector<1x8x32xf32>,
    return
  }
  func.func @transform_0(%arg0: i32, %arg1: i32) -> (i32, i32, i32) {
    %c0_i32 = arith.constant 0 : i32
    %c0_i32_0 = arith.constant 0 : i32
    return %arg0, %arg1, %c0_i32 : i32, i32, i32
  }
  func.func @transform_1(%arg0: i32, %arg1: i32) -> (i32, i32, i32) {
    %c0_i32 = arith.constant 0 : i32
    %c0_i32_0 = arith.constant 0 : i32
    %c0_i32_1 = arith.constant 0 : i32
    return %arg0, %c0_i32, %c0_i32_0 : i32, i32, i32
  }
  func.func @transform_2(%arg0: i32, %arg1: i32) -> (i32, i32, i32) {
    %c0_i32 = arith.constant 0 : i32
    %c0_i32_0 = arith.constant 0 : i32
    %c0_i32_1 = arith.constant 0 : i32
    return %arg0, %c0_i32, %c0_i32_0 : i32, i32, i32
  }
  func.func @transform_3(%arg0: i32, %arg1: i32) -> (i32, i32) {
    %c0_i32 = arith.constant 0 : i32
    %c0_i32_0 = arith.constant 0 : i32
    %c0_i32_1 = arith.constant 0 : i32
    return %c0_i32, %c0_i32_0 : i32, i32
  }
  func.func @transform_4(%arg0: i32, %arg1: i32) -> (i32, i32) {
    %c0_i32 = arith.constant 0 : i32
    %c0_i32_0 = arith.constant 0 : i32
    %c0_i32_1 = arith.constant 0 : i32
    return %c0_i32, %c0_i32_0 : i32, i32
  }
  func.func @transform_5(%arg0: i32, %arg1: i32) -> (i32, i32) {
    %c0_i32 = arith.constant 0 : i32
    %c0_i32_0 = arith.constant 0 : i32
    %c0_i32_1 = arith.constant 0 : i32
    return %c0_i32, %c0_i32_0 : i32, i32
  }
  func.func @transform_6(%arg0: i32, %arg1: i32) -> (i32, i32) {
    %c0_i32 = arith.constant 0 : i32
    %c0_i32_0 = arith.constant 0 : i32
    %c0_i32_1 = arith.constant 0 : i32
    return %c0_i32, %c0_i32_0 : i32, i32
  }
  func.func @transform_7(%arg0: i32, %arg1: i32) -> (i32, i32) {
    %c0_i32 = arith.constant 0 : i32
    %c0_i32_0 = arith.constant 0 : i32
    %c0_i32_1 = arith.constant 0 : i32
    return %c0_i32, %c0_i32_0 : i32, i32
  }
  func.func @transform_8(%arg0: i32, %arg1: i32) -> (i32, i32) {
    %c0_i32 = arith.constant 0 : i32
    %c0_i32_0 = arith.constant 0 : i32
    %c0_i32_1 = arith.constant 0 : i32
    return %c0_i32, %c0_i32_0 : i32, i32
  }
  func.func @transform_9(%arg0: i32, %arg1: i32) -> (i32, i32) {
    %c0_i32 = arith.constant 0 : i32
    %c0_i32_0 = arith.constant 0 : i32
    %c0_i32_1 = arith.constant 0 : i32
    return %c0_i32, %c0_i32_0 : i32, i32
  }
  func.func @transform_10(%arg0: i32, %arg1: i32) -> (i32, i32) {
    %c0_i32 = arith.constant 0 : i32
    %c0_i32_0 = arith.constant 0 : i32
    %c0_i32_1 = arith.constant 0 : i32
    return %c0_i32, %c0_i32_0 : i32, i32
  }
  func.func @transform_11(%arg0: i32, %arg1: i32) -> (i32, i32, i32) {
    %c0_i32 = arith.constant 0 : i32
    %c0_i32_0 = arith.constant 0 : i32
    return %arg0, %arg1, %c0_i32 : i32, i32, i32
  }
}

module attributes {stable_mosaic.version = 11 : i64} {
  func.func @_ffn_kernel(%arg0: i32, %arg1: memref<16x32xf32, #tpu.memory_space<vmem>>, %arg2: memref<1x32xf32, #tpu.memory_space<vmem>>, %arg3: memref<1x32xf32, #tpu.memory_space<vmem>>, %arg4: memref<32x64xbf16, #tpu.memory_space<vmem>>, %arg5: memref<1x64xf32, #tpu.memory_space<vmem>>, %arg6: memref<64x32xbf16, #tpu.memory_space<vmem>>, %arg7: memref<1x32xf32, #tpu.memory_space<vmem>>, %arg8: memref<16x32xf32, #tpu.memory_space<vmem>>) attributes {dimension_semantics = [#tpu.dimension_semantics<parallel>], iteration_bounds = array<i64: 1>, scalar_prefetch = 0 : i64, scratch_operands = 0 : i64, tpu.core_type = #tpu.core_type<tc>, window_params = [{transform_indices = @transform_0, window_bounds = array<i64: 16, 32>}, {pipeline_mode = #tpu.pipeline_mode<synchronous>, transform_indices = @transform_1, window_bounds = array<i64: 1, 32>}, {pipeline_mode = #tpu.pipeline_mode<synchronous>, transform_indices = @transform_2, window_bounds = array<i64: 1, 32>}, {pipeline_mode = #tpu.pipeline_mode<synchronous>, transform_indices = @transform_3, window_bounds = array<i64: 32, 64>}, {pipeline_mode = #tpu.pipeline_mode<synchronous>, transform_indices = @transform_4, window_bounds = array<i64: 1, 64>}, {pipeline_mode = #tpu.pipeline_mode<synchronous>, transform_indices = @transform_5, window_bounds = array<i64: 64, 32>}, {pipeline_mode = #tpu.pipeline_mode<synchronous>, transform_indices = @transform_6, window_bounds = array<i64: 1, 32>}, {transform_indices = @transform_7, window_bounds = array<i64: 16, 32>}]} {
    %c0 = arith.constant 0 : index
    %c0_0 = arith.constant 0 : index
    %0 = vector.load %arg1[%c0, %c0_0] : memref<16x32xf32, #tpu.memory_space<vmem>>, vector<16x32xf32>
    %c0_1 = arith.constant 0 : index
    %c0_2 = arith.constant 0 : index
    %1 = vector.load %arg2[%c0_1, %c0_2] : memref<1x32xf32, #tpu.memory_space<vmem>>, vector<1x32xf32>
    %c0_3 = arith.constant 0 : index
    %c0_4 = arith.constant 0 : index
    %2 = vector.load %arg3[%c0_3, %c0_4] : memref<1x32xf32, #tpu.memory_space<vmem>>, vector<1x32xf32>
    %cst = arith.constant dense<0.000000e+00> : vector<16xf32>
    %3 = vector.multi_reduction <add>, %0, %cst [1] : vector<16x32xf32> to vector<16xf32>
    %4 = vector.shape_cast %3 : vector<16xf32> to vector<16x1xf32>
    %cst_5 = arith.constant 3.200000e+01 : f32
    %5 = vector.broadcast %cst_5 : f32 to vector<16x1xf32>
    %6 = arith.divf %4, %5 : vector<16x1xf32>
    %7 = vector.broadcast %6 : vector<16x1xf32> to vector<16x32xf32>
    %8 = arith.subf %0, %7 : vector<16x32xf32>
    %9 = arith.mulf %8, %8 : vector<16x32xf32>
    %cst_6 = arith.constant dense<0.000000e+00> : vector<16xf32>
    %10 = vector.multi_reduction <add>, %9, %cst_6 [1] : vector<16x32xf32> to vector<16xf32>
    %11 = vector.shape_cast %10 : vector<16xf32> to vector<16x1xf32>
    %cst_7 = arith.constant 0.0322580636 : f32
    %12 = vector.broadcast %cst_7 : f32 to vector<16x1xf32>
    %13 = arith.mulf %11, %12 : vector<16x1xf32>
    %14 = math.sqrt %13 : vector<16x1xf32>
    %cst_8 = arith.constant 9.99999997E-7 : f32
    %15 = vector.broadcast %cst_8 : f32 to vector<16x1xf32>
    %16 = arith.addf %14, %15 : vector<16x1xf32>
    %17 = tpu.reciprocal %16 : vector<16x1xf32> -> vector<16x1xf32>
    %18 = vector.broadcast %6 : vector<16x1xf32> to vector<16x32xf32>
    %19 = arith.subf %0, %18 : vector<16x32xf32>
    %20 = vector.broadcast %1 : vector<1x32xf32> to vector<16x32xf32>
    %21 = arith.mulf %20, %19 : vector<16x32xf32>
    %22 = vector.broadcast %17 : vector<16x1xf32> to vector<16x32xf32>
    %23 = arith.mulf %21, %22 : vector<16x32xf32>
    %24 = vector.broadcast %2 : vector<1x32xf32> to vector<16x32xf32>
    %25 = arith.addf %23, %24 : vector<16x32xf32>
    %26 = arith.truncf %25 : vector<16x32xf32> to vector<16x32xbf16>
    %c0_9 = arith.constant 0 : index
    %c0_10 = arith.constant 0 : index
    %27 = vector.load %arg4[%c0_9, %c0_10] : memref<32x64xbf16, #tpu.memory_space<vmem>>, vector<32x64xbf16>
    %cst_11 = arith.constant dense<0.000000e+00> : vector<16x64xf32>
    %28 = tpu.matmul %26, %27, %cst_11 {dimension_numbers = #tpu.dot_dimension_numbers<[1], [0], [0], [1], [0, 0, 1, 1], [], []>} : vector<16x32xbf16>, vector<32x64xbf16>, vector<16x64xf32> -> vector<16x64xf32>
    %c0_12 = arith.constant 0 : index
    %c0_13 = arith.constant 0 : index
    %29 = vector.load %arg5[%c0_12, %c0_13] : memref<1x64xf32, #tpu.memory_space<vmem>>, vector<1x64xf32>
    %30 = vector.broadcast %29 : vector<1x64xf32> to vector<16x64xf32>
    %31 = arith.addf %28, %30 : vector<16x64xf32>
    %cst_14 = arith.constant 0.000000e+00 : f32
    %32 = vector.broadcast %cst_14 : f32 to vector<16x64xf32>
    %33 = arith.maximumf %31, %32 : vector<16x64xf32>
    %34 = arith.truncf %33 : vector<16x64xf32> to vector<16x64xbf16>
    %c0_15 = arith.constant 0 : index
    %c0_16 = arith.constant 0 : index
    %35 = vector.load %arg6[%c0_15, %c0_16] : memref<64x32xbf16, #tpu.memory_space<vmem>>, vector<64x32xbf16>
    %cst_17 = arith.constant dense<0.000000e+00> : vector<16x32xf32>
    %36 = tpu.matmul %34, %35, %cst_17 {dimension_numbers = #tpu.dot_dimension_numbers<[1], [0], [0], [1], [0, 0, 1, 1], [], []>} : vector<16x64xbf16>, vector<64x32xbf16>, vector<16x32xf32> -> vector<16x32xf32>
    %37 = arith.addf %0, %36 : vector<16x32xf32>
    %c0_18 = arith.constant 0 : index
    %c0_19 = arith.constant 0 : index
    %38 = vector.load %arg7[%c0_18, %c0_19] : memref<1x32xf32, #tpu.memory_space<vmem>>, vector<1x32xf32>
    %39 = vector.broadcast %38 : vector<1x32xf32> to vector<16x32xf32>
    %40 = arith.addf %37, %39 : vector<16x32xf32>
    %c0_20 = arith.constant 0 : index
    %c0_21 = arith.constant 0 : index
    %41 = vector.load %arg8[%c0_20, %c0_21] : memref<16x32xf32, #tpu.memory_space<vmem>>, vector<16x32xf32>
    tpu.vector_store %arg8[%c0_20, %c0_21], %40 {strides = array<i32>} : memref<16x32xf32, #tpu.memory_space<vmem>>, vector<16x32xf32>,
    return
  }
  func.func @transform_0(%arg0: i32) -> (i32, i32) {
    %c0_i32 = arith.constant 0 : i32
    %c0_i32_0 = arith.constant 0 : i32
    return %arg0, %c0_i32 : i32, i32
  }
  func.func @transform_1(%arg0: i32) -> (i32, i32) {
    %c0_i32 = arith.constant 0 : i32
    %c0_i32_0 = arith.constant 0 : i32
    %c0_i32_1 = arith.constant 0 : i32
    return %c0_i32, %c0_i32_0 : i32, i32
  }
  func.func @transform_2(%arg0: i32) -> (i32, i32) {
    %c0_i32 = arith.constant 0 : i32
    %c0_i32_0 = arith.constant 0 : i32
    %c0_i32_1 = arith.constant 0 : i32
    return %c0_i32, %c0_i32_0 : i32, i32
  }
  func.func @transform_3(%arg0: i32) -> (i32, i32) {
    %c0_i32 = arith.constant 0 : i32
    %c0_i32_0 = arith.constant 0 : i32
    %c0_i32_1 = arith.constant 0 : i32
    return %c0_i32, %c0_i32_0 : i32, i32
  }
  func.func @transform_4(%arg0: i32) -> (i32, i32) {
    %c0_i32 = arith.constant 0 : i32
    %c0_i32_0 = arith.constant 0 : i32
    %c0_i32_1 = arith.constant 0 : i32
    return %c0_i32, %c0_i32_0 : i32, i32
  }
  func.func @transform_5(%arg0: i32) -> (i32, i32) {
    %c0_i32 = arith.constant 0 : i32
    %c0_i32_0 = arith.constant 0 : i32
    %c0_i32_1 = arith.constant 0 : i32
    return %c0_i32, %c0_i32_0 : i32, i32
  }
  func.func @transform_6(%arg0: i32) -> (i32, i32) {
    %c0_i32 = arith.constant 0 : i32
    %c0_i32_0 = arith.constant 0 : i32
    %c0_i32_1 = arith.constant 0 : i32
    return %c0_i32, %c0_i32_0 : i32, i32
  }
  func.func @transform_7(%arg0: i32) -> (i32, i32) {
    %c0_i32 = arith.constant 0 : i32
    %c0_i32_0 = arith.constant 0 : i32
    return %arg0, %c0_i32 : i32, i32
  }
}

module attributes {stable_mosaic.version = 11 : i64} {
  func.func @_ffn_kernel(%arg0: i32, %arg1: memref<16x32xf32, #tpu.memory_space<vmem>>, %arg2: memref<1x32xf32, #tpu.memory_space<vmem>>, %arg3: memref<1x32xf32, #tpu.memory_space<vmem>>, %arg4: memref<32x64xbf16, #tpu.memory_space<vmem>>, %arg5: memref<1x64xf32, #tpu.memory_space<vmem>>, %arg6: memref<64x32xbf16, #tpu.memory_space<vmem>>, %arg7: memref<1x32xf32, #tpu.memory_space<vmem>>, %arg8: memref<1x32xf32, #tpu.memory_space<vmem>>, %arg9: memref<1x32xf32, #tpu.memory_space<vmem>>, %arg10: memref<16x32xf32, #tpu.memory_space<vmem>>) attributes {dimension_semantics = [#tpu.dimension_semantics<parallel>], iteration_bounds = array<i64: 1>, scalar_prefetch = 0 : i64, scratch_operands = 0 : i64, tpu.core_type = #tpu.core_type<tc>, window_params = [{transform_indices = @transform_0, window_bounds = array<i64: 16, 32>}, {pipeline_mode = #tpu.pipeline_mode<synchronous>, transform_indices = @transform_1, window_bounds = array<i64: 1, 32>}, {pipeline_mode = #tpu.pipeline_mode<synchronous>, transform_indices = @transform_2, window_bounds = array<i64: 1, 32>}, {pipeline_mode = #tpu.pipeline_mode<synchronous>, transform_indices = @transform_3, window_bounds = array<i64: 32, 64>}, {pipeline_mode = #tpu.pipeline_mode<synchronous>, transform_indices = @transform_4, window_bounds = array<i64: 1, 64>}, {pipeline_mode = #tpu.pipeline_mode<synchronous>, transform_indices = @transform_5, window_bounds = array<i64: 64, 32>}, {pipeline_mode = #tpu.pipeline_mode<synchronous>, transform_indices = @transform_6, window_bounds = array<i64: 1, 32>}, {pipeline_mode = #tpu.pipeline_mode<synchronous>, transform_indices = @transform_7, window_bounds = array<i64: 1, 32>}, {pipeline_mode = #tpu.pipeline_mode<synchronous>, transform_indices = @transform_8, window_bounds = array<i64: 1, 32>}, {transform_indices = @transform_9, window_bounds = array<i64: 16, 32>}]} {
    %c0 = arith.constant 0 : index
    %c0_0 = arith.constant 0 : index
    %0 = vector.load %arg1[%c0, %c0_0] : memref<16x32xf32, #tpu.memory_space<vmem>>, vector<16x32xf32>
    %c0_1 = arith.constant 0 : index
    %c0_2 = arith.constant 0 : index
    %1 = vector.load %arg2[%c0_1, %c0_2] : memref<1x32xf32, #tpu.memory_space<vmem>>, vector<1x32xf32>
    %c0_3 = arith.constant 0 : index
    %c0_4 = arith.constant 0 : index
    %2 = vector.load %arg3[%c0_3, %c0_4] : memref<1x32xf32, #tpu.memory_space<vmem>>, vector<1x32xf32>
    %cst = arith.constant dense<0.000000e+00> : vector<16xf32>
    %3 = vector.multi_reduction <add>, %0, %cst [1] : vector<16x32xf32> to vector<16xf32>
    %4 = vector.shape_cast %3 : vector<16xf32> to vector<16x1xf32>
    %cst_5 = arith.constant 3.200000e+01 : f32
    %5 = vector.broadcast %cst_5 : f32 to vector<16x1xf32>
    %6 = arith.divf %4, %5 : vector<16x1xf32>
    %7 = vector.broadcast %6 : vector<16x1xf32> to vector<16x32xf32>
    %8 = arith.subf %0, %7 : vector<16x32xf32>
    %9 = arith.mulf %8, %8 : vector<16x32xf32>
    %cst_6 = arith.constant dense<0.000000e+00> : vector<16xf32>
    %10 = vector.multi_reduction <add>, %9, %cst_6 [1] : vector<16x32xf32> to vector<16xf32>
    %11 = vector.shape_cast %10 : vector<16xf32> to vector<16x1xf32>
    %cst_7 = arith.constant 0.0322580636 : f32
    %12 = vector.broadcast %cst_7 : f32 to vector<16x1xf32>
    %13 = arith.mulf %11, %12 : vector<16x1xf32>
    %14 = math.sqrt %13 : vector<16x1xf32>
    %cst_8 = arith.constant 9.99999997E-7 : f32
    %15 = vector.broadcast %cst_8 : f32 to vector<16x1xf32>
    %16 = arith.addf %14, %15 : vector<16x1xf32>
    %17 = tpu.reciprocal %16 : vector<16x1xf32> -> vector<16x1xf32>
    %18 = vector.broadcast %6 : vector<16x1xf32> to vector<16x32xf32>
    %19 = arith.subf %0, %18 : vector<16x32xf32>
    %20 = vector.broadcast %1 : vector<1x32xf32> to vector<16x32xf32>
    %21 = arith.mulf %20, %19 : vector<16x32xf32>
    %22 = vector.broadcast %17 : vector<16x1xf32> to vector<16x32xf32>
    %23 = arith.mulf %21, %22 : vector<16x32xf32>
    %24 = vector.broadcast %2 : vector<1x32xf32> to vector<16x32xf32>
    %25 = arith.addf %23, %24 : vector<16x32xf32>
    %26 = arith.truncf %25 : vector<16x32xf32> to vector<16x32xbf16>
    %c0_9 = arith.constant 0 : index
    %c0_10 = arith.constant 0 : index
    %27 = vector.load %arg4[%c0_9, %c0_10] : memref<32x64xbf16, #tpu.memory_space<vmem>>, vector<32x64xbf16>
    %cst_11 = arith.constant dense<0.000000e+00> : vector<16x64xf32>
    %28 = tpu.matmul %26, %27, %cst_11 {dimension_numbers = #tpu.dot_dimension_numbers<[1], [0], [0], [1], [0, 0, 1, 1], [], []>} : vector<16x32xbf16>, vector<32x64xbf16>, vector<16x64xf32> -> vector<16x64xf32>
    %c0_12 = arith.constant 0 : index
    %c0_13 = arith.constant 0 : index
    %29 = vector.load %arg5[%c0_12, %c0_13] : memref<1x64xf32, #tpu.memory_space<vmem>>, vector<1x64xf32>
    %30 = vector.broadcast %29 : vector<1x64xf32> to vector<16x64xf32>
    %31 = arith.addf %28, %30 : vector<16x64xf32>
    %cst_14 = arith.constant 0.000000e+00 : f32
    %32 = vector.broadcast %cst_14 : f32 to vector<16x64xf32>
    %33 = arith.maximumf %31, %32 : vector<16x64xf32>
    %34 = arith.truncf %33 : vector<16x64xf32> to vector<16x64xbf16>
    %c0_15 = arith.constant 0 : index
    %c0_16 = arith.constant 0 : index
    %35 = vector.load %arg6[%c0_15, %c0_16] : memref<64x32xbf16, #tpu.memory_space<vmem>>, vector<64x32xbf16>
    %cst_17 = arith.constant dense<0.000000e+00> : vector<16x32xf32>
    %36 = tpu.matmul %34, %35, %cst_17 {dimension_numbers = #tpu.dot_dimension_numbers<[1], [0], [0], [1], [0, 0, 1, 1], [], []>} : vector<16x64xbf16>, vector<64x32xbf16>, vector<16x32xf32> -> vector<16x32xf32>
    %37 = arith.addf %0, %36 : vector<16x32xf32>
    %c0_18 = arith.constant 0 : index
    %c0_19 = arith.constant 0 : index
    %38 = vector.load %arg7[%c0_18, %c0_19] : memref<1x32xf32, #tpu.memory_space<vmem>>, vector<1x32xf32>
    %39 = vector.broadcast %38 : vector<1x32xf32> to vector<16x32xf32>
    %40 = arith.addf %37, %39 : vector<16x32xf32>
    %c0_20 = arith.constant 0 : index
    %c0_21 = arith.constant 0 : index
    %41 = vector.load %arg8[%c0_20, %c0_21] : memref<1x32xf32, #tpu.memory_space<vmem>>, vector<1x32xf32>
    %c0_22 = arith.constant 0 : index
    %c0_23 = arith.constant 0 : index
    %42 = vector.load %arg9[%c0_22, %c0_23] : memref<1x32xf32, #tpu.memory_space<vmem>>, vector<1x32xf32>
    %cst_24 = arith.constant dense<0.000000e+00> : vector<16xf32>
    %43 = vector.multi_reduction <add>, %40, %cst_24 [1] : vector<16x32xf32> to vector<16xf32>
    %44 = vector.shape_cast %43 : vector<16xf32> to vector<16x1xf32>
    %cst_25 = arith.constant 3.200000e+01 : f32
    %45 = vector.broadcast %cst_25 : f32 to vector<16x1xf32>
    %46 = arith.divf %44, %45 : vector<16x1xf32>
    %47 = vector.broadcast %46 : vector<16x1xf32> to vector<16x32xf32>
    %48 = arith.subf %40, %47 : vector<16x32xf32>
    %49 = arith.mulf %48, %48 : vector<16x32xf32>
    %cst_26 = arith.constant dense<0.000000e+00> : vector<16xf32>
    %50 = vector.multi_reduction <add>, %49, %cst_26 [1] : vector<16x32xf32> to vector<16xf32>
    %51 = vector.shape_cast %50 : vector<16xf32> to vector<16x1xf32>
    %cst_27 = arith.constant 0.0322580636 : f32
    %52 = vector.broadcast %cst_27 : f32 to vector<16x1xf32>
    %53 = arith.mulf %51, %52 : vector<16x1xf32>
    %54 = math.sqrt %53 : vector<16x1xf32>
    %cst_28 = arith.constant 9.99999997E-7 : f32
    %55 = vector.broadcast %cst_28 : f32 to vector<16x1xf32>
    %56 = arith.addf %54, %55 : vector<16x1xf32>
    %57 = tpu.reciprocal %56 : vector<16x1xf32> -> vector<16x1xf32>
    %58 = vector.broadcast %46 : vector<16x1xf32> to vector<16x32xf32>
    %59 = arith.subf %40, %58 : vector<16x32xf32>
    %60 = vector.broadcast %41 : vector<1x32xf32> to vector<16x32xf32>
    %61 = arith.mulf %60, %59 : vector<16x32xf32>
    %62 = vector.broadcast %57 : vector<16x1xf32> to vector<16x32xf32>
    %63 = arith.mulf %61, %62 : vector<16x32xf32>
    %64 = vector.broadcast %42 : vector<1x32xf32> to vector<16x32xf32>
    %65 = arith.addf %63, %64 : vector<16x32xf32>
    %c0_29 = arith.constant 0 : index
    %c0_30 = arith.constant 0 : index
    %66 = vector.load %arg10[%c0_29, %c0_30] : memref<16x32xf32, #tpu.memory_space<vmem>>, vector<16x32xf32>
    tpu.vector_store %arg10[%c0_29, %c0_30], %65 {strides = array<i32>} : memref<16x32xf32, #tpu.memory_space<vmem>>, vector<16x32xf32>,
    return
  }
  func.func @transform_0(%arg0: i32) -> (i32, i32) {
    %c0_i32 = arith.constant 0 : i32
    %c0_i32_0 = arith.constant 0 : i32
    return %arg0, %c0_i32 : i32, i32
  }
  func.func @transform_1(%arg0: i32) -> (i32, i32) {
    %c0_i32 = arith.constant 0 : i32
    %c0_i32_0 = arith.constant 0 : i32
    %c0_i32_1 = arith.constant 0 : i32
    return %c0_i32, %c0_i32_0 : i32, i32
  }
  func.func @transform_2(%arg0: i32) -> (i32, i32) {
    %c0_i32 = arith.constant 0 : i32
    %c0_i32_0 = arith.constant 0 : i32
    %c0_i32_1 = arith.constant 0 : i32
    return %c0_i32, %c0_i32_0 : i32, i32
  }
  func.func @transform_3(%arg0: i32) -> (i32, i32) {
    %c0_i32 = arith.constant 0 : i32
    %c0_i32_0 = arith.constant 0 : i32
    %c0_i32_1 = arith.constant 0 : i32
    return %c0_i32, %c0_i32_0 : i32, i32
  }
  func.func @transform_4(%arg0: i32) -> (i32, i32) {
    %c0_i32 = arith.constant 0 : i32
    %c0_i32_0 = arith.constant 0 : i32
    %c0_i32_1 = arith.constant 0 : i32
    return %c0_i32, %c0_i32_0 : i32, i32
  }
  func.func @transform_5(%arg0: i32) -> (i32, i32) {
    %c0_i32 = arith.constant 0 : i32
    %c0_i32_0 = arith.constant 0 : i32
    %c0_i32_1 = arith.constant 0 : i32
    return %c0_i32, %c0_i32_0 : i32, i32
  }
  func.func @transform_6(%arg0: i32) -> (i32, i32) {
    %c0_i32 = arith.constant 0 : i32
    %c0_i32_0 = arith.constant 0 : i32
    %c0_i32_1 = arith.constant 0 : i32
    return %c0_i32, %c0_i32_0 : i32, i32
  }
  func.func @transform_7(%arg0: i32) -> (i32, i32) {
    %c0_i32 = arith.constant 0 : i32
    %c0_i32_0 = arith.constant 0 : i32
    %c0_i32_1 = arith.constant 0 : i32
    return %c0_i32, %c0_i32_0 : i32, i32
  }
  func.func @transform_8(%arg0: i32) -> (i32, i32) {
    %c0_i32 = arith.constant 0 : i32
    %c0_i32_0 = arith.constant 0 : i32
    %c0_i32_1 = arith.constant 0 : i32
    return %c0_i32, %c0_i32_0 : i32, i32
  }
  func.func @transform_9(%arg0: i32) -> (i32, i32) {
    %c0_i32 = arith.constant 0 : i32
    %c0_i32_0 = arith.constant 0 : i32
    return %arg0, %c0_i32 : i32, i32
  }
}

module attributes {stable_mosaic.version = 11 : i64} {
  func.func @_attn_kernel(%arg0: i32, %arg1: i32, %arg2: memref<1x8x32xf32, #tpu.memory_space<vmem>>, %arg3: memref<1x8x32xf32, #tpu.memory_space<vmem>>, %arg4: memref<1x1x8xf32, #tpu.memory_space<vmem>>, %arg5: memref<1x32xf32, #tpu.memory_space<vmem>>, %arg6: memref<1x32xf32, #tpu.memory_space<vmem>>, %arg7: memref<32x32xbf16, #tpu.memory_space<vmem>>, %arg8: memref<1x32xf32, #tpu.memory_space<vmem>>, %arg9: memref<32x64xbf16, #tpu.memory_space<vmem>>, %arg10: memref<1x64xf32, #tpu.memory_space<vmem>>, %arg11: memref<32x32xbf16, #tpu.memory_space<vmem>>, %arg12: memref<1x32xf32, #tpu.memory_space<vmem>>, %arg13: memref<1x8x32xf32, #tpu.memory_space<vmem>>, %arg14: memref<8x64xbf16, #tpu.memory_space<vmem>>, %arg15: memref<8x32xf32, #tpu.memory_space<vmem>>) attributes {dimension_semantics = [#tpu.dimension_semantics<parallel>, #tpu.dimension_semantics<arbitrary>], iteration_bounds = array<i64: 2, 1>, scalar_prefetch = 0 : i64, scratch_operands = 2 : i64, tpu.core_type = #tpu.core_type<tc>, window_params = [{transform_indices = @transform_0, window_bounds = array<i64: 1, 8, 32>}, {transform_indices = @transform_1, window_bounds = array<i64: 1, 8, 32>}, {transform_indices = @transform_2, window_bounds = array<i64: 1, 1, 8>}, {pipeline_mode = #tpu.pipeline_mode<synchronous>, transform_indices = @transform_3, window_bounds = array<i64: 1, 32>}, {pipeline_mode = #tpu.pipeline_mode<synchronous>, transform_indices = @transform_4, window_bounds = array<i64: 1, 32>}, {pipeline_mode = #tpu.pipeline_mode<synchronous>, transform_indices = @transform_5, window_bounds = array<i64: 32, 32>}, {pipeline_mode = #tpu.pipeline_mode<synchronous>, transform_indices = @transform_6, window_bounds = array<i64: 1, 32>}, {pipeline_mode = #tpu.pipeline_mode<synchronous>, transform_indices = @transform_7, window_bounds = array<i64: 32, 64>}, {pipeline_mode = #tpu.pipeline_mode<synchronous>, transform_indices = @transform_8, window_bounds = array<i64: 1, 64>}, {pipeline_mode = #tpu.pipeline_mode<synchronous>, transform_indices = @transform_9, window_bounds = array<i64: 32, 32>}, {pipeline_mode = #tpu.pipeline_mode<synchronous>, transform_indices = @transform_10, window_bounds = array<i64: 1, 32>}, {transform_indices = @transform_11, window_bounds = array<i64: 1, 8, 32>}]} {
    %c0_i32 = arith.constant 0 : i32
    %0 = arith.cmpi eq, %arg1, %c0_i32 : i32
    %1 = arith.extui %0 : i1 to i32
    %c0_i32_0 = arith.constant 0 : i32
    %2 = arith.cmpi ne, %1, %c0_i32_0 : i32
    scf.if %2 {
      %c0_56 = arith.constant 0 : index
      %c0_57 = arith.constant 0 : index
      %c0_58 = arith.constant 0 : index
      %138 = vector.load %arg3[%c0_56, %c0_57, %c0_58] : memref<1x8x32xf32, #tpu.memory_space<vmem>>, vector<1x8x32xf32>
      %139 = vector.shape_cast %138 : vector<1x8x32xf32> to vector<8x32xf32>
      %c0_59 = arith.constant 0 : index
      %c0_60 = arith.constant 0 : index
      %140 = vector.load %arg5[%c0_59, %c0_60] : memref<1x32xf32, #tpu.memory_space<vmem>>, vector<1x32xf32>
      %c0_61 = arith.constant 0 : index
      %c0_62 = arith.constant 0 : index
      %141 = vector.load %arg6[%c0_61, %c0_62] : memref<1x32xf32, #tpu.memory_space<vmem>>, vector<1x32xf32>
      %cst_63 = arith.constant dense<0.000000e+00> : vector<8xf32>
      %142 = vector.multi_reduction <add>, %139, %cst_63 [1] : vector<8x32xf32> to vector<8xf32>
      %143 = vector.shape_cast %142 : vector<8xf32> to vector<8x1xf32>
      %cst_64 = arith.constant 3.200000e+01 : f32
      %144 = vector.broadcast %cst_64 : f32 to vector<8x1xf32>
      %145 = arith.divf %143, %144 : vector<8x1xf32>
      %146 = vector.broadcast %145 : vector<8x1xf32> to vector<8x32xf32>
      %147 = arith.subf %139, %146 : vector<8x32xf32>
      %148 = arith.mulf %147, %147 : vector<8x32xf32>
      %cst_65 = arith.constant dense<0.000000e+00> : vector<8xf32>
      %149 = vector.multi_reduction <add>, %148, %cst_65 [1] : vector<8x32xf32> to vector<8xf32>
      %150 = vector.shape_cast %149 : vector<8xf32> to vector<8x1xf32>
      %cst_66 = arith.constant 0.0322580636 : f32
      %151 = vector.broadcast %cst_66 : f32 to vector<8x1xf32>
      %152 = arith.mulf %150, %151 : vector<8x1xf32>
      %153 = math.sqrt %152 : vector<8x1xf32>
      %cst_67 = arith.constant 9.99999997E-7 : f32
      %154 = vector.broadcast %cst_67 : f32 to vector<8x1xf32>
      %155 = arith.addf %153, %154 : vector<8x1xf32>
      %156 = tpu.reciprocal %155 : vector<8x1xf32> -> vector<8x1xf32>
      %157 = vector.broadcast %145 : vector<8x1xf32> to vector<8x32xf32>
      %158 = arith.subf %139, %157 : vector<8x32xf32>
      %159 = vector.broadcast %140 : vector<1x32xf32> to vector<8x32xf32>
      %160 = arith.mulf %159, %158 : vector<8x32xf32>
      %161 = vector.broadcast %156 : vector<8x1xf32> to vector<8x32xf32>
      %162 = arith.mulf %160, %161 : vector<8x32xf32>
      %163 = vector.broadcast %141 : vector<1x32xf32> to vector<8x32xf32>
      %164 = arith.addf %162, %163 : vector<8x32xf32>
      %165 = arith.truncf %164 : vector<8x32xf32> to vector<8x32xbf16>
      %c0_68 = arith.constant 0 : index
      %c0_69 = arith.constant 0 : index
      %166 = vector.load %arg9[%c0_68, %c0_69] : memref<32x64xbf16, #tpu.memory_space<vmem>>, vector<32x64xbf16>
      %cst_70 = arith.constant dense<0.000000e+00> : vector<8x64xf32>
      %167 = tpu.matmul %165, %166, %cst_70 {dimension_numbers = #tpu.dot_dimension_numbers<[1], [0], [0], [1], [0, 0, 1, 1], [], []>} : vector<8x32xbf16>, vector<32x64xbf16>, vector<8x64xf32> -> vector<8x64xf32>
      %c0_71 = arith.constant 0 : index
      %c0_72 = arith.constant 0 : index
      %168 = vector.load %arg10[%c0_71, %c0_72] : memref<1x64xf32, #tpu.memory_space<vmem>>, vector<1x64xf32>
      %169 = vector.broadcast %168 : vector<1x64xf32> to vector<8x64xf32>
      %170 = arith.addf %167, %169 : vector<8x64xf32>
      %171 = arith.truncf %170 : vector<8x64xf32> to vector<8x64xbf16>
      %c0_73 = arith.constant 0 : index
      %c0_74 = arith.constant 0 : index
      %172 = vector.load %arg14[%c0_73, %c0_74] : memref<8x64xbf16, #tpu.memory_space<vmem>>, vector<8x64xbf16>
      tpu.vector_store %arg14[%c0_73, %c0_74], %171 {strides = array<i32>} : memref<8x64xbf16, #tpu.memory_space<vmem>>, vector<8x64xbf16>,
    } else {
    }
    %c0 = arith.constant 0 : index
    %c0_1 = arith.constant 0 : index
    %c0_2 = arith.constant 0 : index
    %3 = vector.load %arg2[%c0, %c0_1, %c0_2] : memref<1x8x32xf32, #tpu.memory_space<vmem>>, vector<1x8x32xf32>
    %4 = vector.shape_cast %3 : vector<1x8x32xf32> to vector<8x32xf32>
    %c0_3 = arith.constant 0 : index
    %c0_4 = arith.constant 0 : index
    %5 = vector.load %arg5[%c0_3, %c0_4] : memref<1x32xf32, #tpu.memory_space<vmem>>, vector<1x32xf32>
    %c0_5 = arith.constant 0 : index
    %c0_6 = arith.constant 0 : index
    %6 = vector.load %arg6[%c0_5, %c0_6] : memref<1x32xf32, #tpu.memory_space<vmem>>, vector<1x32xf32>
    %cst = arith.constant dense<0.000000e+00> : vector<8xf32>
    %7 = vector.multi_reduction <add>, %4, %cst [1] : vector<8x32xf32> to vector<8xf32>
    %8 = vector.shape_cast %7 : vector<8xf32> to vector<8x1xf32>
    %cst_7 = arith.constant 3.200000e+01 : f32
    %9 = vector.broadcast %cst_7 : f32 to vector<8x1xf32>
    %10 = arith.divf %8, %9 : vector<8x1xf32>
    %11 = vector.broadcast %10 : vector<8x1xf32> to vector<8x32xf32>
    %12 = arith.subf %4, %11 : vector<8x32xf32>
    %13 = arith.mulf %12, %12 : vector<8x32xf32>
    %cst_8 = arith.constant dense<0.000000e+00> : vector<8xf32>
    %14 = vector.multi_reduction <add>, %13, %cst_8 [1] : vector<8x32xf32> to vector<8xf32>
    %15 = vector.shape_cast %14 : vector<8xf32> to vector<8x1xf32>
    %cst_9 = arith.constant 0.0322580636 : f32
    %16 = vector.broadcast %cst_9 : f32 to vector<8x1xf32>
    %17 = arith.mulf %15, %16 : vector<8x1xf32>
    %18 = math.sqrt %17 : vector<8x1xf32>
    %cst_10 = arith.constant 9.99999997E-7 : f32
    %19 = vector.broadcast %cst_10 : f32 to vector<8x1xf32>
    %20 = arith.addf %18, %19 : vector<8x1xf32>
    %21 = tpu.reciprocal %20 : vector<8x1xf32> -> vector<8x1xf32>
    %22 = vector.broadcast %10 : vector<8x1xf32> to vector<8x32xf32>
    %23 = arith.subf %4, %22 : vector<8x32xf32>
    %24 = vector.broadcast %5 : vector<1x32xf32> to vector<8x32xf32>
    %25 = arith.mulf %24, %23 : vector<8x32xf32>
    %26 = vector.broadcast %21 : vector<8x1xf32> to vector<8x32xf32>
    %27 = arith.mulf %25, %26 : vector<8x32xf32>
    %28 = vector.broadcast %6 : vector<1x32xf32> to vector<8x32xf32>
    %29 = arith.addf %27, %28 : vector<8x32xf32>
    %30 = arith.truncf %29 : vector<8x32xf32> to vector<8x32xbf16>
    %c0_11 = arith.constant 0 : index
    %c0_12 = arith.constant 0 : index
    %31 = vector.load %arg7[%c0_11, %c0_12] : memref<32x32xbf16, #tpu.memory_space<vmem>>, vector<32x32xbf16>
    %cst_13 = arith.constant dense<0.000000e+00> : vector<8x32xf32>
    %32 = tpu.matmul %30, %31, %cst_13 {dimension_numbers = #tpu.dot_dimension_numbers<[1], [0], [0], [1], [0, 0, 1, 1], [], []>} : vector<8x32xbf16>, vector<32x32xbf16>, vector<8x32xf32> -> vector<8x32xf32>
    %c0_14 = arith.constant 0 : index
    %c0_15 = arith.constant 0 : index
    %33 = vector.load %arg8[%c0_14, %c0_15] : memref<1x32xf32, #tpu.memory_space<vmem>>, vector<1x32xf32>
    %34 = vector.broadcast %33 : vector<1x32xf32> to vector<8x32xf32>
    %35 = arith.addf %32, %34 : vector<8x32xf32>
    %36 = arith.truncf %35 : vector<8x32xf32> to vector<8x32xbf16>
    %c0_16 = arith.constant 0 : index
    %c0_17 = arith.constant 0 : index
    %c0_18 = arith.constant 0 : index
    %37 = vector.load %arg4[%c0_16, %c0_17, %c0_18] : memref<1x1x8xf32, #tpu.memory_space<vmem>>, vector<1x1x8xf32>
    %38 = vector.shape_cast %37 : vector<1x1x8xf32> to vector<1x8xf32>
    %cst_19 = arith.constant 1.000000e+00 : f32
    %39 = vector.broadcast %cst_19 : f32 to vector<1x8xf32>
    %40 = arith.subf %38, %39 : vector<1x8xf32>
    %cst_20 = arith.constant 1.000000e+09 : f32
    %41 = vector.broadcast %cst_20 : f32 to vector<1x8xf32>
    %42 = arith.mulf %40, %41 : vector<1x8xf32>
    %43 = tpu.iota {dimensions = array<i32: 0>} : vector<8x8xi32>
    %c8_i32 = arith.constant 8 : i32
    %44 = arith.muli %arg1, %c8_i32 : i32
    %45 = vector.broadcast %44 : i32 to vector<8x8xi32>
    %46 = arith.addi %43, %45 : vector<8x8xi32>
    %47 = tpu.iota {dimensions = array<i32: 1>} : vector<8x8xi32>
    %48 = arith.cmpi sge, %46, %47 : vector<8x8xi32>
    %cst_21 = arith.constant 0.000000e+00 : f32
    %cst_22 = arith.constant -1.000000e+09 : f32
    %49 = vector.broadcast %cst_21 : f32 to vector<8x8xf32>
    %50 = vector.broadcast %cst_22 : f32 to vector<8x8xf32>
    %51 = arith.select %48, %49, %50 : vector<8x8xi1>, vector<8x8xf32>
    %52 = vector.broadcast %42 : vector<1x8xf32> to vector<8x8xf32>
    %53 = arith.addf %52, %51 : vector<8x8xf32>
    %c0_23 = arith.constant 0 : index
    %c0_24 = arith.constant 0 : index
    %54 = vector.load %arg14[%c0_23, %c0_24] : memref<8x64xbf16, #tpu.memory_space<vmem>>, vector<8x64xbf16>
    %55 = vector.extract_strided_slice %54 {offsets = [0, 0], sizes = [8, 8], strides = [1, 1]} : vector<8x64xbf16> to vector<8x8xbf16>
    %56 = vector.extract_strided_slice %54 {offsets = [0, 32], sizes = [8, 8], strides = [1, 1]} : vector<8x64xbf16> to vector<8x8xbf16>
    %57 = vector.extract_strided_slice %36 {offsets = [0, 0], sizes = [8, 8], strides = [1, 1]} : vector<8x32xbf16> to vector<8x8xbf16>
    %cst_25 = arith.constant dense<0.000000e+00> : vector<8x8xf32>
    %58 = tpu.matmul %57, %55, %cst_25 {dimension_numbers = #tpu.dot_dimension_numbers<[1], [1], [0], [0], [0, 0, 1, 0], [], []>} : vector<8x8xbf16>, vector<8x8xbf16>, vector<8x8xf32> -> vector<8x8xf32>
    %59 = arith.addf %58, %53 : vector<8x8xf32>
    %cst_26 = arith.constant dense<0xFF800000> : vector<8xf32>
    %60 = vector.multi_reduction <maximumf>, %59, %cst_26 [1] : vector<8x8xf32> to vector<8xf32>
    %61 = vector.shape_cast %60 : vector<8xf32> to vector<8x1xf32>
    %62 = vector.broadcast %61 : vector<8x1xf32> to vector<8x8xf32>
    %63 = arith.subf %59, %62 : vector<8x8xf32>
    %64 = math.exp %63 : vector<8x8xf32>
    %cst_27 = arith.constant dense<0.000000e+00> : vector<8xf32>
    %65 = vector.multi_reduction <add>, %64, %cst_27 [1] : vector<8x8xf32> to vector<8xf32>
    %66 = vector.shape_cast %65 : vector<8xf32> to vector<8x1xf32>
    %67 = tpu.reciprocal %66 {approx = true} : vector<8x1xf32> -> vector<8x1xf32>
    %68 = vector.broadcast %67 : vector<8x1xf32> to vector<8x8xf32>
    %69 = arith.mulf %64, %68 : vector<8x8xf32>
    %70 = arith.truncf %69 : vector<8x8xf32> to vector<8x8xbf16>
    %cst_28 = arith.constant dense<0.000000e+00> : vector<8x8xf32>
    %71 = tpu.matmul %70, %56, %cst_28 {dimension_numbers = #tpu.dot_dimension_numbers<[1], [0], [0], [1], [0, 0, 1, 1], [], []>} : vector<8x8xbf16>, vector<8x8xbf16>, vector<8x8xf32> -> vector<8x8xf32>
    %c0_29 = arith.constant 0 : index
    %c0_30 = arith.constant 0 : index
    %72 = vector.load %arg15[%c0_29, %c0_30] : memref<8x32xf32, #tpu.memory_space<vmem>>, vector<8x8xf32>
    tpu.vector_store %arg15[%c0_29, %c0_30], %71 {strides = array<i32>} : memref<8x32xf32, #tpu.memory_space<vmem>>, vector<8x8xf32>,
    %73 = vector.extract_strided_slice %54 {offsets = [0, 8], sizes = [8, 8], strides = [1, 1]} : vector<8x64xbf16> to vector<8x8xbf16>
    %74 = vector.extract_strided_slice %54 {offsets = [0, 40], sizes = [8, 8], strides = [1, 1]} : vector<8x64xbf16> to vector<8x8xbf16>
    %75 = vector.extract_strided_slice %36 {offsets = [0, 8], sizes = [8, 8], strides = [1, 1]} : vector<8x32xbf16> to vector<8x8xbf16>
    %cst_31 = arith.constant dense<0.000000e+00> : vector<8x8xf32>
    %76 = tpu.matmul %75, %73, %cst_31 {dimension_numbers = #tpu.dot_dimension_numbers<[1], [1], [0], [0], [0, 0, 1, 0], [], []>} : vector<8x8xbf16>, vector<8x8xbf16>, vector<8x8xf32> -> vector<8x8xf32>
    %77 = arith.addf %76, %53 : vector<8x8xf32>
    %cst_32 = arith.constant dense<0xFF800000> : vector<8xf32>
    %78 = vector.multi_reduction <maximumf>, %77, %cst_32 [1] : vector<8x8xf32> to vector<8xf32>
    %79 = vector.shape_cast %78 : vector<8xf32> to vector<8x1xf32>
    %80 = vector.broadcast %79 : vector<8x1xf32> to vector<8x8xf32>
    %81 = arith.subf %77, %80 : vector<8x8xf32>
    %82 = math.exp %81 : vector<8x8xf32>
    %cst_33 = arith.constant dense<0.000000e+00> : vector<8xf32>
    %83 = vector.multi_reduction <add>, %82, %cst_33 [1] : vector<8x8xf32> to vector<8xf32>
    %84 = vector.shape_cast %83 : vector<8xf32> to vector<8x1xf32>
    %85 = tpu.reciprocal %84 {approx = true} : vector<8x1xf32> -> vector<8x1xf32>
    %86 = vector.broadcast %85 : vector<8x1xf32> to vector<8x8xf32>
    %87 = arith.mulf %82, %86 : vector<8x8xf32>
    %88 = arith.truncf %87 : vector<8x8xf32> to vector<8x8xbf16>
    %cst_34 = arith.constant dense<0.000000e+00> : vector<8x8xf32>
    %89 = tpu.matmul %88, %74, %cst_34 {dimension_numbers = #tpu.dot_dimension_numbers<[1], [0], [0], [1], [0, 0, 1, 1], [], []>} : vector<8x8xbf16>, vector<8x8xbf16>, vector<8x8xf32> -> vector<8x8xf32>
    %c0_35 = arith.constant 0 : index
    %c8 = arith.constant 8 : index
    %90 = vector.load %arg15[%c0_35, %c8] : memref<8x32xf32, #tpu.memory_space<vmem>>, vector<8x8xf32>
    tpu.vector_store %arg15[%c0_35, %c8], %89 {strides = array<i32>} : memref<8x32xf32, #tpu.memory_space<vmem>>, vector<8x8xf32>,
    %91 = vector.extract_strided_slice %54 {offsets = [0, 16], sizes = [8, 8], strides = [1, 1]} : vector<8x64xbf16> to vector<8x8xbf16>
    %92 = vector.extract_strided_slice %54 {offsets = [0, 48], sizes = [8, 8], strides = [1, 1]} : vector<8x64xbf16> to vector<8x8xbf16>
    %93 = vector.extract_strided_slice %36 {offsets = [0, 16], sizes = [8, 8], strides = [1, 1]} : vector<8x32xbf16> to vector<8x8xbf16>
    %cst_36 = arith.constant dense<0.000000e+00> : vector<8x8xf32>
    %94 = tpu.matmul %93, %91, %cst_36 {dimension_numbers = #tpu.dot_dimension_numbers<[1], [1], [0], [0], [0, 0, 1, 0], [], []>} : vector<8x8xbf16>, vector<8x8xbf16>, vector<8x8xf32> -> vector<8x8xf32>
    %95 = arith.addf %94, %53 : vector<8x8xf32>
    %cst_37 = arith.constant dense<0xFF800000> : vector<8xf32>
    %96 = vector.multi_reduction <maximumf>, %95, %cst_37 [1] : vector<8x8xf32> to vector<8xf32>
    %97 = vector.shape_cast %96 : vector<8xf32> to vector<8x1xf32>
    %98 = vector.broadcast %97 : vector<8x1xf32> to vector<8x8xf32>
    %99 = arith.subf %95, %98 : vector<8x8xf32>
    %100 = math.exp %99 : vector<8x8xf32>
    %cst_38 = arith.constant dense<0.000000e+00> : vector<8xf32>
    %101 = vector.multi_reduction <add>, %100, %cst_38 [1] : vector<8x8xf32> to vector<8xf32>
    %102 = vector.shape_cast %101 : vector<8xf32> to vector<8x1xf32>
    %103 = tpu.reciprocal %102 {approx = true} : vector<8x1xf32> -> vector<8x1xf32>
    %104 = vector.broadcast %103 : vector<8x1xf32> to vector<8x8xf32>
    %105 = arith.mulf %100, %104 : vector<8x8xf32>
    %106 = arith.truncf %105 : vector<8x8xf32> to vector<8x8xbf16>
    %cst_39 = arith.constant dense<0.000000e+00> : vector<8x8xf32>
    %107 = tpu.matmul %106, %92, %cst_39 {dimension_numbers = #tpu.dot_dimension_numbers<[1], [0], [0], [1], [0, 0, 1, 1], [], []>} : vector<8x8xbf16>, vector<8x8xbf16>, vector<8x8xf32> -> vector<8x8xf32>
    %c0_40 = arith.constant 0 : index
    %c16 = arith.constant 16 : index
    %108 = vector.load %arg15[%c0_40, %c16] : memref<8x32xf32, #tpu.memory_space<vmem>>, vector<8x8xf32>
    tpu.vector_store %arg15[%c0_40, %c16], %107 {strides = array<i32>} : memref<8x32xf32, #tpu.memory_space<vmem>>, vector<8x8xf32>,
    %109 = vector.extract_strided_slice %54 {offsets = [0, 24], sizes = [8, 8], strides = [1, 1]} : vector<8x64xbf16> to vector<8x8xbf16>
    %110 = vector.extract_strided_slice %54 {offsets = [0, 56], sizes = [8, 8], strides = [1, 1]} : vector<8x64xbf16> to vector<8x8xbf16>
    %111 = vector.extract_strided_slice %36 {offsets = [0, 24], sizes = [8, 8], strides = [1, 1]} : vector<8x32xbf16> to vector<8x8xbf16>
    %cst_41 = arith.constant dense<0.000000e+00> : vector<8x8xf32>
    %112 = tpu.matmul %111, %109, %cst_41 {dimension_numbers = #tpu.dot_dimension_numbers<[1], [1], [0], [0], [0, 0, 1, 0], [], []>} : vector<8x8xbf16>, vector<8x8xbf16>, vector<8x8xf32> -> vector<8x8xf32>
    %113 = arith.addf %112, %53 : vector<8x8xf32>
    %cst_42 = arith.constant dense<0xFF800000> : vector<8xf32>
    %114 = vector.multi_reduction <maximumf>, %113, %cst_42 [1] : vector<8x8xf32> to vector<8xf32>
    %115 = vector.shape_cast %114 : vector<8xf32> to vector<8x1xf32>
    %116 = vector.broadcast %115 : vector<8x1xf32> to vector<8x8xf32>
    %117 = arith.subf %113, %116 : vector<8x8xf32>
    %118 = math.exp %117 : vector<8x8xf32>
    %cst_43 = arith.constant dense<0.000000e+00> : vector<8xf32>
    %119 = vector.multi_reduction <add>, %118, %cst_43 [1] : vector<8x8xf32> to vector<8xf32>
    %120 = vector.shape_cast %119 : vector<8xf32> to vector<8x1xf32>
    %121 = tpu.reciprocal %120 {approx = true} : vector<8x1xf32> -> vector<8x1xf32>
    %122 = vector.broadcast %121 : vector<8x1xf32> to vector<8x8xf32>
    %123 = arith.mulf %118, %122 : vector<8x8xf32>
    %124 = arith.truncf %123 : vector<8x8xf32> to vector<8x8xbf16>
    %cst_44 = arith.constant dense<0.000000e+00> : vector<8x8xf32>
    %125 = tpu.matmul %124, %110, %cst_44 {dimension_numbers = #tpu.dot_dimension_numbers<[1], [0], [0], [1], [0, 0, 1, 1], [], []>} : vector<8x8xbf16>, vector<8x8xbf16>, vector<8x8xf32> -> vector<8x8xf32>
    %c0_45 = arith.constant 0 : index
    %c24 = arith.constant 24 : index
    %126 = vector.load %arg15[%c0_45, %c24] : memref<8x32xf32, #tpu.memory_space<vmem>>, vector<8x8xf32>
    tpu.vector_store %arg15[%c0_45, %c24], %125 {strides = array<i32>} : memref<8x32xf32, #tpu.memory_space<vmem>>, vector<8x8xf32>,
    %c0_46 = arith.constant 0 : index
    %c0_47 = arith.constant 0 : index
    %127 = vector.load %arg15[%c0_46, %c0_47] : memref<8x32xf32, #tpu.memory_space<vmem>>, vector<8x32xf32>
    %128 = arith.truncf %127 : vector<8x32xf32> to vector<8x32xbf16>
    %c0_48 = arith.constant 0 : index
    %c0_49 = arith.constant 0 : index
    %129 = vector.load %arg11[%c0_48, %c0_49] : memref<32x32xbf16, #tpu.memory_space<vmem>>, vector<32x32xbf16>
    %cst_50 = arith.constant dense<0.000000e+00> : vector<8x32xf32>
    %130 = tpu.matmul %128, %129, %cst_50 {dimension_numbers = #tpu.dot_dimension_numbers<[1], [0], [0], [1], [0, 0, 1, 1], [], []>} : vector<8x32xbf16>, vector<32x32xbf16>, vector<8x32xf32> -> vector<8x32xf32>
    %131 = arith.addf %4, %130 : vector<8x32xf32>
    %c0_51 = arith.constant 0 : index
    %c0_52 = arith.constant 0 : index
    %132 = vector.load %arg12[%c0_51, %c0_52] : memref<1x32xf32, #tpu.memory_space<vmem>>, vector<1x32xf32>
    %133 = vector.broadcast %132 : vector<1x32xf32> to vector<8x32xf32>
    %134 = arith.addf %131, %133 : vector<8x32xf32>
    %c0_53 = arith.constant 0 : index
    %c0_54 = arith.constant 0 : index
    %c0_55 = arith.constant 0 : index
    %135 = vector.load %arg13[%c0_53, %c0_54, %c0_55] : memref<1x8x32xf32, #tpu.memory_space<vmem>>, vector<1x8x32xf32>
    %136 = vector.shape_cast %135 : vector<1x8x32xf32> to vector<8x32xf32>
    %137 = vector.shape_cast %134 : vector<8x32xf32> to vector<1x8x32xf32>
    tpu.vector_store %arg13[%c0_53, %c0_54, %c0_55], %137 {strides = array<i32>} : memref<1x8x32xf32, #tpu.memory_space<vmem>>, vector<1x8x32xf32>,
    return
  }
  func.func @transform_0(%arg0: i32, %arg1: i32) -> (i32, i32, i32) {
    %c0_i32 = arith.constant 0 : i32
    %c0_i32_0 = arith.constant 0 : i32
    return %arg0, %arg1, %c0_i32 : i32, i32, i32
  }
  func.func @transform_1(%arg0: i32, %arg1: i32) -> (i32, i32, i32) {
    %c0_i32 = arith.constant 0 : i32
    %c0_i32_0 = arith.constant 0 : i32
    %c0_i32_1 = arith.constant 0 : i32
    return %arg0, %c0_i32, %c0_i32_0 : i32, i32, i32
  }
  func.func @transform_2(%arg0: i32, %arg1: i32) -> (i32, i32, i32) {
    %c0_i32 = arith.constant 0 : i32
    %c0_i32_0 = arith.constant 0 : i32
    %c0_i32_1 = arith.constant 0 : i32
    return %arg0, %c0_i32, %c0_i32_0 : i32, i32, i32
  }
  func.func @transform_3(%arg0: i32, %arg1: i32) -> (i32, i32) {
    %c0_i32 = arith.constant 0 : i32
    %c0_i32_0 = arith.constant 0 : i32
    %c0_i32_1 = arith.constant 0 : i32
    return %c0_i32, %c0_i32_0 : i32, i32
  }
  func.func @transform_4(%arg0: i32, %arg1: i32) -> (i32, i32) {
    %c0_i32 = arith.constant 0 : i32
    %c0_i32_0 = arith.constant 0 : i32
    %c0_i32_1 = arith.constant 0 : i32
    return %c0_i32, %c0_i32_0 : i32, i32
  }
  func.func @transform_5(%arg0: i32, %arg1: i32) -> (i32, i32) {
    %c0_i32 = arith.constant 0 : i32
    %c0_i32_0 = arith.constant 0 : i32
    %c0_i32_1 = arith.constant 0 : i32
    return %c0_i32, %c0_i32_0 : i32, i32
  }
  func.func @transform_6(%arg0: i32, %arg1: i32) -> (i32, i32) {
    %c0_i32 = arith.constant 0 : i32
    %c0_i32_0 = arith.constant 0 : i32
    %c0_i32_1 = arith.constant 0 : i32
    return %c0_i32, %c0_i32_0 : i32, i32
  }
  func.func @transform_7(%arg0: i32, %arg1: i32) -> (i32, i32) {
    %c0_i32 = arith.constant 0 : i32
    %c0_i32_0 = arith.constant 0 : i32
    %c0_i32_1 = arith.constant 0 : i32
    return %c0_i32, %c0_i32_0 : i32, i32
  }
  func.func @transform_8(%arg0: i32, %arg1: i32) -> (i32, i32) {
    %c0_i32 = arith.constant 0 : i32
    %c0_i32_0 = arith.constant 0 : i32
    %c0_i32_1 = arith.constant 0 : i32
    return %c0_i32, %c0_i32_0 : i32, i32
  }
  func.func @transform_9(%arg0: i32, %arg1: i32) -> (i32, i32) {
    %c0_i32 = arith.constant 0 : i32
    %c0_i32_0 = arith.constant 0 : i32
    %c0_i32_1 = arith.constant 0 : i32
    return %c0_i32, %c0_i32_0 : i32, i32
  }
  func.func @transform_10(%arg0: i32, %arg1: i32) -> (i32, i32) {
    %c0_i32 = arith.constant 0 : i32
    %c0_i32_0 = arith.constant 0 : i32
    %c0_i32_1 = arith.constant 0 : i32
    return %c0_i32, %c0_i32_0 : i32, i32
  }
  func.func @transform_11(%arg0: i32, %arg1: i32) -> (i32, i32, i32) {
    %c0_i32 = arith.constant 0 : i32
    %c0_i32_0 = arith.constant 0 : i32
    return %arg0, %arg1, %c0_i32 : i32, i32, i32
  }
}

module attributes {stable_mosaic.version = 11 : i64} {
  func.func @_ffn_kernel(%arg0: i32, %arg1: memref<16x32xf32, #tpu.memory_space<vmem>>, %arg2: memref<1x32xf32, #tpu.memory_space<vmem>>, %arg3: memref<1x32xf32, #tpu.memory_space<vmem>>, %arg4: memref<32x64xbf16, #tpu.memory_space<vmem>>, %arg5: memref<1x64xf32, #tpu.memory_space<vmem>>, %arg6: memref<64x32xbf16, #tpu.memory_space<vmem>>, %arg7: memref<1x32xf32, #tpu.memory_space<vmem>>, %arg8: memref<1x32xf32, #tpu.memory_space<vmem>>, %arg9: memref<1x32xf32, #tpu.memory_space<vmem>>, %arg10: memref<16x32xf32, #tpu.memory_space<vmem>>) attributes {dimension_semantics = [#tpu.dimension_semantics<parallel>], iteration_bounds = array<i64: 1>, scalar_prefetch = 0 : i64, scratch_operands = 0 : i64, tpu.core_type = #tpu.core_type<tc>, window_params = [{transform_indices = @transform_0, window_bounds = array<i64: 16, 32>}, {pipeline_mode = #tpu.pipeline_mode<synchronous>, transform_indices = @transform_1, window_bounds = array<i64: 1, 32>}, {pipeline_mode = #tpu.pipeline_mode<synchronous>, transform_indices = @transform_2, window_bounds = array<i64: 1, 32>}, {pipeline_mode = #tpu.pipeline_mode<synchronous>, transform_indices = @transform_3, window_bounds = array<i64: 32, 64>}, {pipeline_mode = #tpu.pipeline_mode<synchronous>, transform_indices = @transform_4, window_bounds = array<i64: 1, 64>}, {pipeline_mode = #tpu.pipeline_mode<synchronous>, transform_indices = @transform_5, window_bounds = array<i64: 64, 32>}, {pipeline_mode = #tpu.pipeline_mode<synchronous>, transform_indices = @transform_6, window_bounds = array<i64: 1, 32>}, {pipeline_mode = #tpu.pipeline_mode<synchronous>, transform_indices = @transform_7, window_bounds = array<i64: 1, 32>}, {pipeline_mode = #tpu.pipeline_mode<synchronous>, transform_indices = @transform_8, window_bounds = array<i64: 1, 32>}, {transform_indices = @transform_9, window_bounds = array<i64: 16, 32>}]} {
    %c0 = arith.constant 0 : index
    %c0_0 = arith.constant 0 : index
    %0 = vector.load %arg1[%c0, %c0_0] : memref<16x32xf32, #tpu.memory_space<vmem>>, vector<16x32xf32>
    %c0_1 = arith.constant 0 : index
    %c0_2 = arith.constant 0 : index
    %1 = vector.load %arg2[%c0_1, %c0_2] : memref<1x32xf32, #tpu.memory_space<vmem>>, vector<1x32xf32>
    %c0_3 = arith.constant 0 : index
    %c0_4 = arith.constant 0 : index
    %2 = vector.load %arg3[%c0_3, %c0_4] : memref<1x32xf32, #tpu.memory_space<vmem>>, vector<1x32xf32>
    %cst = arith.constant dense<0.000000e+00> : vector<16xf32>
    %3 = vector.multi_reduction <add>, %0, %cst [1] : vector<16x32xf32> to vector<16xf32>
    %4 = vector.shape_cast %3 : vector<16xf32> to vector<16x1xf32>
    %cst_5 = arith.constant 3.200000e+01 : f32
    %5 = vector.broadcast %cst_5 : f32 to vector<16x1xf32>
    %6 = arith.divf %4, %5 : vector<16x1xf32>
    %7 = vector.broadcast %6 : vector<16x1xf32> to vector<16x32xf32>
    %8 = arith.subf %0, %7 : vector<16x32xf32>
    %9 = arith.mulf %8, %8 : vector<16x32xf32>
    %cst_6 = arith.constant dense<0.000000e+00> : vector<16xf32>
    %10 = vector.multi_reduction <add>, %9, %cst_6 [1] : vector<16x32xf32> to vector<16xf32>
    %11 = vector.shape_cast %10 : vector<16xf32> to vector<16x1xf32>
    %cst_7 = arith.constant 0.0322580636 : f32
    %12 = vector.broadcast %cst_7 : f32 to vector<16x1xf32>
    %13 = arith.mulf %11, %12 : vector<16x1xf32>
    %14 = math.sqrt %13 : vector<16x1xf32>
    %cst_8 = arith.constant 9.99999997E-7 : f32
    %15 = vector.broadcast %cst_8 : f32 to vector<16x1xf32>
    %16 = arith.addf %14, %15 : vector<16x1xf32>
    %17 = tpu.reciprocal %16 : vector<16x1xf32> -> vector<16x1xf32>
    %18 = vector.broadcast %6 : vector<16x1xf32> to vector<16x32xf32>
    %19 = arith.subf %0, %18 : vector<16x32xf32>
    %20 = vector.broadcast %1 : vector<1x32xf32> to vector<16x32xf32>
    %21 = arith.mulf %20, %19 : vector<16x32xf32>
    %22 = vector.broadcast %17 : vector<16x1xf32> to vector<16x32xf32>
    %23 = arith.mulf %21, %22 : vector<16x32xf32>
    %24 = vector.broadcast %2 : vector<1x32xf32> to vector<16x32xf32>
    %25 = arith.addf %23, %24 : vector<16x32xf32>
    %26 = arith.truncf %25 : vector<16x32xf32> to vector<16x32xbf16>
    %c0_9 = arith.constant 0 : index
    %c0_10 = arith.constant 0 : index
    %27 = vector.load %arg4[%c0_9, %c0_10] : memref<32x64xbf16, #tpu.memory_space<vmem>>, vector<32x64xbf16>
    %cst_11 = arith.constant dense<0.000000e+00> : vector<16x64xf32>
    %28 = tpu.matmul %26, %27, %cst_11 {dimension_numbers = #tpu.dot_dimension_numbers<[1], [0], [0], [1], [0, 0, 1, 1], [], []>} : vector<16x32xbf16>, vector<32x64xbf16>, vector<16x64xf32> -> vector<16x64xf32>
    %c0_12 = arith.constant 0 : index
    %c0_13 = arith.constant 0 : index
    %29 = vector.load %arg5[%c0_12, %c0_13] : memref<1x64xf32, #tpu.memory_space<vmem>>, vector<1x64xf32>
    %30 = vector.broadcast %29 : vector<1x64xf32> to vector<16x64xf32>
    %31 = arith.addf %28, %30 : vector<16x64xf32>
    %cst_14 = arith.constant 0.000000e+00 : f32
    %32 = vector.broadcast %cst_14 : f32 to vector<16x64xf32>
    %33 = arith.maximumf %31, %32 : vector<16x64xf32>
    %34 = arith.truncf %33 : vector<16x64xf32> to vector<16x64xbf16>
    %c0_15 = arith.constant 0 : index
    %c0_16 = arith.constant 0 : index
    %35 = vector.load %arg6[%c0_15, %c0_16] : memref<64x32xbf16, #tpu.memory_space<vmem>>, vector<64x32xbf16>
    %cst_17 = arith.constant dense<0.000000e+00> : vector<16x32xf32>
    %36 = tpu.matmul %34, %35, %cst_17 {dimension_numbers = #tpu.dot_dimension_numbers<[1], [0], [0], [1], [0, 0, 1, 1], [], []>} : vector<16x64xbf16>, vector<64x32xbf16>, vector<16x32xf32> -> vector<16x32xf32>
    %37 = arith.addf %0, %36 : vector<16x32xf32>
    %c0_18 = arith.constant 0 : index
    %c0_19 = arith.constant 0 : index
    %38 = vector.load %arg7[%c0_18, %c0_19] : memref<1x32xf32, #tpu.memory_space<vmem>>, vector<1x32xf32>
    %39 = vector.broadcast %38 : vector<1x32xf32> to vector<16x32xf32>
    %40 = arith.addf %37, %39 : vector<16x32xf32>
    %c0_20 = arith.constant 0 : index
    %c0_21 = arith.constant 0 : index
    %41 = vector.load %arg8[%c0_20, %c0_21] : memref<1x32xf32, #tpu.memory_space<vmem>>, vector<1x32xf32>
    %c0_22 = arith.constant 0 : index
    %c0_23 = arith.constant 0 : index
    %42 = vector.load %arg9[%c0_22, %c0_23] : memref<1x32xf32, #tpu.memory_space<vmem>>, vector<1x32xf32>
    %cst_24 = arith.constant dense<0.000000e+00> : vector<16xf32>
    %43 = vector.multi_reduction <add>, %40, %cst_24 [1] : vector<16x32xf32> to vector<16xf32>
    %44 = vector.shape_cast %43 : vector<16xf32> to vector<16x1xf32>
    %cst_25 = arith.constant 3.200000e+01 : f32
    %45 = vector.broadcast %cst_25 : f32 to vector<16x1xf32>
    %46 = arith.divf %44, %45 : vector<16x1xf32>
    %47 = vector.broadcast %46 : vector<16x1xf32> to vector<16x32xf32>
    %48 = arith.subf %40, %47 : vector<16x32xf32>
    %49 = arith.mulf %48, %48 : vector<16x32xf32>
    %cst_26 = arith.constant dense<0.000000e+00> : vector<16xf32>
    %50 = vector.multi_reduction <add>, %49, %cst_26 [1] : vector<16x32xf32> to vector<16xf32>
    %51 = vector.shape_cast %50 : vector<16xf32> to vector<16x1xf32>
    %cst_27 = arith.constant 0.0322580636 : f32
    %52 = vector.broadcast %cst_27 : f32 to vector<16x1xf32>
    %53 = arith.mulf %51, %52 : vector<16x1xf32>
    %54 = math.sqrt %53 : vector<16x1xf32>
    %cst_28 = arith.constant 9.99999997E-7 : f32
    %55 = vector.broadcast %cst_28 : f32 to vector<16x1xf32>
    %56 = arith.addf %54, %55 : vector<16x1xf32>
    %57 = tpu.reciprocal %56 : vector<16x1xf32> -> vector<16x1xf32>
    %58 = vector.broadcast %46 : vector<16x1xf32> to vector<16x32xf32>
    %59 = arith.subf %40, %58 : vector<16x32xf32>
    %60 = vector.broadcast %41 : vector<1x32xf32> to vector<16x32xf32>
    %61 = arith.mulf %60, %59 : vector<16x32xf32>
    %62 = vector.broadcast %57 : vector<16x1xf32> to vector<16x32xf32>
    %63 = arith.mulf %61, %62 : vector<16x32xf32>
    %64 = vector.broadcast %42 : vector<1x32xf32> to vector<16x32xf32>
    %65 = arith.addf %63, %64 : vector<16x32xf32>
    %c0_29 = arith.constant 0 : index
    %c0_30 = arith.constant 0 : index
    %66 = vector.load %arg10[%c0_29, %c0_30] : memref<16x32xf32, #tpu.memory_space<vmem>>, vector<16x32xf32>
    tpu.vector_store %arg10[%c0_29, %c0_30], %65 {strides = array<i32>} : memref<16x32xf32, #tpu.memory_space<vmem>>, vector<16x32xf32>,
    return
  }
  func.func @transform_0(%arg0: i32) -> (i32, i32) {
    %c0_i32 = arith.constant 0 : i32
    %c0_i32_0 = arith.constant 0 : i32
    return %arg0, %c0_i32 : i32, i32
  }
  func.func @transform_1(%arg0: i32) -> (i32, i32) {
    %c0_i32 = arith.constant 0 : i32
    %c0_i32_0 = arith.constant 0 : i32
    %c0_i32_1 = arith.constant 0 : i32
    return %c0_i32, %c0_i32_0 : i32, i32
  }
  func.func @transform_2(%arg0: i32) -> (i32, i32) {
    %c0_i32 = arith.constant 0 : i32
    %c0_i32_0 = arith.constant 0 : i32
    %c0_i32_1 = arith.constant 0 : i32
    return %c0_i32, %c0_i32_0 : i32, i32
  }
  func.func @transform_3(%arg0: i32) -> (i32, i32) {
    %c0_i32 = arith.constant 0 : i32
    %c0_i32_0 = arith.constant 0 : i32
    %c0_i32_1 = arith.constant 0 : i32
    return %c0_i32, %c0_i32_0 : i32, i32
  }
  func.func @transform_4(%arg0: i32) -> (i32, i32) {
    %c0_i32 = arith.constant 0 : i32
    %c0_i32_0 = arith.constant 0 : i32
    %c0_i32_1 = arith.constant 0 : i32
    return %c0_i32, %c0_i32_0 : i32, i32
  }
  func.func @transform_5(%arg0: i32) -> (i32, i32) {
    %c0_i32 = arith.constant 0 : i32
    %c0_i32_0 = arith.constant 0 : i32
    %c0_i32_1 = arith.constant 0 : i32
    return %c0_i32, %c0_i32_0 : i32, i32
  }
  func.func @transform_6(%arg0: i32) -> (i32, i32) {
    %c0_i32 = arith.constant 0 : i32
    %c0_i32_0 = arith.constant 0 : i32
    %c0_i32_1 = arith.constant 0 : i32
    return %c0_i32, %c0_i32_0 : i32, i32
  }
  func.func @transform_7(%arg0: i32) -> (i32, i32) {
    %c0_i32 = arith.constant 0 : i32
    %c0_i32_0 = arith.constant 0 : i32
    %c0_i32_1 = arith.constant 0 : i32
    return %c0_i32, %c0_i32_0 : i32, i32
  }
  func.func @transform_8(%arg0: i32) -> (i32, i32) {
    %c0_i32 = arith.constant 0 : i32
    %c0_i32_0 = arith.constant 0 : i32
    %c0_i32_1 = arith.constant 0 : i32
    return %c0_i32, %c0_i32_0 : i32, i32
  }
  func.func @transform_9(%arg0: i32) -> (i32, i32) {
    %c0_i32 = arith.constant 0 : i32
    %c0_i32_0 = arith.constant 0 : i32
    return %arg0, %c0_i32 : i32, i32
  }
}

module attributes {stable_mosaic.version = 11 : i64} {
  func.func @_attn_kernel(%arg0: i32, %arg1: i32, %arg2: memref<1x8x32xf32, #tpu.memory_space<vmem>>, %arg3: memref<1x8x32xf32, #tpu.memory_space<vmem>>, %arg4: memref<1x1x8xf32, #tpu.memory_space<vmem>>, %arg5: memref<1x32xf32, #tpu.memory_space<vmem>>, %arg6: memref<1x32xf32, #tpu.memory_space<vmem>>, %arg7: memref<32x32xbf16, #tpu.memory_space<vmem>>, %arg8: memref<1x32xf32, #tpu.memory_space<vmem>>, %arg9: memref<32x64xbf16, #tpu.memory_space<vmem>>, %arg10: memref<1x64xf32, #tpu.memory_space<vmem>>, %arg11: memref<32x32xbf16, #tpu.memory_space<vmem>>, %arg12: memref<1x32xf32, #tpu.memory_space<vmem>>, %arg13: memref<1x8x32xf32, #tpu.memory_space<vmem>>, %arg14: memref<8x64xbf16, #tpu.memory_space<vmem>>, %arg15: memref<8x32xf32, #tpu.memory_space<vmem>>) attributes {dimension_semantics = [#tpu.dimension_semantics<parallel>, #tpu.dimension_semantics<arbitrary>], iteration_bounds = array<i64: 2, 1>, scalar_prefetch = 0 : i64, scratch_operands = 2 : i64, tpu.core_type = #tpu.core_type<tc>, window_params = [{transform_indices = @transform_0, window_bounds = array<i64: 1, 8, 32>}, {transform_indices = @transform_1, window_bounds = array<i64: 1, 8, 32>}, {transform_indices = @transform_2, window_bounds = array<i64: 1, 1, 8>}, {pipeline_mode = #tpu.pipeline_mode<synchronous>, transform_indices = @transform_3, window_bounds = array<i64: 1, 32>}, {pipeline_mode = #tpu.pipeline_mode<synchronous>, transform_indices = @transform_4, window_bounds = array<i64: 1, 32>}, {pipeline_mode = #tpu.pipeline_mode<synchronous>, transform_indices = @transform_5, window_bounds = array<i64: 32, 32>}, {pipeline_mode = #tpu.pipeline_mode<synchronous>, transform_indices = @transform_6, window_bounds = array<i64: 1, 32>}, {pipeline_mode = #tpu.pipeline_mode<synchronous>, transform_indices = @transform_7, window_bounds = array<i64: 32, 64>}, {pipeline_mode = #tpu.pipeline_mode<synchronous>, transform_indices = @transform_8, window_bounds = array<i64: 1, 64>}, {pipeline_mode = #tpu.pipeline_mode<synchronous>, transform_indices = @transform_9, window_bounds = array<i64: 32, 32>}, {pipeline_mode = #tpu.pipeline_mode<synchronous>, transform_indices = @transform_10, window_bounds = array<i64: 1, 32>}, {transform_indices = @transform_11, window_bounds = array<i64: 1, 8, 32>}]} {
    %c0_i32 = arith.constant 0 : i32
    %0 = arith.cmpi eq, %arg1, %c0_i32 : i32
    %1 = arith.extui %0 : i1 to i32
    %c0_i32_0 = arith.constant 0 : i32
    %2 = arith.cmpi ne, %1, %c0_i32_0 : i32
    scf.if %2 {
      %c0_54 = arith.constant 0 : index
      %c0_55 = arith.constant 0 : index
      %c0_56 = arith.constant 0 : index
      %131 = vector.load %arg3[%c0_54, %c0_55, %c0_56] : memref<1x8x32xf32, #tpu.memory_space<vmem>>, vector<1x8x32xf32>
      %132 = vector.shape_cast %131 : vector<1x8x32xf32> to vector<8x32xf32>
      %133 = arith.truncf %132 : vector<8x32xf32> to vector<8x32xbf16>
      %c0_57 = arith.constant 0 : index
      %c0_58 = arith.constant 0 : index
      %134 = vector.load %arg9[%c0_57, %c0_58] : memref<32x64xbf16, #tpu.memory_space<vmem>>, vector<32x64xbf16>
      %cst_59 = arith.constant dense<0.000000e+00> : vector<8x64xf32>
      %135 = tpu.matmul %133, %134, %cst_59 {dimension_numbers = #tpu.dot_dimension_numbers<[1], [0], [0], [1], [0, 0, 1, 1], [], []>} : vector<8x32xbf16>, vector<32x64xbf16>, vector<8x64xf32> -> vector<8x64xf32>
      %c0_60 = arith.constant 0 : index
      %c0_61 = arith.constant 0 : index
      %136 = vector.load %arg10[%c0_60, %c0_61] : memref<1x64xf32, #tpu.memory_space<vmem>>, vector<1x64xf32>
      %137 = vector.broadcast %136 : vector<1x64xf32> to vector<8x64xf32>
      %138 = arith.addf %135, %137 : vector<8x64xf32>
      %139 = arith.truncf %138 : vector<8x64xf32> to vector<8x64xbf16>
      %c0_62 = arith.constant 0 : index
      %c0_63 = arith.constant 0 : index
      %140 = vector.load %arg14[%c0_62, %c0_63] : memref<8x64xbf16, #tpu.memory_space<vmem>>, vector<8x64xbf16>
      tpu.vector_store %arg14[%c0_62, %c0_63], %139 {strides = array<i32>} : memref<8x64xbf16, #tpu.memory_space<vmem>>, vector<8x64xbf16>,
    } else {
    }
    %c0 = arith.constant 0 : index
    %c0_1 = arith.constant 0 : index
    %c0_2 = arith.constant 0 : index
    %3 = vector.load %arg2[%c0, %c0_1, %c0_2] : memref<1x8x32xf32, #tpu.memory_space<vmem>>, vector<1x8x32xf32>
    %4 = vector.shape_cast %3 : vector<1x8x32xf32> to vector<8x32xf32>
    %c0_3 = arith.constant 0 : index
    %c0_4 = arith.constant 0 : index
    %5 = vector.load %arg5[%c0_3, %c0_4] : memref<1x32xf32, #tpu.memory_space<vmem>>, vector<1x32xf32>
    %c0_5 = arith.constant 0 : index
    %c0_6 = arith.constant 0 : index
    %6 = vector.load %arg6[%c0_5, %c0_6] : memref<1x32xf32, #tpu.memory_space<vmem>>, vector<1x32xf32>
    %cst = arith.constant dense<0.000000e+00> : vector<8xf32>
    %7 = vector.multi_reduction <add>, %4, %cst [1] : vector<8x32xf32> to vector<8xf32>
    %8 = vector.shape_cast %7 : vector<8xf32> to vector<8x1xf32>
    %cst_7 = arith.constant 3.200000e+01 : f32
    %9 = vector.broadcast %cst_7 : f32 to vector<8x1xf32>
    %10 = arith.divf %8, %9 : vector<8x1xf32>
    %11 = vector.broadcast %10 : vector<8x1xf32> to vector<8x32xf32>
    %12 = arith.subf %4, %11 : vector<8x32xf32>
    %13 = arith.mulf %12, %12 : vector<8x32xf32>
    %cst_8 = arith.constant dense<0.000000e+00> : vector<8xf32>
    %14 = vector.multi_reduction <add>, %13, %cst_8 [1] : vector<8x32xf32> to vector<8xf32>
    %15 = vector.shape_cast %14 : vector<8xf32> to vector<8x1xf32>
    %cst_9 = arith.constant 0.0322580636 : f32
    %16 = vector.broadcast %cst_9 : f32 to vector<8x1xf32>
    %17 = arith.mulf %15, %16 : vector<8x1xf32>
    %18 = math.sqrt %17 : vector<8x1xf32>
    %cst_10 = arith.constant 9.99999997E-7 : f32
    %19 = vector.broadcast %cst_10 : f32 to vector<8x1xf32>
    %20 = arith.addf %18, %19 : vector<8x1xf32>
    %21 = tpu.reciprocal %20 : vector<8x1xf32> -> vector<8x1xf32>
    %22 = vector.broadcast %10 : vector<8x1xf32> to vector<8x32xf32>
    %23 = arith.subf %4, %22 : vector<8x32xf32>
    %24 = vector.broadcast %5 : vector<1x32xf32> to vector<8x32xf32>
    %25 = arith.mulf %24, %23 : vector<8x32xf32>
    %26 = vector.broadcast %21 : vector<8x1xf32> to vector<8x32xf32>
    %27 = arith.mulf %25, %26 : vector<8x32xf32>
    %28 = vector.broadcast %6 : vector<1x32xf32> to vector<8x32xf32>
    %29 = arith.addf %27, %28 : vector<8x32xf32>
    %30 = arith.truncf %29 : vector<8x32xf32> to vector<8x32xbf16>
    %c0_11 = arith.constant 0 : index
    %c0_12 = arith.constant 0 : index
    %31 = vector.load %arg7[%c0_11, %c0_12] : memref<32x32xbf16, #tpu.memory_space<vmem>>, vector<32x32xbf16>
    %cst_13 = arith.constant dense<0.000000e+00> : vector<8x32xf32>
    %32 = tpu.matmul %30, %31, %cst_13 {dimension_numbers = #tpu.dot_dimension_numbers<[1], [0], [0], [1], [0, 0, 1, 1], [], []>} : vector<8x32xbf16>, vector<32x32xbf16>, vector<8x32xf32> -> vector<8x32xf32>
    %c0_14 = arith.constant 0 : index
    %c0_15 = arith.constant 0 : index
    %33 = vector.load %arg8[%c0_14, %c0_15] : memref<1x32xf32, #tpu.memory_space<vmem>>, vector<1x32xf32>
    %34 = vector.broadcast %33 : vector<1x32xf32> to vector<8x32xf32>
    %35 = arith.addf %32, %34 : vector<8x32xf32>
    %36 = arith.truncf %35 : vector<8x32xf32> to vector<8x32xbf16>
    %c0_16 = arith.constant 0 : index
    %c0_17 = arith.constant 0 : index
    %c0_18 = arith.constant 0 : index
    %37 = vector.load %arg4[%c0_16, %c0_17, %c0_18] : memref<1x1x8xf32, #tpu.memory_space<vmem>>, vector<1x1x8xf32>
    %38 = vector.shape_cast %37 : vector<1x1x8xf32> to vector<1x8xf32>
    %cst_19 = arith.constant 1.000000e+00 : f32
    %39 = vector.broadcast %cst_19 : f32 to vector<1x8xf32>
    %40 = arith.subf %38, %39 : vector<1x8xf32>
    %cst_20 = arith.constant 1.000000e+09 : f32
    %41 = vector.broadcast %cst_20 : f32 to vector<1x8xf32>
    %42 = arith.mulf %40, %41 : vector<1x8xf32>
    %c0_21 = arith.constant 0 : index
    %c0_22 = arith.constant 0 : index
    %43 = vector.load %arg14[%c0_21, %c0_22] : memref<8x64xbf16, #tpu.memory_space<vmem>>, vector<8x64xbf16>
    %44 = vector.extract_strided_slice %43 {offsets = [0, 0], sizes = [8, 8], strides = [1, 1]} : vector<8x64xbf16> to vector<8x8xbf16>
    %45 = vector.extract_strided_slice %43 {offsets = [0, 32], sizes = [8, 8], strides = [1, 1]} : vector<8x64xbf16> to vector<8x8xbf16>
    %46 = vector.extract_strided_slice %36 {offsets = [0, 0], sizes = [8, 8], strides = [1, 1]} : vector<8x32xbf16> to vector<8x8xbf16>
    %cst_23 = arith.constant dense<0.000000e+00> : vector<8x8xf32>
    %47 = tpu.matmul %46, %44, %cst_23 {dimension_numbers = #tpu.dot_dimension_numbers<[1], [1], [0], [0], [0, 0, 1, 0], [], []>} : vector<8x8xbf16>, vector<8x8xbf16>, vector<8x8xf32> -> vector<8x8xf32>
    %48 = vector.broadcast %42 : vector<1x8xf32> to vector<8x8xf32>
    %49 = arith.addf %47, %48 : vector<8x8xf32>
    %cst_24 = arith.constant dense<0xFF800000> : vector<8xf32>
    %50 = vector.multi_reduction <maximumf>, %49, %cst_24 [1] : vector<8x8xf32> to vector<8xf32>
    %51 = vector.shape_cast %50 : vector<8xf32> to vector<8x1xf32>
    %52 = vector.broadcast %51 : vector<8x1xf32> to vector<8x8xf32>
    %53 = arith.subf %49, %52 : vector<8x8xf32>
    %54 = math.exp %53 : vector<8x8xf32>
    %cst_25 = arith.constant dense<0.000000e+00> : vector<8xf32>
    %55 = vector.multi_reduction <add>, %54, %cst_25 [1] : vector<8x8xf32> to vector<8xf32>
    %56 = vector.shape_cast %55 : vector<8xf32> to vector<8x1xf32>
    %57 = tpu.reciprocal %56 {approx = true} : vector<8x1xf32> -> vector<8x1xf32>
    %58 = vector.broadcast %57 : vector<8x1xf32> to vector<8x8xf32>
    %59 = arith.mulf %54, %58 : vector<8x8xf32>
    %60 = arith.truncf %59 : vector<8x8xf32> to vector<8x8xbf16>
    %cst_26 = arith.constant dense<0.000000e+00> : vector<8x8xf32>
    %61 = tpu.matmul %60, %45, %cst_26 {dimension_numbers = #tpu.dot_dimension_numbers<[1], [0], [0], [1], [0, 0, 1, 1], [], []>} : vector<8x8xbf16>, vector<8x8xbf16>, vector<8x8xf32> -> vector<8x8xf32>
    %c0_27 = arith.constant 0 : index
    %c0_28 = arith.constant 0 : index
    %62 = vector.load %arg15[%c0_27, %c0_28] : memref<8x32xf32, #tpu.memory_space<vmem>>, vector<8x8xf32>
    tpu.vector_store %arg15[%c0_27, %c0_28], %61 {strides = array<i32>} : memref<8x32xf32, #tpu.memory_space<vmem>>, vector<8x8xf32>,
    %63 = vector.extract_strided_slice %43 {offsets = [0, 8], sizes = [8, 8], strides = [1, 1]} : vector<8x64xbf16> to vector<8x8xbf16>
    %64 = vector.extract_strided_slice %43 {offsets = [0, 40], sizes = [8, 8], strides = [1, 1]} : vector<8x64xbf16> to vector<8x8xbf16>
    %65 = vector.extract_strided_slice %36 {offsets = [0, 8], sizes = [8, 8], strides = [1, 1]} : vector<8x32xbf16> to vector<8x8xbf16>
    %cst_29 = arith.constant dense<0.000000e+00> : vector<8x8xf32>
    %66 = tpu.matmul %65, %63, %cst_29 {dimension_numbers = #tpu.dot_dimension_numbers<[1], [1], [0], [0], [0, 0, 1, 0], [], []>} : vector<8x8xbf16>, vector<8x8xbf16>, vector<8x8xf32> -> vector<8x8xf32>
    %67 = vector.broadcast %42 : vector<1x8xf32> to vector<8x8xf32>
    %68 = arith.addf %66, %67 : vector<8x8xf32>
    %cst_30 = arith.constant dense<0xFF800000> : vector<8xf32>
    %69 = vector.multi_reduction <maximumf>, %68, %cst_30 [1] : vector<8x8xf32> to vector<8xf32>
    %70 = vector.shape_cast %69 : vector<8xf32> to vector<8x1xf32>
    %71 = vector.broadcast %70 : vector<8x1xf32> to vector<8x8xf32>
    %72 = arith.subf %68, %71 : vector<8x8xf32>
    %73 = math.exp %72 : vector<8x8xf32>
    %cst_31 = arith.constant dense<0.000000e+00> : vector<8xf32>
    %74 = vector.multi_reduction <add>, %73, %cst_31 [1] : vector<8x8xf32> to vector<8xf32>
    %75 = vector.shape_cast %74 : vector<8xf32> to vector<8x1xf32>
    %76 = tpu.reciprocal %75 {approx = true} : vector<8x1xf32> -> vector<8x1xf32>
    %77 = vector.broadcast %76 : vector<8x1xf32> to vector<8x8xf32>
    %78 = arith.mulf %73, %77 : vector<8x8xf32>
    %79 = arith.truncf %78 : vector<8x8xf32> to vector<8x8xbf16>
    %cst_32 = arith.constant dense<0.000000e+00> : vector<8x8xf32>
    %80 = tpu.matmul %79, %64, %cst_32 {dimension_numbers = #tpu.dot_dimension_numbers<[1], [0], [0], [1], [0, 0, 1, 1], [], []>} : vector<8x8xbf16>, vector<8x8xbf16>, vector<8x8xf32> -> vector<8x8xf32>
    %c0_33 = arith.constant 0 : index
    %c8 = arith.constant 8 : index
    %81 = vector.load %arg15[%c0_33, %c8] : memref<8x32xf32, #tpu.memory_space<vmem>>, vector<8x8xf32>
    tpu.vector_store %arg15[%c0_33, %c8], %80 {strides = array<i32>} : memref<8x32xf32, #tpu.memory_space<vmem>>, vector<8x8xf32>,
    %82 = vector.extract_strided_slice %43 {offsets = [0, 16], sizes = [8, 8], strides = [1, 1]} : vector<8x64xbf16> to vector<8x8xbf16>
    %83 = vector.extract_strided_slice %43 {offsets = [0, 48], sizes = [8, 8], strides = [1, 1]} : vector<8x64xbf16> to vector<8x8xbf16>
    %84 = vector.extract_strided_slice %36 {offsets = [0, 16], sizes = [8, 8], strides = [1, 1]} : vector<8x32xbf16> to vector<8x8xbf16>
    %cst_34 = arith.constant dense<0.000000e+00> : vector<8x8xf32>
    %85 = tpu.matmul %84, %82, %cst_34 {dimension_numbers = #tpu.dot_dimension_numbers<[1], [1], [0], [0], [0, 0, 1, 0], [], []>} : vector<8x8xbf16>, vector<8x8xbf16>, vector<8x8xf32> -> vector<8x8xf32>
    %86 = vector.broadcast %42 : vector<1x8xf32> to vector<8x8xf32>
    %87 = arith.addf %85, %86 : vector<8x8xf32>
    %cst_35 = arith.constant dense<0xFF800000> : vector<8xf32>
    %88 = vector.multi_reduction <maximumf>, %87, %cst_35 [1] : vector<8x8xf32> to vector<8xf32>
    %89 = vector.shape_cast %88 : vector<8xf32> to vector<8x1xf32>
    %90 = vector.broadcast %89 : vector<8x1xf32> to vector<8x8xf32>
    %91 = arith.subf %87, %90 : vector<8x8xf32>
    %92 = math.exp %91 : vector<8x8xf32>
    %cst_36 = arith.constant dense<0.000000e+00> : vector<8xf32>
    %93 = vector.multi_reduction <add>, %92, %cst_36 [1] : vector<8x8xf32> to vector<8xf32>
    %94 = vector.shape_cast %93 : vector<8xf32> to vector<8x1xf32>
    %95 = tpu.reciprocal %94 {approx = true} : vector<8x1xf32> -> vector<8x1xf32>
    %96 = vector.broadcast %95 : vector<8x1xf32> to vector<8x8xf32>
    %97 = arith.mulf %92, %96 : vector<8x8xf32>
    %98 = arith.truncf %97 : vector<8x8xf32> to vector<8x8xbf16>
    %cst_37 = arith.constant dense<0.000000e+00> : vector<8x8xf32>
    %99 = tpu.matmul %98, %83, %cst_37 {dimension_numbers = #tpu.dot_dimension_numbers<[1], [0], [0], [1], [0, 0, 1, 1], [], []>} : vector<8x8xbf16>, vector<8x8xbf16>, vector<8x8xf32> -> vector<8x8xf32>
    %c0_38 = arith.constant 0 : index
    %c16 = arith.constant 16 : index
    %100 = vector.load %arg15[%c0_38, %c16] : memref<8x32xf32, #tpu.memory_space<vmem>>, vector<8x8xf32>
    tpu.vector_store %arg15[%c0_38, %c16], %99 {strides = array<i32>} : memref<8x32xf32, #tpu.memory_space<vmem>>, vector<8x8xf32>,
    %101 = vector.extract_strided_slice %43 {offsets = [0, 24], sizes = [8, 8], strides = [1, 1]} : vector<8x64xbf16> to vector<8x8xbf16>
    %102 = vector.extract_strided_slice %43 {offsets = [0, 56], sizes = [8, 8], strides = [1, 1]} : vector<8x64xbf16> to vector<8x8xbf16>
    %103 = vector.extract_strided_slice %36 {offsets = [0, 24], sizes = [8, 8], strides = [1, 1]} : vector<8x32xbf16> to vector<8x8xbf16>
    %cst_39 = arith.constant dense<0.000000e+00> : vector<8x8xf32>
    %104 = tpu.matmul %103, %101, %cst_39 {dimension_numbers = #tpu.dot_dimension_numbers<[1], [1], [0], [0], [0, 0, 1, 0], [], []>} : vector<8x8xbf16>, vector<8x8xbf16>, vector<8x8xf32> -> vector<8x8xf32>
    %105 = vector.broadcast %42 : vector<1x8xf32> to vector<8x8xf32>
    %106 = arith.addf %104, %105 : vector<8x8xf32>
    %cst_40 = arith.constant dense<0xFF800000> : vector<8xf32>
    %107 = vector.multi_reduction <maximumf>, %106, %cst_40 [1] : vector<8x8xf32> to vector<8xf32>
    %108 = vector.shape_cast %107 : vector<8xf32> to vector<8x1xf32>
    %109 = vector.broadcast %108 : vector<8x1xf32> to vector<8x8xf32>
    %110 = arith.subf %106, %109 : vector<8x8xf32>
    %111 = math.exp %110 : vector<8x8xf32>
    %cst_41 = arith.constant dense<0.000000e+00> : vector<8xf32>
    %112 = vector.multi_reduction <add>, %111, %cst_41 [1] : vector<8x8xf32> to vector<8xf32>
    %113 = vector.shape_cast %112 : vector<8xf32> to vector<8x1xf32>
    %114 = tpu.reciprocal %113 {approx = true} : vector<8x1xf32> -> vector<8x1xf32>
    %115 = vector.broadcast %114 : vector<8x1xf32> to vector<8x8xf32>
    %116 = arith.mulf %111, %115 : vector<8x8xf32>
    %117 = arith.truncf %116 : vector<8x8xf32> to vector<8x8xbf16>
    %cst_42 = arith.constant dense<0.000000e+00> : vector<8x8xf32>
    %118 = tpu.matmul %117, %102, %cst_42 {dimension_numbers = #tpu.dot_dimension_numbers<[1], [0], [0], [1], [0, 0, 1, 1], [], []>} : vector<8x8xbf16>, vector<8x8xbf16>, vector<8x8xf32> -> vector<8x8xf32>
    %c0_43 = arith.constant 0 : index
    %c24 = arith.constant 24 : index
    %119 = vector.load %arg15[%c0_43, %c24] : memref<8x32xf32, #tpu.memory_space<vmem>>, vector<8x8xf32>
    tpu.vector_store %arg15[%c0_43, %c24], %118 {strides = array<i32>} : memref<8x32xf32, #tpu.memory_space<vmem>>, vector<8x8xf32>,
    %c0_44 = arith.constant 0 : index
    %c0_45 = arith.constant 0 : index
    %120 = vector.load %arg15[%c0_44, %c0_45] : memref<8x32xf32, #tpu.memory_space<vmem>>, vector<8x32xf32>
    %121 = arith.truncf %120 : vector<8x32xf32> to vector<8x32xbf16>
    %c0_46 = arith.constant 0 : index
    %c0_47 = arith.constant 0 : index
    %122 = vector.load %arg11[%c0_46, %c0_47] : memref<32x32xbf16, #tpu.memory_space<vmem>>, vector<32x32xbf16>
    %cst_48 = arith.constant dense<0.000000e+00> : vector<8x32xf32>
    %123 = tpu.matmul %121, %122, %cst_48 {dimension_numbers = #tpu.dot_dimension_numbers<[1], [0], [0], [1], [0, 0, 1, 1], [], []>} : vector<8x32xbf16>, vector<32x32xbf16>, vector<8x32xf32> -> vector<8x32xf32>
    %124 = arith.addf %4, %123 : vector<8x32xf32>
    %c0_49 = arith.constant 0 : index
    %c0_50 = arith.constant 0 : index
    %125 = vector.load %arg12[%c0_49, %c0_50] : memref<1x32xf32, #tpu.memory_space<vmem>>, vector<1x32xf32>
    %126 = vector.broadcast %125 : vector<1x32xf32> to vector<8x32xf32>
    %127 = arith.addf %124, %126 : vector<8x32xf32>
    %c0_51 = arith.constant 0 : index
    %c0_52 = arith.constant 0 : index
    %c0_53 = arith.constant 0 : index
    %128 = vector.load %arg13[%c0_51, %c0_52, %c0_53] : memref<1x8x32xf32, #tpu.memory_space<vmem>>, vector<1x8x32xf32>
    %129 = vector.shape_cast %128 : vector<1x8x32xf32> to vector<8x32xf32>
    %130 = vector.shape_cast %127 : vector<8x32xf32> to vector<1x8x32xf32>
    tpu.vector_store %arg13[%c0_51, %c0_52, %c0_53], %130 {strides = array<i32>} : memref<1x8x32xf32, #tpu.memory_space<vmem>>, vector<1x8x32xf32>,
    return
  }
  func.func @transform_0(%arg0: i32, %arg1: i32) -> (i32, i32, i32) {
    %c0_i32 = arith.constant 0 : i32
    %c0_i32_0 = arith.constant 0 : i32
    return %arg0, %arg1, %c0_i32 : i32, i32, i32
  }
  func.func @transform_1(%arg0: i32, %arg1: i32) -> (i32, i32, i32) {
    %c0_i32 = arith.constant 0 : i32
    %c0_i32_0 = arith.constant 0 : i32
    %c0_i32_1 = arith.constant 0 : i32
    return %arg0, %c0_i32, %c0_i32_0 : i32, i32, i32
  }
  func.func @transform_2(%arg0: i32, %arg1: i32) -> (i32, i32, i32) {
    %c0_i32 = arith.constant 0 : i32
    %c0_i32_0 = arith.constant 0 : i32
    %c0_i32_1 = arith.constant 0 : i32
    return %arg0, %c0_i32, %c0_i32_0 : i32, i32, i32
  }
  func.func @transform_3(%arg0: i32, %arg1: i32) -> (i32, i32) {
    %c0_i32 = arith.constant 0 : i32
    %c0_i32_0 = arith.constant 0 : i32
    %c0_i32_1 = arith.constant 0 : i32
    return %c0_i32, %c0_i32_0 : i32, i32
  }
  func.func @transform_4(%arg0: i32, %arg1: i32) -> (i32, i32) {
    %c0_i32 = arith.constant 0 : i32
    %c0_i32_0 = arith.constant 0 : i32
    %c0_i32_1 = arith.constant 0 : i32
    return %c0_i32, %c0_i32_0 : i32, i32
  }
  func.func @transform_5(%arg0: i32, %arg1: i32) -> (i32, i32) {
    %c0_i32 = arith.constant 0 : i32
    %c0_i32_0 = arith.constant 0 : i32
    %c0_i32_1 = arith.constant 0 : i32
    return %c0_i32, %c0_i32_0 : i32, i32
  }
  func.func @transform_6(%arg0: i32, %arg1: i32) -> (i32, i32) {
    %c0_i32 = arith.constant 0 : i32
    %c0_i32_0 = arith.constant 0 : i32
    %c0_i32_1 = arith.constant 0 : i32
    return %c0_i32, %c0_i32_0 : i32, i32
  }
  func.func @transform_7(%arg0: i32, %arg1: i32) -> (i32, i32) {
    %c0_i32 = arith.constant 0 : i32
    %c0_i32_0 = arith.constant 0 : i32
    %c0_i32_1 = arith.constant 0 : i32
    return %c0_i32, %c0_i32_0 : i32, i32
  }
  func.func @transform_8(%arg0: i32, %arg1: i32) -> (i32, i32) {
    %c0_i32 = arith.constant 0 : i32
    %c0_i32_0 = arith.constant 0 : i32
    %c0_i32_1 = arith.constant 0 : i32
    return %c0_i32, %c0_i32_0 : i32, i32
  }
  func.func @transform_9(%arg0: i32, %arg1: i32) -> (i32, i32) {
    %c0_i32 = arith.constant 0 : i32
    %c0_i32_0 = arith.constant 0 : i32
    %c0_i32_1 = arith.constant 0 : i32
    return %c0_i32, %c0_i32_0 : i32, i32
  }
  func.func @transform_10(%arg0: i32, %arg1: i32) -> (i32, i32) {
    %c0_i32 = arith.constant 0 : i32
    %c0_i32_0 = arith.constant 0 : i32
    %c0_i32_1 = arith.constant 0 : i32
    return %c0_i32, %c0_i32_0 : i32, i32
  }
  func.func @transform_11(%arg0: i32, %arg1: i32) -> (i32, i32, i32) {
    %c0_i32 = arith.constant 0 : i32
    %c0_i32_0 = arith.constant 0 : i32
    return %arg0, %arg1, %c0_i32 : i32, i32, i32
  }
}

</mosaic_0001>

<bundles_post_ra>
// kernel: encoder_decoder_forward.11
= control target key start
LH: loop header
LB: loop body
LE: loop exit
PB: predicated region body
PF: predicated region fallthrough
CT: control target
= control target key end

     0   :  { %vm31_vm0 = vcmask 261120   ;;  %v310_v14 = vmov 0.0   ;;  %vm311_vm1 = vmmov 0   ;;  %vm192_vm6 = vcmask 523264   ;;  %s411_s0 = inlined_call_operand.vmem [shape: f32[16,32], index: 0, kind: input, shape index: {}]   ;;  %s412_s3 = inlined_call_operand.vmem [shape: bf16[32,64], index: 3, kind: input, shape index: {}]   ;;  %s413_s5 = inlined_call_operand.vmem [shape: bf16[64,32], index: 5, kind: input, shape index: {}]   ;;  %s414_s1 = inlined_call_operand.vmem [shape: f32[1,32], index: 1, kind: input, shape index: {}]   ;;  %s415_s2 = inlined_call_operand.vmem [shape: f32[1,32], index: 2, kind: input, shape index: {}]   ;;  %s416_s4 = inlined_call_operand.vmem [shape: f32[1,64], index: 4, kind: input, shape index: {}]   ;;  %s417_s6 = inlined_call_operand.vmem [shape: f32[1,32], index: 6, kind: input, shape index: {}]   ;;  %s418_s7 = inlined_call_operand.vmem [shape: f32[16,32], index: 7, kind: output, shape index: {}]  }
   0x1   :  { %v355_v0 = vld [vmem:[%s411_s0] sm:$0xff]  ;;  %v360_v1 = vld [vmem:[%s411_s0 + $0x8] sm:$0xff]  ;;  %274 = vmatprep.subr.bf16.mxu0 %v310_v14  ;;  %278 = vmatprep.mubr.msk.bf16.mxu0 %vm311_vm1, %v310_v14  ;;  %v298_v17 = vld [vmem:[%s413_s5 + $0x18] sm:$0xff]  }
   0x2   :  { %v32_v2 = vsel %vm31_vm0, %v355_v0, 0.0  ;;  %v35_v3 = vsel %vm31_vm0, %v360_v1, 0.0  ;;  %v296_v15 = vld [vmem:[%s412_s3 + $0x8] sm:$0xff]   ;;  %282 = vmatprep.subr.bf16.mxu1 %v310_v14  ;;  %290 = vmatprep.mubr.msk.bf16.mxu1 %vm311_vm1, %v310_v14  ;;  %v297_v16 = vld [vmem:[%s412_s3] sm:$0xff]   ;;  %v299_v45 = vld [vmem:[%s413_s5 + $0x10] sm:$0xff]  }
   0x3   :  { %33 = vadd.xlane.f32.xlu0 %v32_v2  ;;  %275 = vmatpush3.bf16.msra.mxu0 %v296_v15  ;;  %v254_v34 = vld [vmem:[%s414_s1] ss:$0 sm:$0xff]  ;;  %v300_v46 = vld [vmem:[%s413_s5 + $0x8] sm:$0xff]  }
   0x4   :  { %276 = vmatprep.subr.bf16.mxu0 %v310_v14  ;;  %283 = vmatpush3.bf16.msra.mxu1 %v298_v17  ;;  %v255_v40 = vld [vmem:[%s415_s2] ss:$0 sm:$0xff] }
   0x5   :  { %284 = vmatprep.subr.bf16.mxu1 %v310_v14  ;;  %v301_v47 = vld [vmem:[%s413_s5] sm:$0xff]  }
   0x6   :  { %v256_v48 = vld [vmem:[%s416_s4] ss:$0 sm:$0xff] }
   0x7   :  { %36 = vadd.xlane.f32.xlu0 %v35_v3  ;;  %277 = vmatpush3.bf16.msra.mxu0 %v297_v16  ;;  %v265_v59 = vld [vmem:[%s417_s6] ss:$0 sm:$0xff] }
   0x8   :  { %285 = vmatpush3.bf16.msra.mxu1 %v299_v45 }
   0x9   :  { %286 = vmatprep.subr.bf16.mxu1 %v310_v14 }
   0xc   :  { %287 = vmatpush3.bf16.msra.mxu1 %v300_v46 }
   0xd   :  { %288 = vmatprep.subr.bf16.mxu1 %v310_v14 }
  0x10   :  { %289 = vmatpush3.bf16.msra.mxu1 %v301_v47 }
  0x8c   :  { %v34_v4 = vpop.xlane.xlu0 %33 }
  0x8d   :  { %v39_v5 = vmul.f32 0.03125, %v34_v4 }
  0x8f   :  { %v41_v6 = vsub.f32 %v355_v0, %v39_v5 }
  0x90   :  { %v37_v7 = vpop.xlane.xlu0 %36 }
  0x91   :  { %v40_v8 = vmul.f32 0.03125, %v37_v7  ;;  %v43_v9 = vmul.f32 %v41_v6, %v41_v6  ;;  %v77_v36 = vmul.f32 %v254_v34, %v41_v6 }
  0x93   :  { %v42_v10 = vsub.f32 %v360_v1, %v40_v8  ;;  %v45_v11 = vsel %vm31_vm0, %v43_v9, 0.0 }
  0x94   :  { %46 = vadd.xlane.f32.xlu1 %v45_v11 }
  0x95   :  { %v44_v12 = vmul.f32 %v42_v10, %v42_v10  ;;  %v78_v37 = vmul.f32 %v254_v34, %v42_v10 }
  0x97   :  { %v48_v13 = vsel %vm31_vm0, %v44_v12, 0.0 }
  0x98   :  { %49 = vadd.xlane.f32.xlu1 %v48_v13 }
 0x11d   :  { %v47_v18 = vpop.xlane.xlu1 %46 }
 0x11e   :  { %v51_v19 = vmul.f32 0.032258064, %v47_v18 }
 0x120   :  { %302 = vrsqrt.f32 %v51_v19  ;;  %vm55_vm2 = vcmp.eq.f32.partialorder %v51_v19, inf  ;;  %v58_v24 = vand.u32 2147483648, %v51_v19  ;;  %vm57_vm3 = vcmp.eq.f32.partialorder %v51_v19, 0.0 }
 0x121   :  { %v50_v20 = vpop.xlane.xlu1 %49 }
 0x122   :  { %v52_v21 = vmul.f32 0.032258064, %v50_v20 }
 0x124   :  { %304 = vrsqrt.f32 %v52_v21  ;;  %vm62_vm4 = vcmp.eq.f32.partialorder %v52_v21, inf  ;;  %v65_v30 = vand.u32 2147483648, %v52_v21  ;;  %vm64_vm5 = vcmp.eq.f32.partialorder %v52_v21, 0.0 }
 0x12d   :  { %v303_v22 = vpop.eup %302 }
 0x12e   :  { %v54_v23 = vmul.f32 %v303_v22, %v51_v19 }
 0x130   :  { %v56_v25 = vsel %vm55_vm2, %v51_v19, %v54_v23 }
 0x131   :  { %v305_v26 = vpop.eup %304  ;;  %v59_v27 = vsel %vm57_vm3, %v58_v24, %v56_v25 }
 0x132   :  { %v67_v28 = vadd.f32 1e-06, %v59_v27  ;;  %v61_v29 = vmul.f32 %v305_v26, %v52_v21 }
 0x134   :  { %306 = vrcp.f32 %v67_v28  ;;  %v63_v31 = vsel %vm62_vm4, %v52_v21, %v61_v29 }
 0x135   :  { %v66_v32 = vsel %vm64_vm5, %v65_v30, %v63_v31 }
 0x136   :  { %v68_v33 = vadd.f32 1e-06, %v66_v32 }
 0x138   :  { %308 = vrcp.f32 %v68_v33 }
 0x141   :  { %v307_v35 = vpop.eup %306 }
 0x142   :  { %v79_v38 = vmul.f32 %v307_v35, %v77_v36 }
 0x144   :  { %v87_v42 = vadd.f32 %v255_v40, %v79_v38 }
 0x145   :  { %v309_v39 = vpop.eup %308 }
 0x146   :  { %v80_v41 = vmul.f32 %v309_v39, %v78_v37 }
 0x148   :  { %v88_v43 = vadd.f32 %v255_v40, %v80_v41 }
 0x14a   :  { %v89_v44 = vpack.c.bf16 %v88_v43, %v87_v42 }
 0x14c   :  { %279 = vmatmul.mubr.msk.bf16.vlgmr.msra.gmra.mxu0 %vm31_vm0, %v89_v44 }
 0x20c   :  { %v150_v49 = vpop.f32.mrf.mxu0 }
 0x20d   :  { %v151_v51 = vadd.f32 %v256_v48, %v150_v49 }
 0x20e   :  { %v280_v50 = vpop.f32.mrf.mxu0 }
 0x20f   :  { %v157_v55 = vmax.f32 %v151_v51, 0.0 }
 0x210   :  { %v153_v52 = vpop.f32.mrf.mxu0 }
 0x211   :  { %v154_v53 = vadd.f32 %v256_v48, %v153_v52 }
 0x212   :  { %v281_v54 = vpop.f32.mrf.mxu0 }
 0x213   :  { %v158_v56 = vmax.f32 %v154_v53, 0.0 }
 0x215   :  { %v159_v57 = vpack.c.bf16 %v158_v56, %v157_v55 }
 0x217   :  { %291 = vmatmul.mubr.msk.bf16.vlgmr.msra.gmra.mxu1 %vm192_vm6, %v159_v57 }
 0x2d7   :  { %v230_v58 = vpop.f32.mrf.mxu1 }
 0x2d8   :  { %v237_v60 = vadd.f32 %v230_v58, %v355_v0 }
 0x2d9   :  { %v292_v61 = vpop.f32.mrf.mxu1 }
 0x2da   :  { %v246_v62 = vadd.f32 %v265_v59, %v237_v60 }
 0x2db   :  { %v233_v63 = vpop.f32.mrf.mxu1 }
 0x2dc   :  { %248 = vst.msk [vmem:[%s418_s7] sm:$0xff] %vm31_vm0, %v246_v62  ;;  %v238_v2 = vadd.f32 %v233_v63, %v360_v1 }
 0x2dd   :  { %v293_v3 = vpop.f32.mrf.mxu1 }
 0x2de   :  { %v247_v4 = vadd.f32 %v265_v59, %v238_v2 }
 0x2e0   :  { %249 = vst.msk [vmem:[%s418_s7 + $0x8] sm:$0xff] %vm31_vm0, %v247_v4 }

// kernel: encoder_decoder_forward.13
= control target key start
LH: loop header
LB: loop body
LE: loop exit
PB: predicated region body
PF: predicated region fallthrough
CT: control target
= control target key end

     0   :  { %vm37_vm0 = vcmask 261120   ;;  %v384_v14 = vmov 0.0   ;;  %vm385_vm1 = vmmov 0   ;;  %vm198_vm6 = vcmask 523264   ;;  %s505_s0 = inlined_call_operand.vmem [shape: f32[16,32], index: 0, kind: input, shape index: {}]   ;;  %s506_s3 = inlined_call_operand.vmem [shape: bf16[32,64], index: 3, kind: input, shape index: {}]   ;;  %s507_s5 = inlined_call_operand.vmem [shape: bf16[64,32], index: 5, kind: input, shape index: {}]   ;;  %s508_s1 = inlined_call_operand.vmem [shape: f32[1,32], index: 1, kind: input, shape index: {}]   ;;  %s509_s2 = inlined_call_operand.vmem [shape: f32[1,32], index: 2, kind: input, shape index: {}]   ;;  %s510_s4 = inlined_call_operand.vmem [shape: f32[1,64], index: 4, kind: input, shape index: {}]   ;;  %s511_s6 = inlined_call_operand.vmem [shape: f32[1,32], index: 6, kind: input, shape index: {}]   ;;  %s512_s7 = inlined_call_operand.vmem [shape: f32[1,32], index: 7, kind: input, shape index: {}]   ;;  %s513_s8 = inlined_call_operand.vmem [shape: f32[1,32], index: 8, kind: input, shape index: {}]   ;;  %s514_s9 = inlined_call_operand.vmem [shape: f32[16,32], index: 9, kind: output, shape index: {}]  }
   0x1   :  { %v439_v0 = vld [vmem:[%s505_s0] sm:$0xff]  ;;  %v444_v1 = vld [vmem:[%s505_s0 + $0x8] sm:$0xff]  ;;  %340 = vmatprep.subr.bf16.mxu0 %v384_v14  ;;  %344 = vmatprep.mubr.msk.bf16.mxu0 %vm385_vm1, %v384_v14  ;;  %v364_v17 = vld [vmem:[%s507_s5 + $0x18] sm:$0xff]  }
   0x2   :  { %v38_v2 = vsel %vm37_vm0, %v439_v0, 0.0  ;;  %v41_v3 = vsel %vm37_vm0, %v444_v1, 0.0  ;;  %v362_v15 = vld [vmem:[%s506_s3 + $0x8] sm:$0xff]   ;;  %348 = vmatprep.subr.bf16.mxu1 %v384_v14  ;;  %356 = vmatprep.mubr.msk.bf16.mxu1 %vm385_vm1, %v384_v14  ;;  %v363_v16 = vld [vmem:[%s506_s3] sm:$0xff]   ;;  %v365_v45 = vld [vmem:[%s507_s5 + $0x10] sm:$0xff]  }
   0x3   :  { %39 = vadd.xlane.f32.xlu0 %v38_v2  ;;  %341 = vmatpush3.bf16.msra.mxu0 %v362_v15  ;;  %v318_v34 = vld [vmem:[%s508_s1] ss:$0 sm:$0xff]  ;;  %v366_v46 = vld [vmem:[%s507_s5 + $0x8] sm:$0xff]  }
   0x4   :  { %342 = vmatprep.subr.bf16.mxu0 %v384_v14  ;;  %349 = vmatpush3.bf16.msra.mxu1 %v364_v17  ;;  %v319_v40 = vld [vmem:[%s509_s2] ss:$0 sm:$0xff] }
   0x5   :  { %350 = vmatprep.subr.bf16.mxu1 %v384_v14  ;;  %v367_v47 = vld [vmem:[%s507_s5] sm:$0xff]  }
   0x6   :  { %v320_v48 = vld [vmem:[%s510_s4] ss:$0 sm:$0xff] }
   0x7   :  { %42 = vadd.xlane.f32.xlu0 %v41_v3  ;;  %343 = vmatpush3.bf16.msra.mxu0 %v363_v16  ;;  %v329_v59 = vld [vmem:[%s511_s6] ss:$0 sm:$0xff] }
   0x8   :  { %351 = vmatpush3.bf16.msra.mxu1 %v365_v45 }
   0x9   :  { %352 = vmatprep.subr.bf16.mxu1 %v384_v14 }
   0xc   :  { %353 = vmatpush3.bf16.msra.mxu1 %v366_v46 }
   0xd   :  { %354 = vmatprep.subr.bf16.mxu1 %v384_v14 }
  0x10   :  { %355 = vmatpush3.bf16.msra.mxu1 %v367_v47 }
  0x8c   :  { %v40_v4 = vpop.xlane.xlu0 %39 }
  0x8d   :  { %v45_v5 = vmul.f32 0.03125, %v40_v4 }
  0x8f   :  { %v47_v6 = vsub.f32 %v439_v0, %v45_v5 }
  0x90   :  { %v43_v7 = vpop.xlane.xlu0 %42 }
  0x91   :  { %v46_v8 = vmul.f32 0.03125, %v43_v7  ;;  %v49_v9 = vmul.f32 %v47_v6, %v47_v6  ;;  %v83_v36 = vmul.f32 %v318_v34, %v47_v6 }
  0x93   :  { %v48_v10 = vsub.f32 %v444_v1, %v46_v8  ;;  %v51_v11 = vsel %vm37_vm0, %v49_v9, 0.0 }
  0x94   :  { %52 = vadd.xlane.f32.xlu1 %v51_v11 }
  0x95   :  { %v50_v12 = vmul.f32 %v48_v10, %v48_v10  ;;  %v84_v37 = vmul.f32 %v318_v34, %v48_v10  ;;  %v331_v34 = vld [vmem:[%s513_s8] ss:$0 sm:$0xff] }
  0x97   :  { %v54_v13 = vsel %vm37_vm0, %v50_v12, 0.0 }
  0x98   :  { %55 = vadd.xlane.f32.xlu1 %v54_v13 }
 0x11d   :  { %v53_v18 = vpop.xlane.xlu1 %52 }
 0x11e   :  { %v57_v19 = vmul.f32 0.032258064, %v53_v18 }
 0x120   :  { %368 = vrsqrt.f32 %v57_v19  ;;  %vm61_vm2 = vcmp.eq.f32.partialorder %v57_v19, inf  ;;  %v64_v24 = vand.u32 2147483648, %v57_v19  ;;  %vm63_vm3 = vcmp.eq.f32.partialorder %v57_v19, 0.0 }
 0x121   :  { %v56_v20 = vpop.xlane.xlu1 %55 }
 0x122   :  { %v58_v21 = vmul.f32 0.032258064, %v56_v20 }
 0x124   :  { %370 = vrsqrt.f32 %v58_v21  ;;  %vm68_vm4 = vcmp.eq.f32.partialorder %v58_v21, inf  ;;  %v71_v30 = vand.u32 2147483648, %v58_v21  ;;  %vm70_vm5 = vcmp.eq.f32.partialorder %v58_v21, 0.0 }
 0x12d   :  { %v369_v22 = vpop.eup %368 }
 0x12e   :  { %v60_v23 = vmul.f32 %v369_v22, %v57_v19 }
 0x130   :  { %v62_v25 = vsel %vm61_vm2, %v57_v19, %v60_v23 }
 0x131   :  { %v371_v26 = vpop.eup %370  ;;  %v65_v27 = vsel %vm63_vm3, %v64_v24, %v62_v25 }
 0x132   :  { %v73_v28 = vadd.f32 1e-06, %v65_v27  ;;  %v67_v29 = vmul.f32 %v371_v26, %v58_v21 }
 0x134   :  { %372 = vrcp.f32 %v73_v28  ;;  %v69_v31 = vsel %vm68_vm4, %v58_v21, %v67_v29 }
 0x135   :  { %v72_v32 = vsel %vm70_vm5, %v71_v30, %v69_v31  ;;  %v330_v31 = vld [vmem:[%s512_s7] ss:$0 sm:$0xff] }
 0x136   :  { %v74_v33 = vadd.f32 1e-06, %v72_v32 }
 0x138   :  { %374 = vrcp.f32 %v74_v33 }
 0x141   :  { %v373_v35 = vpop.eup %372 }
 0x142   :  { %v85_v38 = vmul.f32 %v373_v35, %v83_v36 }
 0x144   :  { %v93_v42 = vadd.f32 %v319_v40, %v85_v38 }
 0x145   :  { %v375_v39 = vpop.eup %374 }
 0x146   :  { %v86_v41 = vmul.f32 %v375_v39, %v84_v37 }
 0x148   :  { %v94_v43 = vadd.f32 %v319_v40, %v86_v41 }
 0x14a   :  { %v95_v44 = vpack.c.bf16 %v94_v43, %v93_v42 }
 0x14c   :  { %345 = vmatmul.mubr.msk.bf16.vlgmr.msra.gmra.mxu0 %vm37_vm0, %v95_v44 }
 0x20c   :  { %v156_v49 = vpop.f32.mrf.mxu0 }
 0x20d   :  { %v157_v51 = vadd.f32 %v320_v48, %v156_v49 }
 0x20e   :  { %v346_v50 = vpop.f32.mrf.mxu0 }
 0x20f   :  { %v163_v55 = vmax.f32 %v157_v51, 0.0 }
 0x210   :  { %v159_v52 = vpop.f32.mrf.mxu0 }
 0x211   :  { %v160_v53 = vadd.f32 %v320_v48, %v159_v52 }
 0x212   :  { %v347_v54 = vpop.f32.mrf.mxu0 }
 0x213   :  { %v164_v56 = vmax.f32 %v160_v53, 0.0 }
 0x215   :  { %v165_v57 = vpack.c.bf16 %v164_v56, %v163_v55 }
 0x217   :  { %357 = vmatmul.mubr.msk.bf16.vlgmr.msra.gmra.mxu1 %vm198_vm6, %v165_v57 }
 0x2d7   :  { %v236_v58 = vpop.f32.mrf.mxu1 }
 0x2d8   :  { %v243_v60 = vadd.f32 %v236_v58, %v439_v0 }
 0x2d9   :  { %v358_v61 = vpop.f32.mrf.mxu1 }
 0x2da   :  { %v252_v62 = vadd.f32 %v329_v59, %v243_v60 }
 0x2db   :  { %v239_v63 = vpop.f32.mrf.mxu1 }
 0x2dc   :  { %v244_v2 = vadd.f32 %v239_v63, %v444_v1  ;;  %v256_v3 = vsel %vm37_vm0, %v252_v62, 0.0 }
 0x2dd   :  { %257 = vadd.xlane.f32.xlu0 %v256_v3  ;;  %v359_v4 = vpop.f32.mrf.mxu1 }
 0x2de   :  { %v253_v5 = vadd.f32 %v329_v59, %v244_v2 }
 0x2e0   :  { %v259_v6 = vsel %vm37_vm0, %v253_v5, 0.0 }
 0x2e1   :  { %260 = vadd.xlane.f32.xlu1 %v259_v6 }
 0x366   :  { %v258_v7 = vpop.xlane.xlu0 %257 }
 0x367   :  { %v262_v8 = vmul.f32 0.03125, %v258_v7 }
 0x369   :  { %v264_v9 = vsub.f32 %v252_v62, %v262_v8 }
 0x36a   :  { %v261_v10 = vpop.xlane.xlu1 %260 }
 0x36b   :  { %v263_v11 = vmul.f32 0.03125, %v261_v10  ;;  %v266_v12 = vmul.f32 %v264_v9, %v264_v9  ;;  %v300_v32 = vmul.f32 %v330_v31, %v264_v9 }
 0x36d   :  { %v265_v0 = vsub.f32 %v253_v5, %v263_v11  ;;  %v268_v13 = vsel %vm37_vm0, %v266_v12, 0.0 }
 0x36e   :  { %269 = vadd.xlane.f32.xlu0 %v268_v13 }
 0x36f   :  { %v267_v14 = vmul.f32 %v265_v0, %v265_v0  ;;  %v301_v36 = vmul.f32 %v330_v31, %v265_v0 }
 0x371   :  { %v271_v1 = vsel %vm37_vm0, %v267_v14, 0.0 }
 0x372   :  { %272 = vadd.xlane.f32.xlu1 %v271_v1 }
 0x3f7   :  { %v270_v15 = vpop.xlane.xlu0 %269 }
 0x3f8   :  { %v274_v16 = vmul.f32 0.032258064, %v270_v15 }
 0x3fa   :  { %376 = vrsqrt.f32 %v274_v16  ;;  %vm278_vm7 = vcmp.eq.f32.partialorder %v274_v16, inf  ;;  %v281_v21 = vand.u32 2147483648, %v274_v16  ;;  %vm280_vm8 = vcmp.eq.f32.partialorder %v274_v16, 0.0 }
 0x3fb   :  { %v273_v17 = vpop.xlane.xlu1 %272 }
 0x3fc   :  { %v275_v18 = vmul.f32 0.032258064, %v273_v17 }
 0x3fe   :  { %378 = vrsqrt.f32 %v275_v18  ;;  %vm285_vm9 = vcmp.eq.f32.partialorder %v275_v18, inf  ;;  %v288_v27 = vand.u32 2147483648, %v275_v18  ;;  %vm287_vm10 = vcmp.eq.f32.partialorder %v275_v18, 0.0 }
 0x407   :  { %v377_v19 = vpop.eup %376 }
 0x408   :  { %v277_v20 = vmul.f32 %v377_v19, %v274_v16 }
 0x40a   :  { %v279_v22 = vsel %vm278_vm7, %v274_v16, %v277_v20 }
 0x40b   :  { %v379_v23 = vpop.eup %378  ;;  %v282_v24 = vsel %vm280_vm8, %v281_v21, %v279_v22 }
 0x40c   :  { %v290_v25 = vadd.f32 1e-06, %v282_v24  ;;  %v284_v26 = vmul.f32 %v379_v23, %v275_v18 }
 0x40e   :  { %380 = vrcp.f32 %v290_v25  ;;  %v286_v28 = vsel %vm285_vm9, %v275_v18, %v284_v26 }
 0x40f   :  { %v289_v29 = vsel %vm287_vm10, %v288_v27, %v286_v28 }
 0x410   :  { %v291_v30 = vadd.f32 1e-06, %v289_v29 }
 0x412   :  { %382 = vrcp.f32 %v291_v30 }
 0x41b   :  { %v381_v33 = vpop.eup %380 }
 0x41c   :  { %v302_v35 = vmul.f32 %v381_v33, %v300_v32 }
 0x41e   :  { %v310_v37 = vadd.f32 %v331_v34, %v302_v35 }
 0x41f   :  { %v383_v38 = vpop.eup %382 }
 0x420   :  { %312 = vst.msk [vmem:[%s514_s9] sm:$0xff] %vm37_vm0, %v310_v37  ;;  %v303_v39 = vmul.f32 %v383_v38, %v301_v36 }
 0x422   :  { %v311_v40 = vadd.f32 %v331_v34, %v303_v39 }
 0x424   :  { %313 = vst.msk [vmem:[%s514_s9 + $0x8] sm:$0xff] %vm37_vm0, %v311_v40 }

// kernel: encoder_decoder_forward.10
= control target key start
LH: loop header
LB: loop body
LE: loop exit
PB: predicated region body
PF: predicated region fallthrough
CT: control target
= control target key end

     0   :  { %s1598_s17 = smov 0   ;;  %s1600_s18 = smov 0   ;;  %s1762_s0 = inlined_call_operand.vmem [shape: f32[2,8,32], index: 0, kind: input, shape index: {}, may-alias: {0,1}]   ;;  %s1763_s1 = inlined_call_operand.vmem [shape: f32[2,8,32], index: 1, kind: input, shape index: {}, may-alias: {0,1}]   ;;  %s1764_s2 = inlined_call_operand.vmem [shape: f32[2,1,8], index: 2, kind: input, shape index: {}]   ;;  %s1765_s3 = inlined_call_operand.vmem [shape: f32[1,32], index: 3, kind: input, shape index: {}]   ;;  %s1766_s4 = inlined_call_operand.vmem [shape: f32[1,32], index: 4, kind: input, shape index: {}]   ;;  %s1767_s5 = inlined_call_operand.vmem [shape: bf16[32,32], index: 5, kind: input, shape index: {}]   ;;  %s1768_s6 = inlined_call_operand.vmem [shape: f32[1,32], index: 6, kind: input, shape index: {}]   ;;  %s1769_s7 = inlined_call_operand.vmem [shape: bf16[32,64], index: 7, kind: input, shape index: {}]   ;;  %s1770_s8 = inlined_call_operand.vmem [shape: f32[1,64], index: 8, kind: input, shape index: {}]   ;;  %s1771_s9 = inlined_call_operand.vmem [shape: bf16[32,32], index: 9, kind: input, shape index: {}]   ;;  %s1772_s10 = inlined_call_operand.vmem [shape: f32[1,32], index: 10, kind: input, shape index: {}]   ;;  %s1773_s11 = inlined_call_operand.vmem [shape: f32[2,8,32], index: 11, kind: output, shape index: {}]  }
   0x1   :  { %s1602_s19 = smov 0  }
   0x2 LB: > { %s33_s20 = sadd.s32 1, %s1520_s18  ;;  %p1306_p0 = scmp.ge.s32.totalorder %s1524_s19, 1  ;;  %s1524_s19 = sphi %s1602_s19, %s21_s19   ;;  %s1520_s18 = sphi %s1600_s18, %s1775_s18   ;;  %s1516_s17 = sphi %s1598_s17, %s1774_s17  }
   0x3   : > { %p35_p1 = scmp.ge.s32.totalorder %s33_s20, 2  ;;  %p372_p2 = scmp.lt.s32.totalorder %s1524_s19, 3 }
   0x5   : > { %s1777_s20 = smov (%p35_p1, %s33_s20), 0  ;;  %p373_p3 = pnand %p1306_p0, %p372_p2 }
   0x6   : > { %p423_p4 = scmp.lt.s32.totalorder (!%p373_p3), %s1516_s17, 1  ;;  %s1528_s30 = smov (!%p373_p3), 120  }
   0x7   : > { %376 = sbr.rel (%p373_p3) target bundleno = 1755 (0x6db), region = 64  ;;  %s1529_s12 = smov (!%p373_p3), 112  }
   0x8   : > { %s1530_s13 = smov (!%p373_p3), 104   ;;  %s1532_s22 = smov (!%p373_p3), 80  }
   0x9   : > { %s1533_s23 = smov (!%p373_p3), 96   ;;  %s1535_s25 = smov (!%p373_p3), 8  }
   0xa   : > { %s1536_s26 = smov (!%p373_p3), 16  }
   0xc   : > { %s1779_s17 = smov (!%p423_p4, %s1516_s17), 1  ;;  %vm452_vm0 = vcmask 261120   ;;  %v1471_v14 = vld [vmem:[%s1769_s7 + $0x8] sm:$0xff]   ;;  %v1526_v16 = vmov 0.0   ;;  %v1472_v17 = vld [vmem:[%s1769_s7] sm:$0xff]   ;;  %vm1527_vm1 = vmmov 0  }
   0xd   : > { %s1619_s21 = sshll.u32 %s1779_s17, 3  ;;  %v1473_v15 = vld [vmem:[%s1767_s5 + $0x8] sm:$0xff]   ;;  %1363 = vmatprep.subr.bf16.mxu0 %v1526_v16  ;;  %1371 = vmatprep.subr.bf16.mxu1 %v1526_v16  ;;  %v1474_v18 = vld [vmem:[%s1767_s5] sm:$0xff]   ;;  %vm556_vm6 = vcmask 519168   ;;  %vm675_vm7 = vcmask 64512   ;;  %s436_s16 = scalar_lea.vmem %s1764_s2, %s1779_s17  ;;  %vm742_vm8 = vcmask 1043456  }
   0xe   : > { %s433_s24 = scalar_lea.vmem %s1763_s1, %s1619_s21  ;;  %s429_s27 = scalar_lea.vmem %s1762_s0, %s1619_s21  ;;  %1364 = vmatpush3.bf16.msra.mxu0 %v1471_v14  ;;  %1372 = vmatpush3.bf16.msra.mxu1 %v1473_v15  ;;  %v1310_v35 = vld [vmem:[%s1765_s3] ss:$0 sm:$0xff]  ;;  %vm902_vm9 = vcmask 130112   ;;  %vm1018_vm10 = vcmask 195712   ;;  %vm1134_vm11 = vcmask 261312  }
   0xf   : > { %v449_v0 = vld [vmem:[%s433_s24] sm:$0xff]  ;;  %1365 = vmatprep.subr.bf16.mxu0 %v1526_v16  ;;  %1367 = vmatprep.mubr.msk.bf16.mxu0 %vm1527_vm1, %v1526_v16  ;;  %s1531_s17 = smov 88   ;;  %s1534_s24 = smov 72  }
  0x10   : > { %v453_v1 = vsel %vm452_vm0, %v449_v0, 0.0  ;;  %v1630_v2 = vld [vmem:[%s429_s27] sm:$0xff]  ;;  %1373 = vmatprep.subr.bf16.mxu1 %v1526_v16  ;;  %1375 = vmatprep.mubr.msk.bf16.mxu1 %vm1527_vm1, %v1526_v16 }
  0x11   : > { %454 = vadd.xlane.f32.xlu0 %v453_v1  ;;  %v562_v3 = vsel %vm452_vm0, %v1630_v2, 0.0  ;;  %v1311_v38 = vld [vmem:[%s1766_s4] ss:$0 sm:$0xff] }
  0x12   : > { %1366 = vmatpush3.bf16.msra.mxu0 %v1472_v17  ;;  %1374 = vmatpush3.bf16.msra.mxu1 %v1474_v18  ;;  %v1312_v47 = vld [vmem:[%s1770_s8] ss:$0 sm:$0xff] }
  0x13   : > { %1379 = vmatprep.subr.bf16.mxu0 %v1526_v16  ;;  %1385 = vmatprep.subr.bf16.mxu1 %v1526_v16  ;;  %v1318_v51 = vld [vmem:[%s1768_s6] ss:$0 sm:$0xff] }
  0x15   : > { %563 = vadd.xlane.f32.xlu0 %v562_v3 }
  0x9a   : > { %v455_v4 = vpop.xlane.xlu0 %454 }
  0x9b   : > { %v457_v5 = vmul.f32 0.03125, %v455_v4 }
  0x9d   : > { %v458_v6 = vsub.f32 %v449_v0, %v457_v5 }
  0x9e   : > { %v564_v7 = vpop.xlane.xlu0 %563 }
  0x9f   : > { %v566_v8 = vmul.f32 0.03125, %v564_v7  ;;  %v459_v9 = vmul.f32 %v458_v6, %v458_v6  ;;  %v479_v36 = vmul.f32 %v1310_v35, %v458_v6 }
  0xa1   : > { %v567_v10 = vsub.f32 %v1630_v2, %v566_v8  ;;  %v460_v11 = vsel %vm452_vm0, %v459_v9, 0.0 }
  0xa2   : > { %461 = vadd.xlane.f32.xlu1 %v460_v11  ;;  %v665_v11 = vld [vmem:[%s436_s16] sm:$0x1] }
  0xa3   : > { %v568_v12 = vmul.f32 %v567_v10, %v567_v10  ;;  %v588_v40 = vmul.f32 %v1310_v35, %v567_v10  ;;  %v670_v10 = vlaneseq }
  0xa5   : > { %v569_v13 = vsel %vm452_vm0, %v568_v12, 0.0  ;;  %v1322_v12 = vadd.f32 -1.0, %v665_v11 }
  0xa6   : > { %570 = vadd.xlane.f32.xlu1 %v569_v13  ;;  %v671_v13 = vshrl.u32 %v670_v10, 7 }
  0xa7   : > { %v667_v14 = vmul.f32 1e+09, %v1322_v12 }
  0xa8   : > { %v672_v15 = vsub.s32 0, %v671_v13 }
  0xaa   : > { %v673_v17 = vrot.slane %v667_v14, %v672_v15 }
 0x12b   : > { %v462_v19 = vpop.xlane.xlu1 %461 }
 0x12c   : > { %v463_v20 = vmul.f32 0.032258064, %v462_v19 }
 0x12e   : > { %1478 = vrsqrt.f32 %v463_v20  ;;  %vm466_vm2 = vcmp.eq.f32.partialorder %v463_v20, inf  ;;  %v469_v25 = vand.u32 2147483648, %v463_v20  ;;  %vm468_vm3 = vcmp.eq.f32.partialorder %v463_v20, 0.0 }
 0x12f   : > { %v571_v21 = vpop.xlane.xlu1 %570 }
 0x130   : > { %v572_v22 = vmul.f32 0.032258064, %v571_v21 }
 0x132   : > { %1480 = vrsqrt.f32 %v572_v22  ;;  %vm575_vm4 = vcmp.eq.f32.partialorder %v572_v22, inf  ;;  %v578_v29 = vand.u32 2147483648, %v572_v22  ;;  %vm577_vm5 = vcmp.eq.f32.partialorder %v572_v22, 0.0 }
 0x13b   : > { %v1479_v23 = vpop.eup %1478 }
 0x13c   : > { %v465_v24 = vmul.f32 %v1479_v23, %v463_v20 }
 0x13e   : > { %v467_v26 = vsel %vm466_vm2, %v463_v20, %v465_v24 }
 0x13f   : > { %v1481_v27 = vpop.eup %1480  ;;  %v470_v28 = vsel %vm468_vm3, %v469_v25, %v467_v26 }
 0x140   : > { %v471_v30 = vadd.f32 1e-06, %v470_v28  ;;  %v574_v31 = vmul.f32 %v1481_v27, %v572_v22 }
 0x142   : > { %1482 = vrcp.f32 %v471_v30  ;;  %v576_v32 = vsel %vm575_vm4, %v572_v22, %v574_v31 }
 0x143   : > { %v579_v33 = vsel %vm577_vm5, %v578_v29, %v576_v32 }
 0x144   : > { %v580_v34 = vadd.f32 1e-06, %v579_v33 }
 0x146   : > { %1484 = vrcp.f32 %v580_v34 }
 0x14f   : > { %v1483_v37 = vpop.eup %1482 }
 0x150   : > { %v480_v39 = vmul.f32 %v1483_v37, %v479_v36 }
 0x152   : > { %v487_v41 = vadd.f32 %v1311_v38, %v480_v39 }
 0x153   : > { %v1485_v42 = vpop.eup %1484 }
 0x154   : > { %v488_v43 = vpack.c.bf16 %v487_v41, %v487_v41  ;;  %v589_v44 = vmul.f32 %v1485_v42, %v588_v40 }
 0x156   : > { %1368 = vmatmul.mubr.msk.bf16.vlgmr.msra.gmra.mxu0 %vm452_vm0, %v488_v43  ;;  %v596_v45 = vadd.f32 %v1311_v38, %v589_v44 }
 0x157   : > { %1381 = vmatprep.mubr.msk.bf16.mxu0 %vm1527_vm1, %v1526_v16 }
 0x158   : > { %v597_v46 = vpack.c.bf16 %v596_v45, %v596_v45 }
 0x15a   : > { %1376 = vmatmul.mubr.msk.bf16.vlgmr.msra.gmra.mxu1 %vm452_vm0, %v597_v46 }
 0x15b   : > { %1387 = vmatprep.mubr.msk.bf16.mxu1 %vm1527_vm1, %v1526_v16 }
 0x216   : > { %v549_v48 = vpop.f32.mrf.mxu0 }
 0x217   : > { %v550_v49 = vadd.f32 %v1312_v47, %v549_v48 }
 0x218   : > { %v1369_v50 = vpop.f32.mrf.mxu0 }
 0x219   : > { %v555_v52 = vpack.c.bf16 %v550_v49, %v550_v49 }
 0x21a   : > { %v552_v53 = vpop.f32.mrf.mxu0  ;;  %v658_v54 = vpop.f32.mrf.mxu1 }
 0x21b   : > { %557 = vst.msk [vmem:[#allocation2] sm:$0xf] %vm556_vm6, %v555_v52  ;;  %v659_v55 = vadd.f32 %v1318_v51, %v658_v54 }
 0x21c   : > { %v1370_v56 = vpop.f32.mrf.mxu0  ;;  %v1377_v57 = vpop.f32.mrf.mxu1 }
 0x21d   : > { %v664_v58 = vpack.c.bf16 %v659_v55, %v659_v55 }
 0x21e   : > { %v661_v59 = vpop.f32.mrf.mxu1 }
 0x21f   : > { %788 = vrot.lane.b32.xlu1 %v664_v58, %s1528_s30 }
 0x220   : > { %v1378_v60 = vpop.f32.mrf.mxu1 }
 0x222   : > { %v668_v61 = vld [vmem:[#allocation2] sm:$0xf] }
 0x223   : > { %v680_v62 = vsel %vm675_vm7, %v668_v61, 0  ;;  %v1678_v63 = vcombine.low %v668_v61, %v668_v61 }
 0x224   : > { %1380 = vmatpush3.bf16.xpose.msra.mxu0 %v680_v62 }
 0x225   : > { %790 = vrot.lane.b32.xlu0 %v1678_v63, %s1528_s30  ;;  %906 = vrot.lane.b32.xlu1 %v1678_v63, %s1529_s12 }
 0x226   : > { %1391 = vmatprep.subr.bf16.mxu0 %v1526_v16 }
 0x229   : > { %1022 = vrot.lane.b32.xlu0 %v1678_v63, %s1530_s13  ;;  %904 = vrot.lane.b32.xlu1 %v664_v58, %s1529_s12  ;;  %s1537_s12 = smov 24  }
 0x22b   : > { %1382 = vmatmul.mubr.msk.bf16.vlgmr.msra.gmra.mxu0 %vm675_vm7, %v664_v58 }
 0x22c   : > { %1393 = vmatprep.mubr.msk.bf16.mxu0 %vm1527_vm1, %v1526_v16 }
 0x22d   : > { %1020 = vrot.lane.b32.xlu1 %v664_v58, %s1530_s13 }
 0x291   : > { %v789_v3 = vpop.permute.xlu1 %788 }
 0x297   : > { %v791_v0 = vpop.permute.xlu0 %790  ;;  %v907_v4 = vpop.permute.xlu1 %906 }
 0x298   : > { %v796_v1 = vsel %vm675_vm7, %v791_v0, 0  ;;  %v912_v5 = vsel %vm675_vm7, %v907_v4, 0 }
 0x299   : > { %1392 = vmatpush3.bf16.xpose.msra.mxu0 %v796_v1 }
 0x29a   : > { %1403 = vmatprep.subr.bf16.mxu0 %v1526_v16 }
 0x29b   : > { %v1023_v6 = vpop.permute.xlu0 %1022  ;;  %v905_v7 = vpop.permute.xlu1 %904 }
 0x29c   : > { %v1028_v8 = vsel %vm675_vm7, %v1023_v6, 0 }
 0x29f   : > { %v1021_v9 = vpop.permute.xlu1 %1020 }
 0x2a0   : > { %1394 = vmatmul.mubr.msk.bf16.vlgmr.msra.gmra.mxu0 %vm675_vm7, %v789_v3 }
 0x2a1   : > { %1404 = vmatpush3.bf16.xpose.msra.mxu0 %v912_v5  ;;  %1405 = vmatprep.mubr.msk.bf16.mxu0 %vm1527_vm1, %v1526_v16 }
 0x2a2   : > { %1415 = vmatprep.subr.bf16.mxu0 %v1526_v16 }
 0x2a8   : > { %1406 = vmatmul.mubr.msk.bf16.vlgmr.msra.gmra.mxu0 %vm675_vm7, %v905_v7 }
 0x2a9   : > { %1416 = vmatpush3.bf16.xpose.msra.mxu0 %v1028_v8  ;;  %1417 = vmatprep.mubr.msk.bf16.mxu0 %vm1527_vm1, %v1526_v16 }
 0x2aa   : > { %1427 = vmatprep.subr.bf16.mxu0 %v1526_v16 }
 0x2b0   : > { %1418 = vmatmul.mubr.msk.bf16.vlgmr.msra.gmra.mxu0 %vm675_vm7, %v1021_v9 }
 0x2b1   : > { %1431 = vmatprep.mubr.msk.bf16.mxu0 %vm1527_vm1, %v1526_v16 }
 0x2eb   : > { %v716_v18 = vpop.f32.mrf.mxu0 }
 0x2ec   : > { %v717_v19 = vadd.f32 %v716_v18, %v673_v17 }
 0x2ed   : > { %v1383_v20 = vpop.f32.mrf.mxu0 }
 0x2ee   : > { %v722_v21 = vsel %vm675_vm7, %v717_v19, -inf }
 0x2ef   : > { %723 = vmax.xlane.f32.xlu0 %v722_v21  ;;  %v719_v22 = vpop.f32.mrf.mxu0 }
 0x2f1   : > { %v1384_v23 = vpop.f32.mrf.mxu0 }
 0x360   : > { %v832_v24 = vpop.f32.mrf.mxu0 }
 0x361   : > { %v833_v25 = vadd.f32 %v832_v24, %v673_v17 }
 0x362   : > { %v1395_v26 = vpop.f32.mrf.mxu0 }
 0x363   : > { %v838_v27 = vsel %vm675_vm7, %v833_v25, -inf }
 0x364   : > { %839 = vmax.xlane.f32.xlu1 %v838_v27  ;;  %v835_v28 = vpop.f32.mrf.mxu0 }
 0x366   : > { %v1396_v29 = vpop.f32.mrf.mxu0 }
 0x368   : > { %v948_v30 = vpop.f32.mrf.mxu0 }
 0x369   : > { %v949_v31 = vadd.f32 %v948_v30, %v673_v17 }
 0x36a   : > { %v1407_v32 = vpop.f32.mrf.mxu0 }
 0x36b   : > { %v954_v33 = vsel %vm675_vm7, %v949_v31, -inf }
 0x36c   : > { %955 = vmax.xlane.f32.xlu0 %v954_v33  ;;  %v951_v34 = vpop.f32.mrf.mxu0 }
 0x36e   : > { %v1408_v35 = vpop.f32.mrf.mxu0 }
 0x370   : > { %v1064_v36 = vpop.f32.mrf.mxu0 }
 0x371   : > { %v1065_v37 = vadd.f32 %v1064_v36, %v673_v17  ;;  %v1476_v36 = vld [vmem:[%s1771_s9 + $0x8] sm:$0xff]  }
 0x372   : > { %v1419_v38 = vpop.f32.mrf.mxu0  ;;  %1428 = vmatpush3.bf16.msra.mxu0 %v1476_v36 }
 0x373   : > { %v1070_v39 = vsel %vm675_vm7, %v1065_v37, -inf  ;;  %1429 = vmatprep.subr.bf16.mxu0 %v1526_v16 }
 0x374   : > { %1071 = vmax.xlane.f32.xlu0 %v1070_v39  ;;  %v1067_v40 = vpop.f32.mrf.mxu0 }
 0x376   : > { %v1420_v41 = vpop.f32.mrf.mxu0 }
 0x378   : > { %v724_v42 = vpop.xlane.xlu0 %723 }
 0x379   : > { %v725_v43 = vsub.f32 %v717_v19, %v724_v42 }
 0x37b   : > { %v726_v44 = vmul.f32 1.442695, %v725_v43 }
 0x37d   : > { %1486 = vpow2.f32 %v726_v44 }
 0x38a   : > { %v1487_v45 = vpop.eup %1486 }
 0x38b   : > { %v728_v46 = vsel %vm675_vm7, %v1487_v45, 0.0 }
 0x38c   : > { %729 = vadd.xlane.f32.xlu0 %v728_v46 }
 0x3ed   : > { %v840_v47 = vpop.xlane.xlu1 %839 }
 0x3ee   : > { %v841_v48 = vsub.f32 %v833_v25, %v840_v47  ;;  %v1335_v47 = vld [vmem:[%s1772_s10] ss:$0 sm:$0xff] }
 0x3f0   : > { %v842_v49 = vmul.f32 1.442695, %v841_v48 }
 0x3f2   : > { %1488 = vpow2.f32 %v842_v49 }
 0x3f5   : > { %v956_v50 = vpop.xlane.xlu0 %955 }
 0x3f6   : > { %v957_v51 = vsub.f32 %v949_v31, %v956_v50 }
 0x3f8   : > { %v958_v52 = vmul.f32 1.442695, %v957_v51 }
 0x3fa   : > { %1490 = vpow2.f32 %v958_v52 }
 0x3fd   : > { %v1072_v57 = vpop.xlane.xlu0 %1071 }
 0x3fe   : > { %v1073_v58 = vsub.f32 %v1065_v37, %v1072_v57  ;;  %v1477_v37 = vld [vmem:[%s1771_s9] sm:$0xff]  }
 0x3ff   : > { %v1489_v53 = vpop.eup %1488  ;;  %1430 = vmatpush3.bf16.msra.mxu0 %v1477_v37 }
 0x400   : > { %v844_v54 = vsel %vm675_vm7, %v1489_v53, 0.0  ;;  %v1074_v59 = vmul.f32 1.442695, %v1073_v58 }
 0x401   : > { %845 = vadd.xlane.f32.xlu1 %v844_v54 }
 0x402   : > { %1492 = vpow2.f32 %v1074_v59 }
 0x407   : > { %v1491_v55 = vpop.eup %1490 }
 0x408   : > { %v960_v56 = vsel %vm675_vm7, %v1491_v55, 0.0 }
 0x409   : > { %961 = vadd.xlane.f32.xlu0 %v960_v56 }
 0x40f   : > { %v1493_v60 = vpop.eup %1492 }
 0x410   : > { %v1076_v61 = vsel %vm675_vm7, %v1493_v60, 0.0 }
 0x412   : > { %850 = vrot.lane.b32.xlu1 %v1678_v63, %s1531_s17  ;;  %s443_s17 = scalar_lea.vmem %s1773_s11, %s1619_s21 }
 0x415   : > { %v730_v62 = vpop.xlane.xlu0 %729 }
 0x416   : > { %966 = vrot.lane.b32.xlu1 %v1678_v63, %s1532_s22  ;;  %1494 = vrcp.f32 %v730_v62 }
 0x41f   : > { %737 = vrot.lane.b32.xlu0 %v1678_v63, %s1533_s23 }
 0x423   : > { %v1495_v1 = vpop.eup %1494 }
 0x424   : > { %v732_v4 = vmul.f32 %v1495_v1, %v1487_v45 }
 0x426   : > { %v733_v8 = vpack.c.bf16 %v732_v4, %v732_v4 }
 0x43a   : > { %1077 = vadd.xlane.f32.xlu1 %v1076_v61 }
 0x44b   : > { %1082 = vrot.lane.b32.xlu1 %v1678_v63, %s1534_s24 }
 0x48a   : > { %v846_v0 = vpop.xlane.xlu1 %845 }
 0x48b   : > { %1496 = vrcp.f32 %v846_v0 }
 0x48e   : > { %v851_v7 = vpop.permute.xlu1 %850 }
 0x48f   : > { %v856_v63 = vsel %vm742_vm8, %v851_v7, 0 }
 0x492   : > { %v962_v3 = vpop.xlane.xlu0 %961  ;;  %v967_v11 = vpop.permute.xlu1 %966 }
 0x493   : > { %1498 = vrcp.f32 %v962_v3  ;;  %v972_v14 = vsel %vm742_vm8, %v967_v11, 0 }
 0x496   : > { %v738_v5 = vpop.permute.xlu0 %737 }
 0x497   : > { %v744_v6 = vsel %vm742_vm8, %v738_v5, 0 }
 0x498   : > { %1386 = vmatpush3.bf16.msra.mxu1 %v744_v6  ;;  %v1497_v9 = vpop.eup %1496 }
 0x499   : > { %1397 = vmatprep.subr.bf16.mxu1 %v1526_v16  ;;  %v848_v10 = vmul.f32 %v1497_v9, %v1489_v53 }
 0x49b   : > { %1388 = vmatmul.mubr.msk.bf16.vlgmr.msra.gmra.mxu1 %vm675_vm7, %v733_v8  ;;  %v849_v12 = vpack.c.bf16 %v848_v10, %v848_v10 }
 0x49c   : > { %1398 = vmatpush3.bf16.msra.mxu1 %v856_v63  ;;  %1399 = vmatprep.mubr.msk.bf16.mxu1 %vm1527_vm1, %v1526_v16 }
 0x49d   : > { %1409 = vmatprep.subr.bf16.mxu1 %v1526_v16 }
 0x4a0   : > { %v1499_v13 = vpop.eup %1498 }
 0x4a1   : > { %v964_v15 = vmul.f32 %v1499_v13, %v1491_v55 }
 0x4a3   : > { %1400 = vmatmul.mubr.msk.bf16.vlgmr.msra.gmra.mxu1 %vm675_vm7, %v849_v12  ;;  %v965_v17 = vpack.c.bf16 %v964_v15, %v964_v15 }
 0x4a4   : > { %1410 = vmatpush3.bf16.msra.mxu1 %v972_v14  ;;  %1411 = vmatprep.mubr.msk.bf16.mxu1 %vm1527_vm1, %v1526_v16 }
 0x4a5   : > { %1421 = vmatprep.subr.bf16.mxu1 %v1526_v16 }
 0x4ab   : > { %1412 = vmatmul.mubr.msk.bf16.vlgmr.msra.gmra.mxu1 %vm675_vm7, %v965_v17 }
 0x4ac   : > { %1423 = vmatprep.mubr.msk.bf16.mxu1 %vm1527_vm1, %v1526_v16 }
 0x4c3   : > { %v1078_v18 = vpop.xlane.xlu1 %1077 }
 0x4c4   : > { %1500 = vrcp.f32 %v1078_v18 }
 0x4c7   : > { %v1083_v19 = vpop.permute.xlu1 %1082 }
 0x4c8   : > { %v1088_v20 = vsel %vm742_vm8, %v1083_v19, 0 }
 0x4c9   : > { %1422 = vmatpush3.bf16.msra.mxu1 %v1088_v20 }
 0x4d1   : > { %v1501_v21 = vpop.eup %1500 }
 0x4d2   : > { %v1080_v22 = vmul.f32 %v1501_v21, %v1493_v60 }
 0x4d4   : > { %v1081_v23 = vpack.c.bf16 %v1080_v22, %v1080_v22 }
 0x4d6   : > { %1424 = vmatmul.mubr.msk.bf16.vlgmr.msra.gmra.mxu1 %vm675_vm7, %v1081_v23 }
 0x55b   : > { %v780_v24 = vpop.f32.mrf.mxu1 }
 0x55c   : > { %786 = vst.msk [vmem:[#allocation3] sm:$0xff] %vm675_vm7, %v780_v24 }
 0x55d   : > { %v1389_v25 = vpop.f32.mrf.mxu1 }
 0x55f   : > { %v783_v26 = vpop.f32.mrf.mxu1 }
 0x561   : > { %v1390_v27 = vpop.f32.mrf.mxu1 }
 0x563   : > { %v892_v28 = vpop.f32.mrf.mxu1 }
 0x564   : > { %899 = vrot.lane.b32.xlu0 %v892_v28, %s1535_s25 }
 0x565   : > { %v1401_v29 = vpop.f32.mrf.mxu1 }
 0x567   : > { %v895_v30 = vpop.f32.mrf.mxu1 }
 0x569   : > { %v1402_v31 = vpop.f32.mrf.mxu1 }
 0x56b   : > { %v1008_v32 = vpop.f32.mrf.mxu1 }
 0x56c   : > { %1015 = vrot.lane.b32.xlu1 %v1008_v32, %s1536_s26 }
 0x56d   : > { %v1413_v33 = vpop.f32.mrf.mxu1 }
 0x56f   : > { %v1011_v34 = vpop.f32.mrf.mxu1 }
 0x571   : > { %v1414_v35 = vpop.f32.mrf.mxu1 }
 0x596   : > { %v1124_v38 = vpop.f32.mrf.mxu1 }
 0x597   : > { %1131 = vrot.lane.b32.xlu0 %v1124_v38, %s1537_s12 }
 0x598   : > { %v1425_v39 = vpop.f32.mrf.mxu1 }
 0x59a   : > { %v1127_v40 = vpop.f32.mrf.mxu1 }
 0x59c   : > { %v1426_v41 = vpop.f32.mrf.mxu1 }
 0x5d6   : > { %v900_v42 = vpop.permute.xlu0 %899 }
 0x5d7   : > { %903 = vst.msk [vmem:[#allocation3] sm:$0xff] %vm902_vm9, %v900_v42 }
 0x5de   : > { %v1016_v43 = vpop.permute.xlu1 %1015 }
 0x5df   : > { %1019 = vst.msk [vmem:[#allocation3] sm:$0xff] %vm1018_vm10, %v1016_v43 }
 0x609   : > { %v1132_v44 = vpop.permute.xlu0 %1131 }
 0x60a   : > { %1135 = vst.msk [vmem:[#allocation3] sm:$0xff] %vm1134_vm11, %v1132_v44 }
 0x611   : > { %v1136_v45 = vld [vmem:[#allocation3] sm:$0xff] }
 0x612   : > { %v1137_v46 = vpack.c.bf16 %v1136_v45, %v1136_v45 }
 0x614   : > { %1432 = vmatmul.mubr.msk.bf16.vlgmr.msra.gmra.mxu0 %vm452_vm0, %v1137_v46 }
 0x6d4   : > { %v1191_v16 = vpop.f32.mrf.mxu0 }
 0x6d5   : > { %v1197_v48 = vadd.f32 %v1191_v16, %v1630_v2 }
 0x6d6   : > { %v1433_v49 = vpop.f32.mrf.mxu0 }
 0x6d7   : > { %v1205_v50 = vadd.f32 %v1335_v47, %v1197_v48 }
 0x6d8   : > { %v1194_v51 = vpop.f32.mrf.mxu0 }
 0x6d9   : > { %1206 = vst.msk [vmem:[%s443_s17] sm:$0xff] %vm452_vm0, %v1205_v50 }
 0x6da   : > { %v1434_v52 = vpop.f32.mrf.mxu0 }
 0x6db PF: > { %s21_s19 = sadd.s32 1, %s1524_s19   ;;  %s1774_s17 = smov %s1520_s18 }
 0x6dc   : > { %p18_p5 = scmp.ge.s32.totalorder %s21_s19, 4   ;;  %s1775_s18 = smov %s1777_s20 }
 0x6de   :  { %20 = sbr.rel (!%p18_p5) target bundleno = 2 (0x2), region = 104 }

// kernel: encoder_decoder_forward.14
= control target key start
LH: loop header
LB: loop body
LE: loop exit
PB: predicated region body
PF: predicated region fallthrough
CT: control target
= control target key end

     0   :  { %s1610_s17 = smov 0   ;;  %s1612_s18 = smov 0   ;;  %s1774_s0 = inlined_call_operand.vmem [shape: f32[2,8,32], index: 0, kind: input, shape index: {}, may-alias: {0,1}]   ;;  %s1775_s1 = inlined_call_operand.vmem [shape: f32[2,8,32], index: 1, kind: input, shape index: {}, may-alias: {0,1}]   ;;  %s1776_s2 = inlined_call_operand.vmem [shape: f32[2,1,8], index: 2, kind: input, shape index: {}]   ;;  %s1777_s3 = inlined_call_operand.vmem [shape: f32[1,32], index: 3, kind: input, shape index: {}]   ;;  %s1778_s4 = inlined_call_operand.vmem [shape: f32[1,32], index: 4, kind: input, shape index: {}]   ;;  %s1779_s5 = inlined_call_operand.vmem [shape: bf16[32,32], index: 5, kind: input, shape index: {}]   ;;  %s1780_s6 = inlined_call_operand.vmem [shape: f32[1,32], index: 6, kind: input, shape index: {}]   ;;  %s1781_s7 = inlined_call_operand.vmem [shape: bf16[32,64], index: 7, kind: input, shape index: {}]   ;;  %s1782_s8 = inlined_call_operand.vmem [shape: f32[1,64], index: 8, kind: input, shape index: {}]   ;;  %s1783_s9 = inlined_call_operand.vmem [shape: bf16[32,32], index: 9, kind: input, shape index: {}]   ;;  %s1784_s10 = inlined_call_operand.vmem [shape: f32[1,32], index: 10, kind: input, shape index: {}]   ;;  %s1785_s11 = inlined_call_operand.vmem [shape: f32[2,8,32], index: 11, kind: output, shape index: {}]  }
   0x1   :  { %s1614_s19 = smov 0  }
   0x2 LB: > { %s33_s20 = sadd.s32 1, %s1531_s18  ;;  %p1316_p0 = scmp.ge.s32.totalorder %s1535_s19, 1  ;;  %s1535_s19 = sphi %s1614_s19, %s21_s19   ;;  %s1531_s18 = sphi %s1612_s18, %s1787_s18   ;;  %s1527_s17 = sphi %s1610_s17, %s1786_s17  }
   0x3   : > { %p35_p1 = scmp.ge.s32.totalorder %s33_s20, 2  ;;  %p372_p2 = scmp.lt.s32.totalorder %s1535_s19, 3 }
   0x5   : > { %s1789_s20 = smov (%p35_p1, %s33_s20), 0  ;;  %p373_p3 = pnand %p1316_p0, %p372_p2 }
   0x6   : > { %p423_p4 = scmp.lt.s32.totalorder (!%p373_p3), %s1527_s17, 1  ;;  %s1539_s30 = smov (!%p373_p3), 120  }
   0x7   : > { %376 = sbr.rel (%p373_p3) target bundleno = 1755 (0x6db), region = 64  ;;  %s1540_s12 = smov (!%p373_p3), 112  }
   0x8   : > { %s1541_s13 = smov (!%p373_p3), 104   ;;  %s1544_s22 = smov (!%p373_p3), 80  }
   0x9   : > { %s1545_s23 = smov (!%p373_p3), 96   ;;  %s1547_s25 = smov (!%p373_p3), 8  }
   0xa   : > { %s1548_s26 = smov (!%p373_p3), 16  }
   0xc   : > { %s1791_s17 = smov (!%p423_p4, %s1527_s17), 1  ;;  %vm452_vm0 = vcmask 261120   ;;  %v1482_v14 = vld [vmem:[%s1781_s7 + $0x8] sm:$0xff]   ;;  %v1537_v16 = vmov 0.0   ;;  %v1483_v17 = vld [vmem:[%s1781_s7] sm:$0xff]   ;;  %vm1538_vm1 = vmmov 0  }
   0xd   : > { %s1631_s21 = sshll.u32 %s1791_s17, 3  ;;  %v1484_v15 = vld [vmem:[%s1779_s5 + $0x8] sm:$0xff]   ;;  %1373 = vmatprep.subr.bf16.mxu0 %v1537_v16  ;;  %1381 = vmatprep.subr.bf16.mxu1 %v1537_v16  ;;  %v1485_v18 = vld [vmem:[%s1779_s5] sm:$0xff]   ;;  %vm556_vm6 = vcmask 519168   ;;  %vm685_vm7 = vcmask 64512   ;;  %s436_s16 = scalar_lea.vmem %s1776_s2, %s1791_s17  ;;  %vm752_vm9 = vcmask 1043456  }
   0xe   : > { %s433_s24 = scalar_lea.vmem %s1775_s1, %s1631_s21  ;;  %s429_s27 = scalar_lea.vmem %s1774_s0, %s1631_s21  ;;  %1374 = vmatpush3.bf16.msra.mxu0 %v1482_v14  ;;  %1382 = vmatpush3.bf16.msra.mxu1 %v1484_v15  ;;  %v1320_v35 = vld [vmem:[%s1777_s3] ss:$0 sm:$0xff]  ;;  %vm912_vm10 = vcmask 130112   ;;  %vm1028_vm11 = vcmask 195712   ;;  %vm1144_vm12 = vcmask 261312  }
   0xf   : > { %v449_v0 = vld [vmem:[%s433_s24] sm:$0xff]  ;;  %1375 = vmatprep.subr.bf16.mxu0 %v1537_v16  ;;  %1377 = vmatprep.mubr.msk.bf16.mxu0 %vm1538_vm1, %v1537_v16  ;;  %s1543_s17 = smov 88   ;;  %s1546_s24 = smov 72  }
  0x10   : > { %v453_v1 = vsel %vm452_vm0, %v449_v0, 0.0  ;;  %v1642_v2 = vld [vmem:[%s429_s27] sm:$0xff]  ;;  %1383 = vmatprep.subr.bf16.mxu1 %v1537_v16  ;;  %1385 = vmatprep.mubr.msk.bf16.mxu1 %vm1538_vm1, %v1537_v16 }
  0x11   : > { %454 = vadd.xlane.f32.xlu0 %v453_v1  ;;  %v562_v3 = vsel %vm452_vm0, %v1642_v2, 0.0  ;;  %v1321_v38 = vld [vmem:[%s1778_s4] ss:$0 sm:$0xff] }
  0x12   : > { %1376 = vmatpush3.bf16.msra.mxu0 %v1483_v17  ;;  %1384 = vmatpush3.bf16.msra.mxu1 %v1485_v18  ;;  %v1322_v47 = vld [vmem:[%s1782_s8] ss:$0 sm:$0xff] }
  0x13   : > { %1389 = vmatprep.subr.bf16.mxu0 %v1537_v16  ;;  %1395 = vmatprep.subr.bf16.mxu1 %v1537_v16  ;;  %v1328_v51 = vld [vmem:[%s1780_s6] ss:$0 sm:$0xff] }
  0x15   : > { %563 = vadd.xlane.f32.xlu0 %v562_v3 }
  0x9a   : > { %v455_v4 = vpop.xlane.xlu0 %454 }
  0x9b   : > { %v457_v5 = vmul.f32 0.03125, %v455_v4 }
  0x9d   : > { %v458_v6 = vsub.f32 %v449_v0, %v457_v5 }
  0x9e   : > { %v564_v7 = vpop.xlane.xlu0 %563 }
  0x9f   : > { %v566_v8 = vmul.f32 0.03125, %v564_v7  ;;  %v459_v9 = vmul.f32 %v458_v6, %v458_v6  ;;  %v479_v36 = vmul.f32 %v1320_v35, %v458_v6 }
  0xa1   : > { %v567_v10 = vsub.f32 %v1642_v2, %v566_v8  ;;  %v460_v11 = vsel %vm452_vm0, %v459_v9, 0.0 }
  0xa2   : > { %461 = vadd.xlane.f32.xlu1 %v460_v11  ;;  %v665_v11 = vld [vmem:[%s436_s16] sm:$0x1] }
  0xa3   : > { %v568_v12 = vmul.f32 %v567_v10, %v567_v10  ;;  %v588_v40 = vmul.f32 %v1320_v35, %v567_v10  ;;  %v668_v10 = vlaneseq }
  0xa5   : > { %v569_v13 = vsel %vm452_vm0, %v568_v12, 0.0  ;;  %v1332_v12 = vadd.f32 -1.0, %v665_v11  ;;  %v674_v14 = vand.u32 127, %v668_v10 }
  0xa6   : > { %570 = vadd.xlane.f32.xlu1 %v569_v13  ;;  %v669_v13 = vshrl.u32 %v668_v10, 7 }
  0xa7   : > { %v667_v15 = vmul.f32 1e+09, %v1332_v12 }
  0xa8   : > { %v680_v17 = vsub.s32 0, %v669_v13  ;;  %vm675_vm8 = vcmp.ge.s32.totalorder %v669_v13, %v674_v14 }
  0xaa   : > { %v681_v18 = vrot.slane %v667_v15, %v680_v17 }
 0x12b   : > { %v462_v19 = vpop.xlane.xlu1 %461 }
 0x12c   : > { %v463_v20 = vmul.f32 0.032258064, %v462_v19  ;;  %v1542_v19 = vmov -1e+09  }
 0x12e   : > { %1489 = vrsqrt.f32 %v463_v20  ;;  %vm466_vm2 = vcmp.eq.f32.partialorder %v463_v20, inf  ;;  %v469_v25 = vand.u32 2147483648, %v463_v20  ;;  %vm468_vm3 = vcmp.eq.f32.partialorder %v463_v20, 0.0 }
 0x12f   : > { %v571_v21 = vpop.xlane.xlu1 %570 }
 0x130   : > { %v572_v22 = vmul.f32 0.032258064, %v571_v21 }
 0x132   : > { %1491 = vrsqrt.f32 %v572_v22  ;;  %vm575_vm4 = vcmp.eq.f32.partialorder %v572_v22, inf  ;;  %v578_v29 = vand.u32 2147483648, %v572_v22  ;;  %vm577_vm5 = vcmp.eq.f32.partialorder %v572_v22, 0.0 }
 0x13b   : > { %v1490_v23 = vpop.eup %1489 }
 0x13c   : > { %v465_v24 = vmul.f32 %v1490_v23, %v463_v20 }
 0x13e   : > { %v467_v26 = vsel %vm466_vm2, %v463_v20, %v465_v24  ;;  %v676_v20 = vsel %vm675_vm8, 0.0, %v1542_v19 }
 0x13f   : > { %v1492_v27 = vpop.eup %1491  ;;  %v470_v28 = vsel %vm468_vm3, %v469_v25, %v467_v26  ;;  %v683_v21 = vadd.f32 %v681_v18, %v676_v20 }
 0x140   : > { %v471_v30 = vadd.f32 1e-06, %v470_v28  ;;  %v574_v31 = vmul.f32 %v1492_v27, %v572_v22 }
 0x142   : > { %1493 = vrcp.f32 %v471_v30  ;;  %v576_v32 = vsel %vm575_vm4, %v572_v22, %v574_v31 }
 0x143   : > { %v579_v33 = vsel %vm577_vm5, %v578_v29, %v576_v32 }
 0x144   : > { %v580_v34 = vadd.f32 1e-06, %v579_v33 }
 0x146   : > { %1495 = vrcp.f32 %v580_v34 }
 0x14f   : > { %v1494_v37 = vpop.eup %1493 }
 0x150   : > { %v480_v39 = vmul.f32 %v1494_v37, %v479_v36 }
 0x152   : > { %v487_v41 = vadd.f32 %v1321_v38, %v480_v39 }
 0x153   : > { %v1496_v42 = vpop.eup %1495 }
 0x154   : > { %v488_v43 = vpack.c.bf16 %v487_v41, %v487_v41  ;;  %v589_v44 = vmul.f32 %v1496_v42, %v588_v40 }
 0x156   : > { %1378 = vmatmul.mubr.msk.bf16.vlgmr.msra.gmra.mxu0 %vm452_vm0, %v488_v43  ;;  %v596_v45 = vadd.f32 %v1321_v38, %v589_v44 }
 0x157   : > { %1391 = vmatprep.mubr.msk.bf16.mxu0 %vm1538_vm1, %v1537_v16 }
 0x158   : > { %v597_v46 = vpack.c.bf16 %v596_v45, %v596_v45 }
 0x15a   : > { %1386 = vmatmul.mubr.msk.bf16.vlgmr.msra.gmra.mxu1 %vm452_vm0, %v597_v46 }
 0x15b   : > { %1397 = vmatprep.mubr.msk.bf16.mxu1 %vm1538_vm1, %v1537_v16 }
 0x216   : > { %v549_v48 = vpop.f32.mrf.mxu0 }
 0x217   : > { %v550_v49 = vadd.f32 %v1322_v47, %v549_v48 }
 0x218   : > { %v1379_v50 = vpop.f32.mrf.mxu0 }
 0x219   : > { %v555_v52 = vpack.c.bf16 %v550_v49, %v550_v49 }
 0x21a   : > { %v552_v53 = vpop.f32.mrf.mxu0  ;;  %v658_v54 = vpop.f32.mrf.mxu1 }
 0x21b   : > { %557 = vst.msk [vmem:[#allocation2] sm:$0xf] %vm556_vm6, %v555_v52  ;;  %v659_v55 = vadd.f32 %v1328_v51, %v658_v54 }
 0x21c   : > { %v1380_v56 = vpop.f32.mrf.mxu0  ;;  %v1387_v57 = vpop.f32.mrf.mxu1 }
 0x21d   : > { %v664_v58 = vpack.c.bf16 %v659_v55, %v659_v55 }
 0x21e   : > { %v661_v59 = vpop.f32.mrf.mxu1 }
 0x21f   : > { %798 = vrot.lane.b32.xlu1 %v664_v58, %s1539_s30 }
 0x220   : > { %v1388_v60 = vpop.f32.mrf.mxu1 }
 0x222   : > { %v684_v61 = vld [vmem:[#allocation2] sm:$0xf] }
 0x223   : > { %v690_v62 = vsel %vm685_vm7, %v684_v61, 0  ;;  %v1690_v63 = vcombine.low %v684_v61, %v684_v61 }
 0x224   : > { %1390 = vmatpush3.bf16.xpose.msra.mxu0 %v690_v62 }
 0x225   : > { %800 = vrot.lane.b32.xlu0 %v1690_v63, %s1539_s30  ;;  %916 = vrot.lane.b32.xlu1 %v1690_v63, %s1540_s12 }
 0x226   : > { %1401 = vmatprep.subr.bf16.mxu0 %v1537_v16 }
 0x229   : > { %1032 = vrot.lane.b32.xlu0 %v1690_v63, %s1541_s13  ;;  %914 = vrot.lane.b32.xlu1 %v664_v58, %s1540_s12  ;;  %s1549_s12 = smov 24  }
 0x22b   : > { %1392 = vmatmul.mubr.msk.bf16.vlgmr.msra.gmra.mxu0 %vm685_vm7, %v664_v58 }
 0x22c   : > { %1403 = vmatprep.mubr.msk.bf16.mxu0 %vm1538_vm1, %v1537_v16 }
 0x22d   : > { %1030 = vrot.lane.b32.xlu1 %v664_v58, %s1541_s13 }
 0x291   : > { %v799_v3 = vpop.permute.xlu1 %798 }
 0x297   : > { %v801_v0 = vpop.permute.xlu0 %800  ;;  %v917_v4 = vpop.permute.xlu1 %916 }
 0x298   : > { %v806_v1 = vsel %vm685_vm7, %v801_v0, 0  ;;  %v922_v5 = vsel %vm685_vm7, %v917_v4, 0 }
 0x299   : > { %1402 = vmatpush3.bf16.xpose.msra.mxu0 %v806_v1 }
 0x29a   : > { %1413 = vmatprep.subr.bf16.mxu0 %v1537_v16 }
 0x29b   : > { %v1033_v6 = vpop.permute.xlu0 %1032  ;;  %v915_v7 = vpop.permute.xlu1 %914 }
 0x29c   : > { %v1038_v8 = vsel %vm685_vm7, %v1033_v6, 0 }
 0x29f   : > { %v1031_v9 = vpop.permute.xlu1 %1030 }
 0x2a0   : > { %1404 = vmatmul.mubr.msk.bf16.vlgmr.msra.gmra.mxu0 %vm685_vm7, %v799_v3 }
 0x2a1   : > { %1414 = vmatpush3.bf16.xpose.msra.mxu0 %v922_v5  ;;  %1415 = vmatprep.mubr.msk.bf16.mxu0 %vm1538_vm1, %v1537_v16 }
 0x2a2   : > { %1425 = vmatprep.subr.bf16.mxu0 %v1537_v16 }
 0x2a8   : > { %1416 = vmatmul.mubr.msk.bf16.vlgmr.msra.gmra.mxu0 %vm685_vm7, %v915_v7 }
 0x2a9   : > { %1426 = vmatpush3.bf16.xpose.msra.mxu0 %v1038_v8  ;;  %1427 = vmatprep.mubr.msk.bf16.mxu0 %vm1538_vm1, %v1537_v16 }
 0x2aa   : > { %1437 = vmatprep.subr.bf16.mxu0 %v1537_v16 }
 0x2b0   : > { %1428 = vmatmul.mubr.msk.bf16.vlgmr.msra.gmra.mxu0 %vm685_vm7, %v1031_v9 }
 0x2b1   : > { %1441 = vmatprep.mubr.msk.bf16.mxu0 %vm1538_vm1, %v1537_v16 }
 0x2eb   : > { %v726_v22 = vpop.f32.mrf.mxu0 }
 0x2ec   : > { %v727_v23 = vadd.f32 %v726_v22, %v683_v21 }
 0x2ed   : > { %v1393_v24 = vpop.f32.mrf.mxu0 }
 0x2ee   : > { %v732_v25 = vsel %vm685_vm7, %v727_v23, -inf }
 0x2ef   : > { %733 = vmax.xlane.f32.xlu0 %v732_v25  ;;  %v729_v26 = vpop.f32.mrf.mxu0 }
 0x2f1   : > { %v1394_v27 = vpop.f32.mrf.mxu0 }
 0x360   : > { %v842_v28 = vpop.f32.mrf.mxu0 }
 0x361   : > { %v843_v29 = vadd.f32 %v842_v28, %v683_v21 }
 0x362   : > { %v1405_v30 = vpop.f32.mrf.mxu0 }
 0x363   : > { %v848_v31 = vsel %vm685_vm7, %v843_v29, -inf }
 0x364   : > { %849 = vmax.xlane.f32.xlu1 %v848_v31  ;;  %v845_v32 = vpop.f32.mrf.mxu0 }
 0x366   : > { %v1406_v33 = vpop.f32.mrf.mxu0 }
 0x368   : > { %v958_v34 = vpop.f32.mrf.mxu0 }
 0x369   : > { %v959_v35 = vadd.f32 %v958_v34, %v683_v21 }
 0x36a   : > { %v1417_v36 = vpop.f32.mrf.mxu0 }
 0x36b   : > { %v964_v37 = vsel %vm685_vm7, %v959_v35, -inf }
 0x36c   : > { %965 = vmax.xlane.f32.xlu0 %v964_v37  ;;  %v961_v38 = vpop.f32.mrf.mxu0 }
 0x36e   : > { %v1418_v39 = vpop.f32.mrf.mxu0 }
 0x370   : > { %v1074_v40 = vpop.f32.mrf.mxu0 }
 0x371   : > { %v1075_v41 = vadd.f32 %v1074_v40, %v683_v21  ;;  %v1487_v40 = vld [vmem:[%s1783_s9 + $0x8] sm:$0xff]  }
 0x372   : > { %v1429_v42 = vpop.f32.mrf.mxu0  ;;  %1438 = vmatpush3.bf16.msra.mxu0 %v1487_v40 }
 0x373   : > { %v1080_v43 = vsel %vm685_vm7, %v1075_v41, -inf  ;;  %1439 = vmatprep.subr.bf16.mxu0 %v1537_v16 }
 0x374   : > { %1081 = vmax.xlane.f32.xlu0 %v1080_v43  ;;  %v1077_v44 = vpop.f32.mrf.mxu0 }
 0x376   : > { %v1430_v45 = vpop.f32.mrf.mxu0 }
 0x378   : > { %v734_v46 = vpop.xlane.xlu0 %733 }
 0x379   : > { %v735_v47 = vsub.f32 %v727_v23, %v734_v46 }
 0x37b   : > { %v736_v48 = vmul.f32 1.442695, %v735_v47 }
 0x37d   : > { %1497 = vpow2.f32 %v736_v48 }
 0x38a   : > { %v1498_v49 = vpop.eup %1497 }
 0x38b   : > { %v738_v50 = vsel %vm685_vm7, %v1498_v49, 0.0 }
 0x38c   : > { %739 = vadd.xlane.f32.xlu0 %v738_v50 }
 0x3ed   : > { %v850_v51 = vpop.xlane.xlu1 %849 }
 0x3ee   : > { %v851_v52 = vsub.f32 %v843_v29, %v850_v51  ;;  %v1345_v51 = vld [vmem:[%s1784_s10] ss:$0 sm:$0xff] }
 0x3f0   : > { %v852_v53 = vmul.f32 1.442695, %v851_v52 }
 0x3f2   : > { %1499 = vpow2.f32 %v852_v53 }
 0x3f5   : > { %v966_v54 = vpop.xlane.xlu0 %965 }
 0x3f6   : > { %v967_v55 = vsub.f32 %v959_v35, %v966_v54 }
 0x3f8   : > { %v968_v56 = vmul.f32 1.442695, %v967_v55 }
 0x3fa   : > { %1501 = vpow2.f32 %v968_v56 }
 0x3fd   : > { %v1082_v61 = vpop.xlane.xlu0 %1081 }
 0x3fe   : > { %v1083_v62 = vsub.f32 %v1075_v41, %v1082_v61  ;;  %v1488_v41 = vld [vmem:[%s1783_s9] sm:$0xff]  }
 0x3ff   : > { %v1500_v57 = vpop.eup %1499  ;;  %1440 = vmatpush3.bf16.msra.mxu0 %v1488_v41 }
 0x400   : > { %v854_v58 = vsel %vm685_vm7, %v1500_v57, 0.0  ;;  %v1084_v0 = vmul.f32 1.442695, %v1083_v62 }
 0x401   : > { %855 = vadd.xlane.f32.xlu1 %v854_v58 }
 0x402   : > { %1503 = vpow2.f32 %v1084_v0 }
 0x407   : > { %v1502_v59 = vpop.eup %1501 }
 0x408   : > { %v970_v60 = vsel %vm685_vm7, %v1502_v59, 0.0 }
 0x409   : > { %971 = vadd.xlane.f32.xlu0 %v970_v60 }
 0x40f   : > { %v1504_v1 = vpop.eup %1503 }
 0x410   : > { %v1086_v3 = vsel %vm685_vm7, %v1504_v1, 0.0 }
 0x412   : > { %860 = vrot.lane.b32.xlu1 %v1690_v63, %s1543_s17  ;;  %s443_s17 = scalar_lea.vmem %s1785_s11, %s1631_s21 }
 0x415   : > { %v740_v4 = vpop.xlane.xlu0 %739 }
 0x416   : > { %976 = vrot.lane.b32.xlu1 %v1690_v63, %s1544_s22  ;;  %1505 = vrcp.f32 %v740_v4 }
 0x41f   : > { %747 = vrot.lane.b32.xlu0 %v1690_v63, %s1545_s23 }
 0x423   : > { %v1506_v6 = vpop.eup %1505 }
 0x424   : > { %v742_v8 = vmul.f32 %v1506_v6, %v1498_v49 }
 0x426   : > { %v743_v12 = vpack.c.bf16 %v742_v8, %v742_v8 }
 0x43a   : > { %1087 = vadd.xlane.f32.xlu1 %v1086_v3 }
 0x44b   : > { %1092 = vrot.lane.b32.xlu1 %v1690_v63, %s1546_s24 }
 0x48a   : > { %v856_v5 = vpop.xlane.xlu1 %855 }
 0x48b   : > { %1507 = vrcp.f32 %v856_v5 }
 0x48e   : > { %v861_v11 = vpop.permute.xlu1 %860 }
 0x48f   : > { %v866_v63 = vsel %vm752_vm9, %v861_v11, 0 }
 0x492   : > { %v972_v7 = vpop.xlane.xlu0 %971  ;;  %v977_v15 = vpop.permute.xlu1 %976 }
 0x493   : > { %1509 = vrcp.f32 %v972_v7  ;;  %v982_v19 = vsel %vm752_vm9, %v977_v15, 0 }
 0x496   : > { %v748_v9 = vpop.permute.xlu0 %747 }
 0x497   : > { %v754_v10 = vsel %vm752_vm9, %v748_v9, 0 }
 0x498   : > { %1396 = vmatpush3.bf16.msra.mxu1 %v754_v10  ;;  %v1508_v13 = vpop.eup %1507 }
 0x499   : > { %1407 = vmatprep.subr.bf16.mxu1 %v1537_v16  ;;  %v858_v14 = vmul.f32 %v1508_v13, %v1500_v57 }
 0x49b   : > { %1398 = vmatmul.mubr.msk.bf16.vlgmr.msra.gmra.mxu1 %vm685_vm7, %v743_v12  ;;  %v859_v17 = vpack.c.bf16 %v858_v14, %v858_v14 }
 0x49c   : > { %1408 = vmatpush3.bf16.msra.mxu1 %v866_v63  ;;  %1409 = vmatprep.mubr.msk.bf16.mxu1 %vm1538_vm1, %v1537_v16 }
 0x49d   : > { %1419 = vmatprep.subr.bf16.mxu1 %v1537_v16 }
 0x4a0   : > { %v1510_v18 = vpop.eup %1509 }
 0x4a1   : > { %v974_v20 = vmul.f32 %v1510_v18, %v1502_v59 }
 0x4a3   : > { %1410 = vmatmul.mubr.msk.bf16.vlgmr.msra.gmra.mxu1 %vm685_vm7, %v859_v17  ;;  %v975_v21 = vpack.c.bf16 %v974_v20, %v974_v20 }
 0x4a4   : > { %1420 = vmatpush3.bf16.msra.mxu1 %v982_v19  ;;  %1421 = vmatprep.mubr.msk.bf16.mxu1 %vm1538_vm1, %v1537_v16 }
 0x4a5   : > { %1431 = vmatprep.subr.bf16.mxu1 %v1537_v16 }
 0x4ab   : > { %1422 = vmatmul.mubr.msk.bf16.vlgmr.msra.gmra.mxu1 %vm685_vm7, %v975_v21 }
 0x4ac   : > { %1433 = vmatprep.mubr.msk.bf16.mxu1 %vm1538_vm1, %v1537_v16 }
 0x4c3   : > { %v1088_v22 = vpop.xlane.xlu1 %1087 }
 0x4c4   : > { %1511 = vrcp.f32 %v1088_v22 }
 0x4c7   : > { %v1093_v23 = vpop.permute.xlu1 %1092 }
 0x4c8   : > { %v1098_v24 = vsel %vm752_vm9, %v1093_v23, 0 }
 0x4c9   : > { %1432 = vmatpush3.bf16.msra.mxu1 %v1098_v24 }
 0x4d1   : > { %v1512_v25 = vpop.eup %1511 }
 0x4d2   : > { %v1090_v26 = vmul.f32 %v1512_v25, %v1504_v1 }
 0x4d4   : > { %v1091_v27 = vpack.c.bf16 %v1090_v26, %v1090_v26 }
 0x4d6   : > { %1434 = vmatmul.mubr.msk.bf16.vlgmr.msra.gmra.mxu1 %vm685_vm7, %v1091_v27 }
 0x55b   : > { %v790_v28 = vpop.f32.mrf.mxu1 }
 0x55c   : > { %796 = vst.msk [vmem:[#allocation3] sm:$0xff] %vm685_vm7, %v790_v28 }
 0x55d   : > { %v1399_v29 = vpop.f32.mrf.mxu1 }
 0x55f   : > { %v793_v30 = vpop.f32.mrf.mxu1 }
 0x561   : > { %v1400_v31 = vpop.f32.mrf.mxu1 }
 0x563   : > { %v902_v32 = vpop.f32.mrf.mxu1 }
 0x564   : > { %909 = vrot.lane.b32.xlu0 %v902_v32, %s1547_s25 }
 0x565   : > { %v1411_v33 = vpop.f32.mrf.mxu1 }
 0x567   : > { %v905_v34 = vpop.f32.mrf.mxu1 }
 0x569   : > { %v1412_v35 = vpop.f32.mrf.mxu1 }
 0x56b   : > { %v1018_v36 = vpop.f32.mrf.mxu1 }
 0x56c   : > { %1025 = vrot.lane.b32.xlu1 %v1018_v36, %s1548_s26 }
 0x56d   : > { %v1423_v37 = vpop.f32.mrf.mxu1 }
 0x56f   : > { %v1021_v38 = vpop.f32.mrf.mxu1 }
 0x571   : > { %v1424_v39 = vpop.f32.mrf.mxu1 }
 0x596   : > { %v1134_v42 = vpop.f32.mrf.mxu1 }
 0x597   : > { %1141 = vrot.lane.b32.xlu0 %v1134_v42, %s1549_s12 }
 0x598   : > { %v1435_v43 = vpop.f32.mrf.mxu1 }
 0x59a   : > { %v1137_v44 = vpop.f32.mrf.mxu1 }
 0x59c   : > { %v1436_v45 = vpop.f32.mrf.mxu1 }
 0x5d6   : > { %v910_v46 = vpop.permute.xlu0 %909 }
 0x5d7   : > { %913 = vst.msk [vmem:[#allocation3] sm:$0xff] %vm912_vm10, %v910_v46 }
 0x5de   : > { %v1026_v47 = vpop.permute.xlu1 %1025 }
 0x5df   : > { %1029 = vst.msk [vmem:[#allocation3] sm:$0xff] %vm1028_vm11, %v1026_v47 }
 0x609   : > { %v1142_v48 = vpop.permute.xlu0 %1141 }
 0x60a   : > { %1145 = vst.msk [vmem:[#allocation3] sm:$0xff] %vm1144_vm12, %v1142_v48 }
 0x611   : > { %v1146_v49 = vld [vmem:[#allocation3] sm:$0xff] }
 0x612   : > { %v1147_v50 = vpack.c.bf16 %v1146_v49, %v1146_v49 }
 0x614   : > { %1442 = vmatmul.mubr.msk.bf16.vlgmr.msra.gmra.mxu0 %vm452_vm0, %v1147_v50 }
 0x6d4   : > { %v1201_v16 = vpop.f32.mrf.mxu0 }
 0x6d5   : > { %v1207_v52 = vadd.f32 %v1201_v16, %v1642_v2 }
 0x6d6   : > { %v1443_v53 = vpop.f32.mrf.mxu0 }
 0x6d7   : > { %v1215_v54 = vadd.f32 %v1345_v51, %v1207_v52 }
 0x6d8   : > { %v1204_v55 = vpop.f32.mrf.mxu0 }
 0x6d9   : > { %1216 = vst.msk [vmem:[%s443_s17] sm:$0xff] %vm452_vm0, %v1215_v54 }
 0x6da   : > { %v1444_v56 = vpop.f32.mrf.mxu0 }
 0x6db PF: > { %s21_s19 = sadd.s32 1, %s1535_s19   ;;  %s1786_s17 = smov %s1531_s18 }
 0x6dc   : > { %p18_p5 = scmp.ge.s32.totalorder %s21_s19, 4   ;;  %s1787_s18 = smov %s1789_s20 }
 0x6de   :  { %20 = sbr.rel (!%p18_p5) target bundleno = 2 (0x2), region = 104 }

// kernel: encoder_decoder_forward.19
= control target key start
LH: loop header
LB: loop body
LE: loop exit
PB: predicated region body
PF: predicated region fallthrough
CT: control target
= control target key end

     0   :  { %vm38_vm0 = vcmask 261120   ;;  %s543_s0 = inlined_call_operand.vmem [shape: f32[16,32], index: 0, kind: input, shape index: {}]   ;;  %s544_s1 = inlined_call_operand.vmem [shape: f32[1,32], index: 1, kind: input, shape index: {}]   ;;  %s545_s2 = inlined_call_operand.vmem [shape: f32[1,32], index: 2, kind: input, shape index: {}]   ;;  %s546_s3 = inlined_call_operand.vmem [shape: bf16[32,64], index: 3, kind: input, shape index: {}]   ;;  %s547_s4 = inlined_call_operand.vmem [shape: f32[1,64], index: 4, kind: input, shape index: {}]   ;;  %s548_s5 = inlined_call_operand.vmem [shape: bf16[64,32], index: 5, kind: input, shape index: {}]   ;;  %s549_s6 = inlined_call_operand.vmem [shape: f32[1,32], index: 6, kind: input, shape index: {}]   ;;  %s550_s7 = inlined_call_operand.vmem [shape: f32[1,32], index: 7, kind: input, shape index: {}]   ;;  %s551_s8 = inlined_call_operand.vmem [shape: f32[1,32], index: 8, kind: input, shape index: {}]   ;;  %s552_s9 = inlined_call_operand.hbm [shape: f32[16,32], index: 9, kind: output, shape index: {}]  }
   0x1   :  { %v480_v0 = vld [vmem:[%s543_s0] sm:$0xff]  ;;  %v485_v1 = vld [vmem:[%s543_s0 + $0x8] sm:$0xff] }
   0x2   :  { %v39_v2 = vsel %vm38_vm0, %v480_v0, 0.0  ;;  %v42_v3 = vsel %vm38_vm0, %v485_v1, 0.0 }
   0x3   :  { %40 = vadd.xlane.f32.xlu0 %v39_v2 }
   0x4   :  { %14 = vsyncpa [#allocation3], 0  ;;  %v378_v14 = vld [vmem:[%s546_s3 + $0x8] sm:$0xff]   ;;  %v422_v15 = vmov 0.0   ;;  %vm423_vm1 = vmmov 0   ;;  %v379_v16 = vld [vmem:[%s546_s3] sm:$0xff]  }
   0x5   :  { %353 = vmatprep.subr.bf16.mxu0 %v422_v15  ;;  %357 = vmatprep.mubr.msk.bf16.mxu0 %vm423_vm1, %v422_v15  ;;  %v380_v17 = vld [vmem:[%s548_s5 + $0x18] sm:$0xff]   ;;  %v331_v34 = vld [vmem:[%s544_s1] ss:$0 sm:$0xff]  ;;  %v381_v45 = vld [vmem:[%s548_s5 + $0x10] sm:$0xff]   ;;  %vm199_vm6 = vcmask 523264   ;;  %s424_s30 = smov [#allocation2]  }
   0x6   :  { %354 = vmatpush3.bf16.msra.mxu0 %v378_v14  ;;  %361 = vmatprep.subr.bf16.mxu1 %v422_v15  ;;  %v332_v40 = vld [vmem:[%s545_s2] ss:$0 sm:$0xff]  ;;  %v382_v46 = vld [vmem:[%s548_s5 + $0x8] sm:$0xff]   ;;  %s320_s10 = sshll.u32 %s424_s30, 4  ;;  %s321_s10 = int_to_ptr.vmem [resolvable:$true] %s320_s10 }
   0x7   :  { %43 = vadd.xlane.f32.xlu0 %v42_v3  ;;  %355 = vmatprep.subr.bf16.mxu0 %v422_v15  ;;  %v383_v47 = vld [vmem:[%s548_s5] sm:$0xff]   ;;  %p405_p1 = scmp.lt.s32.totalorder %s321_s10, %s321_s10 }
   0x8   :  { %369 = vmatprep.mubr.msk.bf16.mxu1 %vm423_vm1, %v422_v15  ;;  %362 = vmatpush3.bf16.msra.mxu1 %v380_v17  ;;  %v333_v48 = vld [vmem:[%s547_s4] ss:$0 sm:$0xff] }
   0x9   :  { %363 = vmatprep.subr.bf16.mxu1 %v422_v15  ;;  %v342_v59 = vld [vmem:[%s549_s6] ss:$0 sm:$0xff] }
   0xa   :  { %356 = vmatpush3.bf16.msra.mxu0 %v379_v16 }
   0xc   :  { %364 = vmatpush3.bf16.msra.mxu1 %v381_v45 }
   0xd   :  { %365 = vmatprep.subr.bf16.mxu1 %v422_v15 }
  0x10   :  { %366 = vmatpush3.bf16.msra.mxu1 %v382_v46 }
  0x11   :  { %367 = vmatprep.subr.bf16.mxu1 %v422_v15 }
  0x14   :  { %368 = vmatpush3.bf16.msra.mxu1 %v383_v47 }
  0x8c   :  { %v41_v4 = vpop.xlane.xlu0 %40 }
  0x8d   :  { %v46_v5 = vmul.f32 0.03125, %v41_v4 }
  0x8f   :  { %v48_v6 = vsub.f32 %v480_v0, %v46_v5 }
  0x90   :  { %v44_v7 = vpop.xlane.xlu0 %43 }
  0x91   :  { %v47_v8 = vmul.f32 0.03125, %v44_v7  ;;  %v50_v9 = vmul.f32 %v48_v6, %v48_v6  ;;  %v84_v36 = vmul.f32 %v331_v34, %v48_v6 }
  0x93   :  { %v49_v10 = vsub.f32 %v485_v1, %v47_v8  ;;  %v52_v11 = vsel %vm38_vm0, %v50_v9, 0.0 }
  0x94   :  { %53 = vadd.xlane.f32.xlu1 %v52_v11 }
  0x95   :  { %v51_v12 = vmul.f32 %v49_v10, %v49_v10  ;;  %v85_v37 = vmul.f32 %v331_v34, %v49_v10  ;;  %v344_v34 = vld [vmem:[%s551_s8] ss:$0 sm:$0xff] }
  0x97   :  { %v55_v13 = vsel %vm38_vm0, %v51_v12, 0.0 }
  0x98   :  { %56 = vadd.xlane.f32.xlu1 %v55_v13 }
 0x11d   :  { %v54_v18 = vpop.xlane.xlu1 %53 }
 0x11e   :  { %v58_v19 = vmul.f32 0.032258064, %v54_v18 }
 0x120   :  { %384 = vrsqrt.f32 %v58_v19  ;;  %vm62_vm2 = vcmp.eq.f32.partialorder %v58_v19, inf  ;;  %v65_v24 = vand.u32 2147483648, %v58_v19  ;;  %vm64_vm3 = vcmp.eq.f32.partialorder %v58_v19, 0.0 }
 0x121   :  { %v57_v20 = vpop.xlane.xlu1 %56 }
 0x122   :  { %v59_v21 = vmul.f32 0.032258064, %v57_v20 }
 0x124   :  { %386 = vrsqrt.f32 %v59_v21  ;;  %vm69_vm4 = vcmp.eq.f32.partialorder %v59_v21, inf  ;;  %v72_v30 = vand.u32 2147483648, %v59_v21  ;;  %vm71_vm5 = vcmp.eq.f32.partialorder %v59_v21, 0.0 }
 0x12d   :  { %v385_v22 = vpop.eup %384 }
 0x12e   :  { %v61_v23 = vmul.f32 %v385_v22, %v58_v19 }
 0x130   :  { %v63_v25 = vsel %vm62_vm2, %v58_v19, %v61_v23 }
 0x131   :  { %v387_v26 = vpop.eup %386  ;;  %v66_v27 = vsel %vm64_vm3, %v65_v24, %v63_v25 }
 0x132   :  { %v74_v28 = vadd.f32 1e-06, %v66_v27  ;;  %v68_v29 = vmul.f32 %v387_v26, %v59_v21 }
 0x134   :  { %388 = vrcp.f32 %v74_v28  ;;  %v70_v31 = vsel %vm69_vm4, %v59_v21, %v68_v29 }
 0x135   :  { %v73_v32 = vsel %vm71_vm5, %v72_v30, %v70_v31  ;;  %v343_v31 = vld [vmem:[%s550_s7] ss:$0 sm:$0xff]  ;;  %s400_s7 = scalar_lea.vmem %s321_s10, 256 }
 0x136   :  { %v75_v33 = vadd.f32 1e-06, %v73_v32  ;;  %p401_p0 = scmp.ne.s32.totalorder %s321_s10, %s400_s7  ;;  %p406_p2 = scmp.lt.s32.totalorder %s400_s7, %s400_s7 }
 0x138   :  { %390 = vrcp.f32 %v75_v33  ;;  %p407_p3 = por %p406_p2, %p405_p1 }
 0x13a   :  { %p408_p4 = pnand %p407_p3, %p401_p0 }
 0x141   :  { %v389_v35 = vpop.eup %388 }
 0x142   :  { %v86_v38 = vmul.f32 %v389_v35, %v84_v36 }
 0x144   :  { %v94_v42 = vadd.f32 %v332_v40, %v86_v38 }
 0x145   :  { %v391_v39 = vpop.eup %390 }
 0x146   :  { %v87_v41 = vmul.f32 %v391_v39, %v85_v37 }
 0x148   :  { %v95_v43 = vadd.f32 %v332_v40, %v87_v41 }
 0x14a   :  { %v96_v44 = vpack.c.bf16 %v95_v43, %v94_v42 }
 0x14c   :  { %358 = vmatmul.mubr.msk.bf16.vlgmr.msra.gmra.mxu0 %vm38_vm0, %v96_v44 }
 0x20c   :  { %v157_v49 = vpop.f32.mrf.mxu0 }
 0x20d   :  { %v158_v51 = vadd.f32 %v333_v48, %v157_v49 }
 0x20e   :  { %v359_v50 = vpop.f32.mrf.mxu0 }
 0x20f   :  { %v164_v55 = vmax.f32 %v158_v51, 0.0 }
 0x210   :  { %v160_v52 = vpop.f32.mrf.mxu0 }
 0x211   :  { %v161_v53 = vadd.f32 %v333_v48, %v160_v52 }
 0x212   :  { %v360_v54 = vpop.f32.mrf.mxu0 }
 0x213   :  { %v165_v56 = vmax.f32 %v161_v53, 0.0 }
 0x215   :  { %v166_v57 = vpack.c.bf16 %v165_v56, %v164_v55 }
 0x217   :  { %370 = vmatmul.mubr.msk.bf16.vlgmr.msra.gmra.mxu1 %vm199_vm6, %v166_v57 }
 0x2d7   :  { %v237_v58 = vpop.f32.mrf.mxu1 }
 0x2d8   :  { %v244_v60 = vadd.f32 %v237_v58, %v480_v0 }
 0x2d9   :  { %v371_v61 = vpop.f32.mrf.mxu1 }
 0x2da   :  { %v253_v62 = vadd.f32 %v342_v59, %v244_v60 }
 0x2db   :  { %v240_v63 = vpop.f32.mrf.mxu1 }
 0x2dc   :  { %v245_v2 = vadd.f32 %v240_v63, %v485_v1  ;;  %v257_v3 = vsel %vm38_vm0, %v253_v62, 0.0 }
 0x2dd   :  { %258 = vadd.xlane.f32.xlu0 %v257_v3  ;;  %v372_v4 = vpop.f32.mrf.mxu1 }
 0x2de   :  { %v254_v5 = vadd.f32 %v342_v59, %v245_v2 }
 0x2e0   :  { %v260_v6 = vsel %vm38_vm0, %v254_v5, 0.0 }
 0x2e1   :  { %261 = vadd.xlane.f32.xlu1 %v260_v6 }
 0x366   :  { %v259_v7 = vpop.xlane.xlu0 %258 }
 0x367   :  { %v263_v8 = vmul.f32 0.03125, %v259_v7 }
 0x369   :  { %v265_v9 = vsub.f32 %v253_v62, %v263_v8 }
 0x36a   :  { %v262_v10 = vpop.xlane.xlu1 %261 }
 0x36b   :  { %v264_v11 = vmul.f32 0.03125, %v262_v10  ;;  %v267_v12 = vmul.f32 %v265_v9, %v265_v9  ;;  %v301_v32 = vmul.f32 %v343_v31, %v265_v9 }
 0x36d   :  { %v266_v0 = vsub.f32 %v254_v5, %v264_v11  ;;  %v269_v13 = vsel %vm38_vm0, %v267_v12, 0.0 }
 0x36e   :  { %270 = vadd.xlane.f32.xlu0 %v269_v13 }
 0x36f   :  { %v268_v14 = vmul.f32 %v266_v0, %v266_v0  ;;  %v302_v36 = vmul.f32 %v343_v31, %v266_v0 }
 0x371   :  { %v272_v1 = vsel %vm38_vm0, %v268_v14, 0.0 }
 0x372   :  { %273 = vadd.xlane.f32.xlu1 %v272_v1 }
 0x3f7   :  { %v271_v15 = vpop.xlane.xlu0 %270 }
 0x3f8   :  { %v275_v16 = vmul.f32 0.032258064, %v271_v15 }
 0x3fa   :  { %392 = vrsqrt.f32 %v275_v16  ;;  %vm279_vm7 = vcmp.eq.f32.partialorder %v275_v16, inf  ;;  %v282_v21 = vand.u32 2147483648, %v275_v16  ;;  %vm281_vm8 = vcmp.eq.f32.partialorder %v275_v16, 0.0 }
 0x3fb   :  { %v274_v17 = vpop.xlane.xlu1 %273 }
 0x3fc   :  { %v276_v18 = vmul.f32 0.032258064, %v274_v17 }
 0x3fe   :  { %394 = vrsqrt.f32 %v276_v18  ;;  %vm286_vm9 = vcmp.eq.f32.partialorder %v276_v18, inf  ;;  %v289_v27 = vand.u32 2147483648, %v276_v18  ;;  %vm288_vm10 = vcmp.eq.f32.partialorder %v276_v18, 0.0 }
 0x407   :  { %v393_v19 = vpop.eup %392 }
 0x408   :  { %v278_v20 = vmul.f32 %v393_v19, %v275_v16 }
 0x40a   :  { %v280_v22 = vsel %vm279_vm7, %v275_v16, %v278_v20 }
 0x40b   :  { %v395_v23 = vpop.eup %394  ;;  %v283_v24 = vsel %vm281_vm8, %v282_v21, %v280_v22 }
 0x40c   :  { %v291_v25 = vadd.f32 1e-06, %v283_v24  ;;  %v285_v26 = vmul.f32 %v395_v23, %v276_v18 }
 0x40e   :  { %396 = vrcp.f32 %v291_v25  ;;  %v287_v28 = vsel %vm286_vm9, %v276_v18, %v285_v26 }
 0x40f   :  { %v290_v29 = vsel %vm288_vm10, %v289_v27, %v287_v28 }
 0x410   :  { %v292_v30 = vadd.f32 1e-06, %v290_v29 }
 0x412   :  { %398 = vrcp.f32 %v292_v30 }
 0x41b   :  { %v397_v33 = vpop.eup %396 }
 0x41c   :  { %v303_v35 = vmul.f32 %v397_v33, %v301_v32 }
 0x41e   :  { %v311_v37 = vadd.f32 %v344_v34, %v303_v35 }
 0x41f   :  { %v399_v38 = vpop.eup %398 }
 0x420   :  { %v304_v39 = vmul.f32 %v399_v38, %v302_v36  ;;  %313 = vst.msk [vmem:[#allocation2] sm:$0xff] %vm38_vm0, %v311_v37 }
 0x422   :  { %v312_v40 = vadd.f32 %v344_v34, %v304_v39 }
 0x424   :  { %314 = vst.msk [vmem:[#allocation2 + $0x8] sm:$0xff] %vm38_vm0, %v312_v40 }
 0x425   :  { %411 = shalt.err (!%p408_p4)
}
 0x426   :  { %s425_s8 = smov 128   ;;  %s426_s11 = smov 8  }
 0x427   :  { %326 = dma.vmem_to_hbm [thread:$0]  %s321_s10, 256, %s552_s9, [#allocation3], %s425_s8, %s425_s8, %s426_s11  }
 0x428   :  { %420 = dma.done.wait [#allocation3], 256  }
 0x429   :  { %421 = vsyncadd [#allocation3], 4294967040 }
 0x42a   :  { %330 = vsyncpa [#allocation3], 1 }

// kernel: encoder_decoder_forward.15
= control target key start
LH: loop header
LB: loop body
LE: loop exit
PB: predicated region body
PF: predicated region fallthrough
CT: control target
= control target key end

     0   :  { %s1555_s17 = smov 0   ;;  %s1557_s18 = smov 0   ;;  %s1717_s0 = inlined_call_operand.vmem [shape: f32[2,8,32], index: 0, kind: input, shape index: {}]   ;;  %s1718_s1 = inlined_call_operand.vmem [shape: f32[2,8,32], index: 1, kind: input, shape index: {}]   ;;  %s1719_s2 = inlined_call_operand.vmem [shape: f32[2,1,8], index: 2, kind: input, shape index: {}]   ;;  %s1720_s3 = inlined_call_operand.vmem [shape: f32[1,32], index: 3, kind: input, shape index: {}]   ;;  %s1721_s4 = inlined_call_operand.vmem [shape: f32[1,32], index: 4, kind: input, shape index: {}]   ;;  %s1722_s5 = inlined_call_operand.vmem [shape: bf16[32,32], index: 5, kind: input, shape index: {}]   ;;  %s1723_s6 = inlined_call_operand.vmem [shape: f32[1,32], index: 6, kind: input, shape index: {}]   ;;  %s1724_s7 = inlined_call_operand.vmem [shape: bf16[32,64], index: 7, kind: input, shape index: {}]   ;;  %s1725_s8 = inlined_call_operand.vmem [shape: f32[1,64], index: 8, kind: input, shape index: {}]   ;;  %s1726_s9 = inlined_call_operand.vmem [shape: bf16[32,32], index: 9, kind: input, shape index: {}]   ;;  %s1727_s10 = inlined_call_operand.vmem [shape: f32[1,32], index: 10, kind: input, shape index: {}]   ;;  %s1728_s11 = inlined_call_operand.vmem [shape: f32[2,8,32], index: 11, kind: output, shape index: {}]  }
   0x1   :  { %s1559_s19 = smov 0  }
   0x2 LB: > { %s33_s20 = sadd.s32 1, %s1477_s18  ;;  %p1269_p0 = scmp.ge.s32.totalorder %s1481_s19, 1  ;;  %s1481_s19 = sphi %s1559_s19, %s21_s19   ;;  %s1477_s18 = sphi %s1557_s18, %s1730_s18   ;;  %s1473_s17 = sphi %s1555_s17, %s1729_s17  }
   0x3   : > { %p35_p1 = scmp.ge.s32.totalorder %s33_s20, 2  ;;  %p372_p2 = scmp.lt.s32.totalorder %s1481_s19, 3 }
   0x5   : > { %s1732_s20 = smov (%p35_p1, %s33_s20), 0  ;;  %p373_p3 = pnand %p1269_p0, %p372_p2 }
   0x6   : > { %p423_p4 = scmp.lt.s32.totalorder (!%p373_p3), %s1473_s17, 1  ;;  %s1485_s28 = smov (!%p373_p3), 120  }
   0x7   : > { %376 = sbr.rel (%p373_p3) target bundleno = 1733 (0x6c5), region = 64  ;;  %s1486_s29 = smov (!%p373_p3), 112  }
   0x8   : > { %s1487_s13 = smov (!%p373_p3), 104   ;;  %s1489_s22 = smov (!%p373_p3), 96  }
   0x9   : > { %s1490_s23 = smov (!%p373_p3), 72   ;;  %s1492_s25 = smov (!%p373_p3), 8  }
   0xa   : > { %s1493_s30 = smov (!%p373_p3), 16   ;;  %s1494_s12 = smov (!%p373_p3), 24  }
   0xc   : > { %s1734_s17 = smov (!%p423_p4, %s1473_s17), 1  ;;  %vm474_vm0 = vcmask 261120   ;;  %v1432_v7 = vld [vmem:[%s1724_s7 + $0x8] sm:$0xff]   ;;  %v1483_v8 = vmov 0.0   ;;  %v1433_v10 = vld [vmem:[%s1724_s7] sm:$0xff]   ;;  %vm1484_vm1 = vmmov 0   ;;  %v633_v55 = vlaneseq }
   0xd   : > { %s1576_s21 = sshll.u32 %s1734_s17, 3  ;;  %1324 = vmatprep.subr.bf16.mxu0 %v1483_v8  ;;  %1332 = vmatprep.subr.bf16.mxu1 %v1483_v8  ;;  %v1434_v12 = vld [vmem:[%s1722_s5 + $0x8] sm:$0xff]   ;;  %v1435_v13 = vld [vmem:[%s1722_s5] sm:$0xff]   ;;  %vm519_vm4 = vcmask 519168   ;;  %vm638_vm5 = vcmask 64512   ;;  %s436_s16 = scalar_lea.vmem %s1719_s2, %s1734_s17  ;;  %vm705_vm6 = vcmask 1043456  }
   0xe   : > { %s429_s24 = scalar_lea.vmem %s1717_s0, %s1576_s21  ;;  %s433_s27 = scalar_lea.vmem %s1718_s1, %s1576_s21  ;;  %1325 = vmatpush3.bf16.msra.mxu0 %v1432_v7  ;;  %1328 = vmatprep.mubr.msk.bf16.mxu0 %vm1484_vm1, %v1483_v8  ;;  %v1277_v22 = vld [vmem:[%s1720_s3] ss:$0 sm:$0xff]  ;;  %v634_v58 = vshrl.u32 %v633_v55, 7  ;;  %vm865_vm7 = vcmask 130112   ;;  %vm981_vm8 = vcmask 195712   ;;  %vm1097_vm9 = vcmask 261312  }
   0xf   : > { %v1582_v0 = vld [vmem:[%s429_s24] sm:$0xff]  ;;  %1326 = vmatprep.subr.bf16.mxu0 %v1483_v8  ;;  %1336 = vmatprep.mubr.msk.bf16.mxu1 %vm1484_vm1, %v1483_v8  ;;  %s1488_s17 = smov 88   ;;  %s1491_s24 = smov 80  }
  0x10   : > { %v525_v1 = vsel %vm474_vm0, %v1582_v0, 0.0  ;;  %v449_v9 = vld [vmem:[%s433_s27] sm:$0xff]  ;;  %1333 = vmatpush3.bf16.msra.mxu1 %v1434_v12  ;;  %v635_v60 = vsub.s32 0, %v634_v58 }
  0x11   : > { %526 = vadd.xlane.f32.xlu0 %v525_v1  ;;  %v450_v11 = vpack.c.bf16 %v449_v9, %v449_v9  ;;  %1334 = vmatprep.subr.bf16.mxu1 %v1483_v8  ;;  %v1278_v25 = vld [vmem:[%s1721_s4] ss:$0 sm:$0xff] }
  0x12   : > { %1327 = vmatpush3.bf16.msra.mxu0 %v1433_v10  ;;  %v1273_v29 = vld [vmem:[%s1725_s8] ss:$0 sm:$0xff] }
  0x13   : > { %1340 = vmatprep.subr.bf16.mxu0 %v1483_v8  ;;  %v1279_v39 = vld [vmem:[%s1723_s6] ss:$0 sm:$0xff] }
  0x14   : > { %1335 = vmatpush3.bf16.msra.mxu1 %v1435_v13  ;;  %v628_v56 = vld [vmem:[%s436_s16] sm:$0x1] }
  0x15   : > { %1329 = vmatmul.mubr.msk.bf16.vlgmr.msra.gmra.mxu0 %vm474_vm0, %v450_v11  ;;  %1346 = vmatprep.subr.bf16.mxu1 %v1483_v8  ;;  %v1283_v57 = vadd.f32 -1.0, %v628_v56 }
  0x16   : > { %1342 = vmatprep.mubr.msk.bf16.mxu0 %vm1484_vm1, %v1483_v8 }
  0x17   : > { %v630_v59 = vmul.f32 1e+09, %v1283_v57 }
  0x19   : > { %v636_v61 = vrot.slane %v630_v59, %v635_v60 }
  0x9a   : > { %v527_v2 = vpop.xlane.xlu0 %526 }
  0x9b   : > { %v529_v3 = vmul.f32 0.03125, %v527_v2 }
  0x9d   : > { %v530_v4 = vsub.f32 %v1582_v0, %v529_v3 }
  0x9f   : > { %v531_v5 = vmul.f32 %v530_v4, %v530_v4  ;;  %v551_v23 = vmul.f32 %v1277_v22, %v530_v4 }
  0xa1   : > { %v532_v6 = vsel %vm474_vm0, %v531_v5, 0.0 }
  0xa2   : > { %533 = vadd.xlane.f32.xlu0 %v532_v6 }
  0xd5   : > { %v512_v30 = vpop.f32.mrf.mxu0 }
  0xd6   : > { %v513_v31 = vadd.f32 %v1273_v29, %v512_v30 }
  0xd7   : > { %v1330_v32 = vpop.f32.mrf.mxu0 }
  0xd8   : > { %v518_v33 = vpack.c.bf16 %v513_v31, %v513_v31 }
  0xd9   : > { %v515_v34 = vpop.f32.mrf.mxu0 }
  0xda   : > { %520 = vst.msk [vmem:[#allocation2] sm:$0xf] %vm519_vm4, %v518_v33 }
  0xdb   : > { %v1331_v35 = vpop.f32.mrf.mxu0 }
  0xe1   : > { %v631_v36 = vld [vmem:[#allocation2] sm:$0xf] }
  0xe2   : > { %v1629_v37 = vcombine.low %v631_v36, %v631_v36  ;;  %v643_v38 = vsel %vm638_vm5, %v631_v36, 0 }
  0xe3   : > { %1341 = vmatpush3.bf16.xpose.msra.mxu0 %v643_v38 }
  0xe4   : > { %753 = vrot.lane.b32.xlu1 %v1629_v37, %s1485_s28  ;;  %869 = vrot.lane.b32.xlu0 %v1629_v37, %s1486_s29 }
  0xe5   : > { %1352 = vmatprep.subr.bf16.mxu0 %v1483_v8 }
 0x12b   : > { %v534_v14 = vpop.xlane.xlu0 %533 }
 0x12c   : > { %v535_v15 = vmul.f32 0.032258064, %v534_v14 }
 0x12e   : > { %1439 = vrsqrt.f32 %v535_v15  ;;  %vm538_vm2 = vcmp.eq.f32.partialorder %v535_v15, inf  ;;  %v541_v18 = vand.u32 2147483648, %v535_v15  ;;  %vm540_vm3 = vcmp.eq.f32.partialorder %v535_v15, 0.0 }
 0x13b   : > { %v1440_v16 = vpop.eup %1439 }
 0x13c   : > { %v537_v17 = vmul.f32 %v1440_v16, %v535_v15 }
 0x13e   : > { %v539_v19 = vsel %vm538_vm2, %v535_v15, %v537_v17 }
 0x13f   : > { %v542_v20 = vsel %vm540_vm3, %v541_v18, %v539_v19 }
 0x140   : > { %v543_v21 = vadd.f32 1e-06, %v542_v20 }
 0x142   : > { %1441 = vrcp.f32 %v543_v21 }
 0x14f   : > { %v1442_v24 = vpop.eup %1441 }
 0x150   : > { %v552_v26 = vmul.f32 %v1442_v24, %v551_v23 }
 0x152   : > { %v559_v27 = vadd.f32 %v1278_v25, %v552_v26 }
 0x154   : > { %v560_v28 = vpack.c.bf16 %v559_v27, %v559_v27 }
 0x156   : > { %1337 = vmatmul.mubr.msk.bf16.vlgmr.msra.gmra.mxu1 %vm474_vm0, %v560_v28  ;;  %v754_v41 = vpop.permute.xlu1 %753  ;;  %v870_v48 = vpop.permute.xlu0 %869 }
 0x157   : > { %1348 = vmatprep.mubr.msk.bf16.mxu1 %vm1484_vm1, %v1483_v8  ;;  %v759_v45 = vsel %vm638_vm5, %v754_v41, 0  ;;  %v875_v50 = vsel %vm638_vm5, %v870_v48, 0 }
 0x216   : > { %v621_v40 = vpop.f32.mrf.mxu1 }
 0x217   : > { %v622_v42 = vadd.f32 %v1279_v39, %v621_v40 }
 0x218   : > { %v1338_v43 = vpop.f32.mrf.mxu1 }
 0x219   : > { %v627_v44 = vpack.c.bf16 %v622_v42, %v622_v42 }
 0x21a   : > { %v624_v46 = vpop.f32.mrf.mxu1 }
 0x21b   : > { %751 = vrot.lane.b32.xlu1 %v627_v44, %s1485_s28  ;;  %1343 = vmatmul.mubr.msk.bf16.vlgmr.msra.gmra.mxu0 %vm638_vm5, %v627_v44 }
 0x21c   : > { %v1339_v47 = vpop.f32.mrf.mxu1  ;;  %1353 = vmatpush3.bf16.xpose.msra.mxu0 %v759_v45  ;;  %1354 = vmatprep.mubr.msk.bf16.mxu0 %vm1484_vm1, %v1483_v8 }
 0x21d   : > { %1364 = vmatprep.subr.bf16.mxu0 %v1483_v8 }
 0x21f   : > { %867 = vrot.lane.b32.xlu1 %v627_v44, %s1486_s29 }
 0x223   : > { %985 = vrot.lane.b32.xlu1 %v1629_v37, %s1487_s13 }
 0x227   : > { %983 = vrot.lane.b32.xlu1 %v627_v44, %s1487_s13 }
 0x28d   : > { %v752_v49 = vpop.permute.xlu1 %751 }
 0x28e   : > { %1355 = vmatmul.mubr.msk.bf16.vlgmr.msra.gmra.mxu0 %vm638_vm5, %v752_v49 }
 0x28f   : > { %1365 = vmatpush3.bf16.xpose.msra.mxu0 %v875_v50  ;;  %1366 = vmatprep.mubr.msk.bf16.mxu0 %vm1484_vm1, %v1483_v8 }
 0x290   : > { %1376 = vmatprep.subr.bf16.mxu0 %v1483_v8 }
 0x291   : > { %v868_v51 = vpop.permute.xlu1 %867 }
 0x295   : > { %v986_v52 = vpop.permute.xlu1 %985 }
 0x296   : > { %v991_v53 = vsel %vm638_vm5, %v986_v52, 0  ;;  %1367 = vmatmul.mubr.msk.bf16.vlgmr.msra.gmra.mxu0 %vm638_vm5, %v868_v51 }
 0x297   : > { %1377 = vmatpush3.bf16.xpose.msra.mxu0 %v991_v53  ;;  %1378 = vmatprep.mubr.msk.bf16.mxu0 %vm1484_vm1, %v1483_v8 }
 0x298   : > { %1388 = vmatprep.subr.bf16.mxu0 %v1483_v8 }
 0x299   : > { %v984_v54 = vpop.permute.xlu1 %983 }
 0x29e   : > { %1379 = vmatmul.mubr.msk.bf16.vlgmr.msra.gmra.mxu0 %vm638_vm5, %v984_v54 }
 0x29f   : > { %1392 = vmatprep.mubr.msk.bf16.mxu0 %vm1484_vm1, %v1483_v8 }
 0x2db   : > { %v679_v62 = vpop.f32.mrf.mxu0 }
 0x2dc   : > { %v680_v63 = vadd.f32 %v679_v62, %v636_v61 }
 0x2dd   : > { %v1344_v1 = vpop.f32.mrf.mxu0 }
 0x2de   : > { %v685_v2 = vsel %vm638_vm5, %v680_v63, -inf }
 0x2df   : > { %686 = vmax.xlane.f32.xlu1 %v685_v2  ;;  %v682_v3 = vpop.f32.mrf.mxu0 }
 0x2e1   : > { %v1345_v4 = vpop.f32.mrf.mxu0 }
 0x34e   : > { %v795_v5 = vpop.f32.mrf.mxu0 }
 0x34f   : > { %v796_v6 = vadd.f32 %v795_v5, %v636_v61 }
 0x350   : > { %v1356_v7 = vpop.f32.mrf.mxu0 }
 0x351   : > { %v801_v9 = vsel %vm638_vm5, %v796_v6, -inf }
 0x352   : > { %802 = vmax.xlane.f32.xlu0 %v801_v9  ;;  %v798_v10 = vpop.f32.mrf.mxu0 }
 0x354   : > { %v1357_v11 = vpop.f32.mrf.mxu0 }
 0x356   : > { %v911_v12 = vpop.f32.mrf.mxu0 }
 0x357   : > { %v912_v13 = vadd.f32 %v911_v12, %v636_v61 }
 0x358   : > { %v1368_v14 = vpop.f32.mrf.mxu0 }
 0x359   : > { %v917_v15 = vsel %vm638_vm5, %v912_v13, -inf  ;;  %v1437_v14 = vld [vmem:[%s1726_s9 + $0x8] sm:$0xff]  }
 0x35a   : > { %918 = vmax.xlane.f32.xlu1 %v917_v15  ;;  %v914_v16 = vpop.f32.mrf.mxu0  ;;  %1389 = vmatpush3.bf16.msra.mxu0 %v1437_v14 }
 0x35b   : > { %v1438_v16 = vld [vmem:[%s1726_s9] sm:$0xff]   ;;  %1390 = vmatprep.subr.bf16.mxu0 %v1483_v8 }
 0x35c   : > { %v1369_v17 = vpop.f32.mrf.mxu0 }
 0x35e   : > { %v1027_v18 = vpop.f32.mrf.mxu0  ;;  %1391 = vmatpush3.bf16.msra.mxu0 %v1438_v16 }
 0x35f   : > { %v1028_v19 = vadd.f32 %v1027_v18, %v636_v61 }
 0x360   : > { %v1380_v20 = vpop.f32.mrf.mxu0 }
 0x361   : > { %v1033_v21 = vsel %vm638_vm5, %v1028_v19, -inf }
 0x362   : > { %1034 = vmax.xlane.f32.xlu1 %v1033_v21  ;;  %v1030_v22 = vpop.f32.mrf.mxu0 }
 0x364   : > { %v1381_v23 = vpop.f32.mrf.mxu0 }
 0x368   : > { %v687_v24 = vpop.xlane.xlu1 %686 }
 0x369   : > { %v688_v25 = vsub.f32 %v680_v63, %v687_v24 }
 0x36b   : > { %v689_v26 = vmul.f32 1.442695, %v688_v25 }
 0x36d   : > { %1443 = vpow2.f32 %v689_v26 }
 0x37a   : > { %v1444_v27 = vpop.eup %1443 }
 0x37b   : > { %v691_v28 = vsel %vm638_vm5, %v1444_v27, 0.0 }
 0x37c   : > { %692 = vadd.xlane.f32.xlu0 %v691_v28 }
 0x3db   : > { %v803_v29 = vpop.xlane.xlu0 %802 }
 0x3dc   : > { %v804_v30 = vsub.f32 %v796_v6, %v803_v29  ;;  %v1296_v29 = vld [vmem:[%s1727_s10] ss:$0 sm:$0xff] }
 0x3de   : > { %v805_v31 = vmul.f32 1.442695, %v804_v30 }
 0x3e0   : > { %1445 = vpow2.f32 %v805_v31 }
 0x3e3   : > { %v919_v32 = vpop.xlane.xlu1 %918 }
 0x3e4   : > { %v920_v33 = vsub.f32 %v912_v13, %v919_v32 }
 0x3e6   : > { %v921_v34 = vmul.f32 1.442695, %v920_v33 }
 0x3e8   : > { %1447 = vpow2.f32 %v921_v34 }
 0x3eb   : > { %v1035_v40 = vpop.xlane.xlu1 %1034 }
 0x3ec   : > { %v1036_v41 = vsub.f32 %v1028_v19, %v1035_v40 }
 0x3ed   : > { %v1446_v35 = vpop.eup %1445 }
 0x3ee   : > { %v807_v36 = vsel %vm638_vm5, %v1446_v35, 0.0  ;;  %v1037_v42 = vmul.f32 1.442695, %v1036_v41 }
 0x3ef   : > { %808 = vadd.xlane.f32.xlu1 %v807_v36 }
 0x3f0   : > { %1449 = vpow2.f32 %v1037_v42 }
 0x3f5   : > { %v1448_v38 = vpop.eup %1447 }
 0x3f6   : > { %v923_v39 = vsel %vm638_vm5, %v1448_v38, 0.0 }
 0x3f7   : > { %924 = vadd.xlane.f32.xlu0 %v923_v39 }
 0x3fd   : > { %v1450_v43 = vpop.eup %1449 }
 0x3fe   : > { %v1039_v44 = vsel %vm638_vm5, %v1450_v43, 0.0 }
 0x400   : > { %813 = vrot.lane.b32.xlu1 %v1629_v37, %s1488_s17  ;;  %s443_s17 = scalar_lea.vmem %s1728_s11, %s1576_s21 }
 0x405   : > { %v693_v45 = vpop.xlane.xlu0 %692 }
 0x406   : > { %1451 = vrcp.f32 %v693_v45 }
 0x40d   : > { %700 = vrot.lane.b32.xlu0 %v1629_v37, %s1489_s22 }
 0x411   : > { %1045 = vrot.lane.b32.xlu0 %v1629_v37, %s1490_s23 }
 0x413   : > { %v1452_v47 = vpop.eup %1451 }
 0x414   : > { %v695_v49 = vmul.f32 %v1452_v47, %v1444_v27 }
 0x416   : > { %v696_v53 = vpack.c.bf16 %v695_v49, %v695_v49 }
 0x424   : > { %1040 = vadd.xlane.f32.xlu1 %v1039_v44 }
 0x435   : > { %929 = vrot.lane.b32.xlu1 %v1629_v37, %s1491_s24 }
 0x478   : > { %v809_v46 = vpop.xlane.xlu1 %808 }
 0x479   : > { %1453 = vrcp.f32 %v809_v46 }
 0x47c   : > { %v814_v52 = vpop.permute.xlu1 %813 }
 0x47d   : > { %v819_v55 = vsel %vm705_vm6, %v814_v52, 0 }
 0x480   : > { %v925_v48 = vpop.xlane.xlu0 %924 }
 0x481   : > { %1455 = vrcp.f32 %v925_v48 }
 0x484   : > { %v701_v50 = vpop.permute.xlu0 %700 }
 0x485   : > { %v707_v51 = vsel %vm705_vm6, %v701_v50, 0 }
 0x486   : > { %1347 = vmatpush3.bf16.msra.mxu1 %v707_v51  ;;  %v1454_v54 = vpop.eup %1453 }
 0x487   : > { %1358 = vmatprep.subr.bf16.mxu1 %v1483_v8  ;;  %v811_v37 = vmul.f32 %v1454_v54, %v1446_v35 }
 0x488   : > { %v1046_v62 = vpop.permute.xlu0 %1045 }
 0x489   : > { %1349 = vmatmul.mubr.msk.bf16.vlgmr.msra.gmra.mxu1 %vm638_vm5, %v696_v53  ;;  %v812_v56 = vpack.c.bf16 %v811_v37, %v811_v37  ;;  %v1051_v1 = vsel %vm705_vm6, %v1046_v62, 0 }
 0x48a   : > { %1359 = vmatpush3.bf16.msra.mxu1 %v819_v55  ;;  %1360 = vmatprep.mubr.msk.bf16.mxu1 %vm1484_vm1, %v1483_v8 }
 0x48b   : > { %1370 = vmatprep.subr.bf16.mxu1 %v1483_v8 }
 0x48e   : > { %v1456_v57 = vpop.eup %1455 }
 0x48f   : > { %v927_v59 = vmul.f32 %v1456_v57, %v1448_v38 }
 0x491   : > { %1361 = vmatmul.mubr.msk.bf16.vlgmr.msra.gmra.mxu1 %vm638_vm5, %v812_v56  ;;  %v928_v63 = vpack.c.bf16 %v927_v59, %v927_v59 }
 0x492   : > { %1372 = vmatprep.mubr.msk.bf16.mxu1 %vm1484_vm1, %v1483_v8 }
 0x4ad   : > { %v1041_v58 = vpop.xlane.xlu1 %1040 }
 0x4ae   : > { %1457 = vrcp.f32 %v1041_v58 }
 0x4b1   : > { %v930_v60 = vpop.permute.xlu1 %929 }
 0x4b2   : > { %v935_v61 = vsel %vm705_vm6, %v930_v60, 0 }
 0x4b3   : > { %1371 = vmatpush3.bf16.msra.mxu1 %v935_v61 }
 0x4b4   : > { %1382 = vmatprep.subr.bf16.mxu1 %v1483_v8 }
 0x4b6   : > { %1373 = vmatmul.mubr.msk.bf16.vlgmr.msra.gmra.mxu1 %vm638_vm5, %v928_v63 }
 0x4b7   : > { %1383 = vmatpush3.bf16.msra.mxu1 %v1051_v1  ;;  %1384 = vmatprep.mubr.msk.bf16.mxu1 %vm1484_vm1, %v1483_v8 }
 0x4bb   : > { %v1458_v2 = vpop.eup %1457 }
 0x4bc   : > { %v1043_v3 = vmul.f32 %v1458_v2, %v1450_v43 }
 0x4be   : > { %v1044_v4 = vpack.c.bf16 %v1043_v3, %v1043_v3 }
 0x4c0   : > { %1385 = vmatmul.mubr.msk.bf16.vlgmr.msra.gmra.mxu1 %vm638_vm5, %v1044_v4 }
 0x549   : > { %v743_v5 = vpop.f32.mrf.mxu1 }
 0x54a   : > { %749 = vst.msk [vmem:[#allocation3] sm:$0xff] %vm638_vm5, %v743_v5 }
 0x54b   : > { %v1350_v6 = vpop.f32.mrf.mxu1 }
 0x54d   : > { %v746_v7 = vpop.f32.mrf.mxu1 }
 0x54f   : > { %v1351_v9 = vpop.f32.mrf.mxu1 }
 0x551   : > { %v855_v10 = vpop.f32.mrf.mxu1 }
 0x552   : > { %862 = vrot.lane.b32.xlu1 %v855_v10, %s1492_s25 }
 0x553   : > { %v1362_v11 = vpop.f32.mrf.mxu1 }
 0x555   : > { %v858_v12 = vpop.f32.mrf.mxu1 }
 0x557   : > { %v1363_v13 = vpop.f32.mrf.mxu1 }
 0x576   : > { %v971_v15 = vpop.f32.mrf.mxu1 }
 0x577   : > { %978 = vrot.lane.b32.xlu0 %v971_v15, %s1493_s30 }
 0x578   : > { %v1374_v17 = vpop.f32.mrf.mxu1 }
 0x57a   : > { %v974_v18 = vpop.f32.mrf.mxu1 }
 0x57c   : > { %v1375_v19 = vpop.f32.mrf.mxu1 }
 0x580   : > { %v1087_v20 = vpop.f32.mrf.mxu1 }
 0x581   : > { %1094 = vrot.lane.b32.xlu1 %v1087_v20, %s1494_s12 }
 0x582   : > { %v1386_v21 = vpop.f32.mrf.mxu1 }
 0x584   : > { %v1090_v22 = vpop.f32.mrf.mxu1 }
 0x586   : > { %v1387_v23 = vpop.f32.mrf.mxu1 }
 0x5c4   : > { %v863_v24 = vpop.permute.xlu1 %862 }
 0x5c5   : > { %866 = vst.msk [vmem:[#allocation3] sm:$0xff] %vm865_vm7, %v863_v24 }
 0x5e9   : > { %v979_v25 = vpop.permute.xlu0 %978 }
 0x5ea   : > { %982 = vst.msk [vmem:[#allocation3] sm:$0xff] %vm981_vm8, %v979_v25 }
 0x5f3   : > { %v1095_v26 = vpop.permute.xlu1 %1094 }
 0x5f4   : > { %1098 = vst.msk [vmem:[#allocation3] sm:$0xff] %vm1097_vm9, %v1095_v26 }
 0x5fb   : > { %v1099_v8 = vld [vmem:[#allocation3] sm:$0xff] }
 0x5fc   : > { %v1100_v27 = vpack.c.bf16 %v1099_v8, %v1099_v8 }
 0x5fe   : > { %1393 = vmatmul.mubr.msk.bf16.vlgmr.msra.gmra.mxu0 %vm474_vm0, %v1100_v27 }
 0x6be   : > { %v1154_v28 = vpop.f32.mrf.mxu0 }
 0x6bf   : > { %v1160_v30 = vadd.f32 %v1154_v28, %v1582_v0 }
 0x6c0   : > { %v1394_v31 = vpop.f32.mrf.mxu0 }
 0x6c1   : > { %v1168_v32 = vadd.f32 %v1296_v29, %v1160_v30 }
 0x6c2   : > { %v1157_v33 = vpop.f32.mrf.mxu0 }
 0x6c3   : > { %1169 = vst.msk [vmem:[%s443_s17] sm:$0xff] %vm474_vm0, %v1168_v32 }
 0x6c4   : > { %v1395_v34 = vpop.f32.mrf.mxu0 }
 0x6c5 PF: > { %s21_s19 = sadd.s32 1, %s1481_s19   ;;  %s1729_s17 = smov %s1477_s18 }
 0x6c6   : > { %p18_p5 = scmp.ge.s32.totalorder %s21_s19, 4   ;;  %s1730_s18 = smov %s1732_s20 }
 0x6c8   :  { %20 = sbr.rel (!%p18_p5) target bundleno = 2 (0x2), region = 104 }

</bundles_post_ra>
